<compile_context>
chip_gen: v5e
topology: v5e:2x2
jax: 0.10.0
libtpu: 0.0.40
codegen_flags: <defaults>
</compile_context>

<pallas_src>
import math
import numpy as np
import jax
import jax.numpy as jnp
from jax import lax
from jax.experimental import pallas as pl
from jax.experimental.pallas import tpu as pltpu

# ----------------------------- configuration --------------------------------
DIM         = 32          # C
H = W       = 8           # input_resolution
NUM_HEADS   = 4
WINDOW_SIZE = 4
SHIFT_SIZE  = 2
MLP_RATIO   = 4.0
BATCH       = 2

HEAD_DIM = DIM // NUM_HEADS
SCALE    = HEAD_DIM ** (-0.5)
N_TOK    = WINDOW_SIZE * WINDOW_SIZE              # tokens per window
N_WIN    = (H // WINDOW_SIZE) * (W // WINDOW_SIZE)
L_TOK    = H * W                                  # tokens per image
T_TOK    = BATCH * L_TOK                          # total tokens in the fused call
HIDDEN   = int(DIM * MLP_RATIO)
LN_EPS   = 1e-5
NEG_INF  = -1e9                                   # cross-window / cross-batch mask


# ------------------------- window helpers (host / reference) -----------------
def window_partition(x, ws):
    B, Hh, Ww, C = x.shape
    x = x.reshape(B, Hh // ws, ws, Ww // ws, ws, C)
    return x.transpose(0, 1, 3, 2, 4, 5).reshape(-1, ws, ws, C)


def window_reverse(windows, ws, Hh, Ww):
    B = windows.shape[0] // (Hh * Ww // ws // ws)
    x = windows.reshape(B, Hh // ws, Ww // ws, ws, ws, -1)
    return x.transpose(0, 1, 3, 2, 4, 5).reshape(B, Hh, Ww, -1)


def make_relative_position_index(ws):
    coords = np.stack(np.meshgrid(np.arange(ws), np.arange(ws), indexing="ij"))
    coords_flatten = coords.reshape(2, -1)
    rel = coords_flatten[:, :, None] - coords_flatten[:, None, :]
    rel = rel.transpose(1, 2, 0).astype(np.int64)
    rel[:, :, 0] += ws - 1
    rel[:, :, 1] += ws - 1
    rel[:, :, 0] *= 2 * ws - 1
    return rel.sum(-1)                             # (N, N)


def make_attn_mask(Hh, Ww, ws, shift):
    img_mask = np.zeros((1, Hh, Ww, 1), dtype=np.float32)
    h_slices = (slice(0, -ws), slice(-ws, -shift), slice(-shift, None))
    w_slices = (slice(0, -ws), slice(-ws, -shift), slice(-shift, None))
    cnt = 0
    for hs in h_slices:
        for wsl in w_slices:
            img_mask[:, hs, wsl, :] = cnt
            cnt += 1
    mw = window_partition(img_mask, ws).reshape(-1, ws * ws)
    attn_mask = mw[:, None, :] - mw[:, :, None]
    attn_mask = np.where(attn_mask != 0, -100.0, 0.0).astype(np.float32)
    return attn_mask                               # (nW, N, N)


def make_image_bias(rel_bias, attn_mask):
    """Fold shift + window partition into a per-image (nh, L, L) attention bias.

    rel_bias : (nh, N, N)  relative-position bias per head (numpy, f32)
    attn_mask: (nW, N, N)  module's 0 / -100 shift mask (numpy, f32)
    Same-shifted-window pairs get rel_bias + shift mask; other same-image pairs
    get -1e9 (exactly 0 after softmax).  Identical for every batch image.
    """
    ws, s = WINDOW_SIZE, SHIFT_SIZE
    r = np.arange(H)[:, None]
    c = np.arange(W)[None, :]
    rs = (r - s) % H                               # shifted row of original token
    cs = (c - s) % W                               # shifted col of original token
    win = ((rs // ws) * (W // ws) + (cs // ws)).reshape(-1)     # (L,) window id
    loc = ((rs % ws) * ws + (cs % ws)).reshape(-1)              # (L,) local id

    same = win[:, None] == win[None, :]                          # (L, L)
    per_pair = (rel_bias[:, loc[:, None], loc[None, :]]
                + attn_mask[win[:, None], loc[:, None], loc[None, :]][None])  # (nh,L,L)
    return np.where(same[None], per_pair, NEG_INF).astype(np.float32)


# ------------------------------ fused Pallas kernel --------------------------
def _swin_block_kernel(x_ref, bias_ref, w_ref, w2_ref, vec_ref, b1m_ref, o_ref):
    # Layout: channels on sublanes, tokens on lanes -> every tensor lane-dense.
    xT = x_ref[...]                                # (C, T) f32, T = B*L = 128

    g1  = vec_ref[:, 0:1]                          # (C, 1) per-channel columns
    b1  = vec_ref[:, 1:2]
    g2  = vec_ref[:, 2:3]
    b2  = vec_ref[:, 3:4]
    bpj = vec_ref[:, 4:5]
    b2m = vec_ref[:, 5:6]

    # ---------------- norm1 (over channel axis 0) ----------------
    mu  = jnp.mean(xT, axis=0, keepdims=True)      # (1, T)
    xc  = xT - mu
    var = jnp.mean(xc * xc, axis=0, keepdims=True)
    xn  = xc * lax.rsqrt(var + LN_EPS) * g1 + b1   # (C, T)

    # ------------- fused qkv for all heads (scale folded into wq) -------------
    # w_ref rows: [wq^T*scale (C) ; wk^T (C) ; wv^T (C) ; wproj^T (C) ; w1^T (HIDDEN)]
    qkvT = jnp.dot(w_ref[0:3 * DIM, :], xn,
                   preferred_element_type=jnp.float32)           # (3C, T)

    # cross-batch mask (in-kernel iota -> 0 HBM bytes), shared across heads
    row_img = lax.broadcasted_iota(jnp.int32, (T_TOK, T_TOK), 0) >= L_TOK
    col_img = lax.broadcasted_iota(jnp.int32, (T_TOK, T_TOK), 1) >= L_TOK
    neg3 = jnp.where(row_img == col_img,
                     jnp.float32(0.0), jnp.float32(NEG_INF)).reshape(2, L_TOK, T_TOK)

    # ---------- attention: window/shift structure folded into the bias -------
    head_outs = []
    for h in range(NUM_HEADS):                     # unrolled; clean sublane slices
        qh = qkvT[h * HEAD_DIM:(h + 1) * HEAD_DIM, :]                    # (hd, T)
        kh = qkvT[DIM + h * HEAD_DIM:DIM + (h + 1) * HEAD_DIM, :]        # (hd, T)
        vh = qkvT[2 * DIM + h * HEAD_DIM:2 * DIM + (h + 1) * HEAD_DIM, :]

        # scores (T, T), lane-dense: contract the head dim of q^T / k^T
        s = lax.dot_general(qh, kh, (((0,), (0,)), ((), ())),
                            preferred_element_type=jnp.float32)          # (T, T)
        # add per-image bias (bf16 -> f32) via a free leading-axis broadcast,
        # plus the cross-batch -inf mask
        s = (s.reshape(2, L_TOK, T_TOK)
             + bias_ref[h].astype(jnp.float32)[None]
             + neg3)                                                     # (2, L, T)
        s = s - jnp.max(s, axis=-1, keepdims=True)
        e = jnp.exp(s)
        p = e * pl.reciprocal(jnp.sum(e, axis=-1, keepdims=True), approx=True)
        p = p.reshape(T_TOK, T_TOK)
        # o_h^T = V_h^T P^T : contract the 128-deep key axis (one deep matmul)
        head_outs.append(lax.dot_general(vh, p, (((1,), (1,)), ((), ())),
                                         preferred_element_type=jnp.float32))
    attn_T = jnp.concatenate(head_outs, axis=0)    # (C, T), sublane-aligned concat

    # output projection: one depth-32 matmul, bias added once
    yT = jnp.dot(w_ref[3 * DIM:4 * DIM, :], attn_T,
                 preferred_element_type=jnp.float32) + bpj               # (C, T)

    # ---------------- residual 1 ----------------
    x1 = xT + yT

    # ---------------- norm2 + MLP + residual 2 ----------------
    mu2  = jnp.mean(x1, axis=0, keepdims=True)
    xc2  = x1 - mu2
    var2 = jnp.mean(xc2 * xc2, axis=0, keepdims=True)
    x1n  = xc2 * lax.rsqrt(var2 + LN_EPS) * g2 + b2

    hT = jnp.dot(w_ref[4 * DIM:4 * DIM + HIDDEN, :], x1n,
                 preferred_element_type=jnp.float32) + b1m_ref[...]      # (HIDDEN, T)
    hT = 0.5 * hT * (1.0 + lax.erf(hT * (1.0 / math.sqrt(2.0))))         # exact GELU
    zT = jnp.dot(w2_ref[...], hT, preferred_element_type=jnp.float32) + b2m

    o_ref[...] = (x1 + zT).astype(o_ref.dtype)     # (C, T) unmasked full-lane store


def swin_block_forward(x, params):
    B, L, C = x.shape
    assert B == BATCH and L == H * W and C == DIM, "shape/config mismatch"
    T = B * L

    xT = x.reshape(T, C).T                         # wrapper-side layout plumbing

    outT = pl.pallas_call(
        _swin_block_kernel,
        out_shape=jax.ShapeDtypeStruct((C, T), x.dtype),
        grid=(1,),                                 # single fused step: all data in VMEM
        in_specs=[
            pl.BlockSpec((C, T), lambda i: (0, 0)),                       # x^T
            pl.BlockSpec((NUM_HEADS, L_TOK, T), lambda i: (0, 0, 0)),     # bias (bf16)
            pl.BlockSpec((4 * C + HIDDEN, C), lambda i: (0, 0)),          # weight slab
            pl.BlockSpec((C, HIDDEN), lambda i: (0, 0)),                  # w2^T
            pl.BlockSpec((C, 6), lambda i: (0, 0)),                       # vec slab
            pl.BlockSpec((HIDDEN, 1), lambda i: (0, 0)),                  # b1_mlp column
        ],
        out_specs=pl.BlockSpec((C, T), lambda i: (0, 0)),
        compiler_params=pltpu.CompilerParams(dimension_semantics=("arbitrary",)),
    )(xT, params["bias_tiled"], params["w_stack"], params["w2_t"],
      params["vecs"], params["b1m_col"])

    return outT.T.reshape(B, L, C)


# --------------------------- pure-JAX reference ------------------------------
def swin_block_reference(x, params):
    B, L, C = x.shape

    def ln(z, g, b):
        mu = jnp.mean(z, -1, keepdims=True)
        var = jnp.mean((z - mu) ** 2, -1, keepdims=True)
        return (z - mu) * lax.rsqrt(var + LN_EPS) * g + b

    shortcut = x
    y = ln(x, params["g1"], params["b1"]).reshape(B, H, W, C)
    if SHIFT_SIZE > 0:
        y = jnp.roll(y, shift=(-SHIFT_SIZE, -SHIFT_SIZE), axis=(1, 2))
    xw = window_partition(y, WINDOW_SIZE).reshape(-1, N_TOK, C)

    qkv = xw @ params["w_qkv"]                                        # (nWB, N, 3C)
    qkv = qkv.reshape(-1, N_TOK, 3, NUM_HEADS, HEAD_DIM).transpose(2, 0, 3, 1, 4)
    q, k, v = qkv[0] * SCALE, qkv[1], qkv[2]                          # (nWB, nh, N, hd)
    attn = jnp.einsum("bhqd,bhkd->bhqk", q, k)
    bias = params["bias_all"][jnp.arange(xw.shape[0]) % N_WIN]        # (nWB, nh, N, N)
    attn = jax.nn.softmax(attn + bias, axis=-1)
    o = jnp.einsum("bhqk,bhkd->bhqd", attn, v).transpose(0, 2, 1, 3).reshape(-1, N_TOK, C)
    o = o @ params["w_proj"] + params["b_proj"]

    o = o.reshape(-1, WINDOW_SIZE, WINDOW_SIZE, C)
    y = window_reverse(o, WINDOW_SIZE, H, W)
    if SHIFT_SIZE > 0:
        y = jnp.roll(y, shift=(SHIFT_SIZE, SHIFT_SIZE), axis=(1, 2))
    x1 = shortcut + y.reshape(B, L, C)

    z = ln(x1, params["g2"], params["b2"])
    hdn = jax.nn.gelu(z @ params["w1"] + params["b1_mlp"], approximate=False)
    return x1 + (hdn @ params["w2"] + params["b2_mlp"])


# ---------------------------------- main -------------------------------------
if __name__ == "__main__":
    key = jax.random.PRNGKey(0)
    keys = jax.random.split(key, 10)

    # Deterministic synthetic parameters (shapes follow the PyTorch module).
    g1 = jnp.ones((DIM,), jnp.float32)
    b1 = jnp.zeros((DIM,), jnp.float32)
    g2 = jnp.ones((DIM,), jnp.float32)
    b2 = jnp.zeros((DIM,), jnp.float32)
    w_qkv = jax.random.normal(keys[0], (DIM, 3 * DIM), jnp.float32) * 0.05
    w_proj = jax.random.normal(keys[1], (DIM, DIM), jnp.float32) * 0.05
    b_proj = jax.random.normal(keys[2], (DIM,), jnp.float32) * 0.02
    rpb_table = jax.random.normal(
        keys[3], ((2 * WINDOW_SIZE - 1) * (2 * WINDOW_SIZE - 1), NUM_HEADS),
        jnp.float32) * 0.02
    w1 = jax.random.normal(keys[4], (DIM, HIDDEN), jnp.float32) * 0.05
    b1_mlp = jax.random.normal(keys[5], (HIDDEN,), jnp.float32) * 0.02
    w2 = jax.random.normal(keys[6], (HIDDEN, DIM), jnp.float32) * 0.05
    b2_mlp = jax.random.normal(keys[7], (DIM,), jnp.float32) * 0.02

    # relative-position bias + shift mask (host precompute)
    rel_idx = make_relative_position_index(WINDOW_SIZE)              # (N, N)
    rel_bias = np.asarray(rpb_table)[rel_idx.reshape(-1)]
    rel_bias = rel_bias.reshape(N_TOK, N_TOK, NUM_HEADS).transpose(2, 0, 1)   # (nh,N,N)
    attn_mask = make_attn_mask(H, W, WINDOW_SIZE, SHIFT_SIZE)        # (nW, N, N)

    # reference: per-window bias (nW, nh, N, N)
    bias_all = jnp.asarray(rel_bias[None, :, :, :] + attn_mask[:, None, :, :])

    # kernel: per-image (nh, L, L) bias, tiled along the key axis to (nh, L, 2L),
    # stored in bf16 (64 KiB vs the old 256 KiB dense full bias).
    bias_img = make_image_bias(rel_bias, attn_mask)                  # (nh, L, L) f32
    bias_tiled = jnp.asarray(np.concatenate([bias_img, bias_img], axis=-1),
                             dtype=jnp.bfloat16)                     # (nh, L, 2L)

    # pack weights: [wq^T*scale ; wk^T ; wv^T ; wproj^T ; w1^T]  -> (4C+HIDDEN, C)
    w_qkv_np = np.asarray(w_qkv)
    w_stack = jnp.asarray(np.concatenate(
        [(w_qkv_np[:, :DIM] * SCALE).T,
         w_qkv_np[:, DIM:2 * DIM].T,
         w_qkv_np[:, 2 * DIM:].T,
         np.asarray(w_proj).T,
         np.asarray(w1).T], axis=0), jnp.float32)                    # (256, 32)
    w2_t = jnp.asarray(np.asarray(w2).T)                             # (C, HIDDEN)

    # pack the six per-channel vectors as columns of one (C, 6) slab
    vecs = jnp.stack([g1, b1, g2, b2, b_proj, b2_mlp], axis=1)       # (32, 6)
    b1m_col = b1_mlp.reshape(HIDDEN, 1)                              # (128, 1)

    params = dict(g1=g1, b1=b1, g2=g2, b2=b2,
                  w_qkv=w_qkv, w_proj=w_proj, b_proj=b_proj,
                  bias_all=bias_all, bias_tiled=bias_tiled,
                  w1=w1, b1_mlp=b1_mlp, w2=w2, b2_mlp=b2_mlp,
                  w_stack=w_stack, w2_t=w2_t, vecs=vecs, b1m_col=b1m_col)

    x = jax.random.normal(keys[8], (BATCH, H * W, DIM), jnp.float32)

    fwd = jax.jit(swin_block_forward)
    out = jax.block_until_ready(fwd(x, params))
    ref = jax.block_until_ready(swin_block_reference(x, params))

    # 1e-3 tolerance covers the EUP approximate reciprocal and the bf16 bias.
    np.testing.assert_allclose(np.asarray(out), np.asarray(ref), rtol=1e-3, atol=1e-3)
    print("KERNEL_OK")
</pallas_src>

<mosaic_0001>
module attributes {stable_mosaic.version = 11 : i64} {
  func.func @_swin_block_kernel(%arg0: i32, %arg1: memref<32x128xf32, #tpu.memory_space<vmem>>, %arg2: memref<4x64x128xbf16, #tpu.memory_space<vmem>>, %arg3: memref<256x32xf32, #tpu.memory_space<vmem>>, %arg4: memref<32x128xf32, #tpu.memory_space<vmem>>, %arg5: memref<32x6xf32, #tpu.memory_space<vmem>>, %arg6: memref<128x1xf32, #tpu.memory_space<vmem>>, %arg7: memref<32x128xf32, #tpu.memory_space<vmem>>) attributes {dimension_semantics = [#tpu.dimension_semantics<arbitrary>], iteration_bounds = array<i64: 1>, scalar_prefetch = 0 : i64, scratch_operands = 0 : i64, tpu.core_type = #tpu.core_type<tc>, window_params = [{pipeline_mode = #tpu.pipeline_mode<synchronous>, transform_indices = @transform_0, window_bounds = array<i64: 32, 128>}, {pipeline_mode = #tpu.pipeline_mode<synchronous>, transform_indices = @transform_1, window_bounds = array<i64: 4, 64, 128>}, {pipeline_mode = #tpu.pipeline_mode<synchronous>, transform_indices = @transform_2, window_bounds = array<i64: 256, 32>}, {pipeline_mode = #tpu.pipeline_mode<synchronous>, transform_indices = @transform_3, window_bounds = array<i64: 32, 128>}, {pipeline_mode = #tpu.pipeline_mode<synchronous>, transform_indices = @transform_4, window_bounds = array<i64: 32, 6>}, {pipeline_mode = #tpu.pipeline_mode<synchronous>, transform_indices = @transform_5, window_bounds = array<i64: 128, 1>}, {pipeline_mode = #tpu.pipeline_mode<synchronous>, transform_indices = @transform_6, window_bounds = array<i64: 32, 128>}]} {
    %c0 = arith.constant 0 : index
    %c0_0 = arith.constant 0 : index
    %0 = vector.load %arg1[%c0, %c0_0] : memref<32x128xf32, #tpu.memory_space<vmem>>, vector<32x128xf32>
    %c0_1 = arith.constant 0 : index
    %c0_2 = arith.constant 0 : index
    %1 = vector.load %arg5[%c0_1, %c0_2] : memref<32x6xf32, #tpu.memory_space<vmem>>, vector<32x1xf32>
    %c0_3 = arith.constant 0 : index
    %c1 = arith.constant 1 : index
    %2 = vector.load %arg5[%c0_3, %c1] : memref<32x6xf32, #tpu.memory_space<vmem>>, vector<32x1xf32>
    %c0_4 = arith.constant 0 : index
    %c2 = arith.constant 2 : index
    %3 = vector.load %arg5[%c0_4, %c2] : memref<32x6xf32, #tpu.memory_space<vmem>>, vector<32x1xf32>
    %c0_5 = arith.constant 0 : index
    %c3 = arith.constant 3 : index
    %4 = vector.load %arg5[%c0_5, %c3] : memref<32x6xf32, #tpu.memory_space<vmem>>, vector<32x1xf32>
    %c0_6 = arith.constant 0 : index
    %c4 = arith.constant 4 : index
    %5 = vector.load %arg5[%c0_6, %c4] : memref<32x6xf32, #tpu.memory_space<vmem>>, vector<32x1xf32>
    %c0_7 = arith.constant 0 : index
    %c5 = arith.constant 5 : index
    %6 = vector.load %arg5[%c0_7, %c5] : memref<32x6xf32, #tpu.memory_space<vmem>>, vector<32x1xf32>
    %cst = arith.constant dense<0.000000e+00> : vector<128xf32>
    %7 = vector.multi_reduction <add>, %0, %cst [0] : vector<32x128xf32> to vector<128xf32>
    %8 = vector.shape_cast %7 : vector<128xf32> to vector<1x128xf32>
    %cst_8 = arith.constant 3.200000e+01 : f32
    %9 = vector.broadcast %cst_8 : f32 to vector<1x128xf32>
    %10 = arith.divf %8, %9 : vector<1x128xf32>
    %11 = vector.broadcast %10 : vector<1x128xf32> to vector<32x128xf32>
    %12 = arith.subf %0, %11 : vector<32x128xf32>
    %13 = arith.mulf %12, %12 : vector<32x128xf32>
    %cst_9 = arith.constant dense<0.000000e+00> : vector<128xf32>
    %14 = vector.multi_reduction <add>, %13, %cst_9 [0] : vector<32x128xf32> to vector<128xf32>
    %15 = vector.shape_cast %14 : vector<128xf32> to vector<1x128xf32>
    %cst_10 = arith.constant 3.200000e+01 : f32
    %16 = vector.broadcast %cst_10 : f32 to vector<1x128xf32>
    %17 = arith.divf %15, %16 : vector<1x128xf32>
    %cst_11 = arith.constant 9.99999974E-6 : f32
    %18 = vector.broadcast %cst_11 : f32 to vector<1x128xf32>
    %19 = arith.addf %17, %18 : vector<1x128xf32>
    %20 = math.rsqrt %19 : vector<1x128xf32>
    %21 = vector.broadcast %20 : vector<1x128xf32> to vector<32x128xf32>
    %22 = arith.mulf %12, %21 : vector<32x128xf32>
    %23 = vector.broadcast %1 : vector<32x1xf32> to vector<32x128xf32>
    %24 = arith.mulf %22, %23 : vector<32x128xf32>
    %25 = vector.broadcast %2 : vector<32x1xf32> to vector<32x128xf32>
    %26 = arith.addf %24, %25 : vector<32x128xf32>
    %c0_12 = arith.constant 0 : index
    %c0_13 = arith.constant 0 : index
    %27 = vector.load %arg3[%c0_12, %c0_13] : memref<256x32xf32, #tpu.memory_space<vmem>>, vector<96x32xf32>
    %cst_14 = arith.constant dense<0.000000e+00> : vector<96x128xf32>
    %28 = tpu.matmul %27, %26, %cst_14 {dimension_numbers = #tpu.dot_dimension_numbers<[1], [0], [0], [1], [0, 0, 1, 1], [], []>} : vector<96x32xf32>, vector<32x128xf32>, vector<96x128xf32> -> vector<96x128xf32>
    %29 = tpu.iota {dimensions = array<i32: 0>} : vector<128x128xi32>
    %c64_i32 = arith.constant 64 : i32
    %30 = vector.broadcast %c64_i32 : i32 to vector<128x128xi32>
    %31 = arith.cmpi sge, %29, %30 : vector<128x128xi32>
    %32 = tpu.iota {dimensions = array<i32: 1>} : vector<128x128xi32>
    %c64_i32_15 = arith.constant 64 : i32
    %33 = vector.broadcast %c64_i32_15 : i32 to vector<128x128xi32>
    %34 = arith.cmpi sge, %32, %33 : vector<128x128xi32>
    %35 = arith.xori %31, %34 : vector<128x128xi1>
    %cst_16 = arith.constant dense<true> : vector<128x128xi1>
    %36 = arith.xori %35, %cst_16 : vector<128x128xi1>
    %cst_17 = arith.constant 0.000000e+00 : f32
    %cst_18 = arith.constant -1.000000e+09 : f32
    %37 = vector.broadcast %cst_17 : f32 to vector<128x128xf32>
    %38 = vector.broadcast %cst_18 : f32 to vector<128x128xf32>
    %39 = arith.select %36, %37, %38 : vector<128x128xi1>, vector<128x128xf32>
    %40 = vector.shape_cast %39 : vector<128x128xf32> to vector<2x64x128xf32>
    %41 = vector.extract_strided_slice %28 {offsets = [0, 0], sizes = [8, 128], strides = [1, 1]} : vector<96x128xf32> to vector<8x128xf32>
    %42 = vector.extract_strided_slice %28 {offsets = [32, 0], sizes = [8, 128], strides = [1, 1]} : vector<96x128xf32> to vector<8x128xf32>
    %43 = vector.extract_strided_slice %28 {offsets = [64, 0], sizes = [8, 128], strides = [1, 1]} : vector<96x128xf32> to vector<8x128xf32>
    %cst_19 = arith.constant dense<0.000000e+00> : vector<128x128xf32>
    %44 = tpu.matmul %41, %42, %cst_19 {dimension_numbers = #tpu.dot_dimension_numbers<[0], [0], [1], [1], [0, 1, 1, 1], [], []>} : vector<8x128xf32>, vector<8x128xf32>, vector<128x128xf32> -> vector<128x128xf32>
    %45 = vector.shape_cast %44 : vector<128x128xf32> to vector<2x64x128xf32>
    %c0_20 = arith.constant 0 : index
    %c0_21 = arith.constant 0 : index
    %c0_22 = arith.constant 0 : index
    %46 = vector.load %arg2[%c0_20, %c0_21, %c0_22] : memref<4x64x128xbf16, #tpu.memory_space<vmem>>, vector<1x64x128xbf16>
    %47 = vector.shape_cast %46 : vector<1x64x128xbf16> to vector<64x128xbf16>
    %48 = arith.extf %47 : vector<64x128xbf16> to vector<64x128xf32>
    %49 = vector.shape_cast %48 : vector<64x128xf32> to vector<1x64x128xf32>
    %50 = vector.broadcast %49 : vector<1x64x128xf32> to vector<2x64x128xf32>
    %51 = arith.addf %45, %50 : vector<2x64x128xf32>
    %52 = arith.addf %51, %40 : vector<2x64x128xf32>
    %cst_23 = arith.constant dense<0xFF800000> : vector<2x64xf32>
    %53 = vector.multi_reduction <maximumf>, %52, %cst_23 [2] : vector<2x64x128xf32> to vector<2x64xf32>
    %54 = vector.shape_cast %53 : vector<2x64xf32> to vector<2x64x1xf32>
    %55 = vector.broadcast %54 : vector<2x64x1xf32> to vector<2x64x128xf32>
    %56 = arith.subf %52, %55 : vector<2x64x128xf32>
    %57 = math.exp %56 : vector<2x64x128xf32>
    %cst_24 = arith.constant dense<0.000000e+00> : vector<2x64xf32>
    %58 = vector.multi_reduction <add>, %57, %cst_24 [2] : vector<2x64x128xf32> to vector<2x64xf32>
    %59 = vector.shape_cast %58 : vector<2x64xf32> to vector<2x64x1xf32>
    %60 = tpu.reciprocal %59 {approx = true} : vector<2x64x1xf32> -> vector<2x64x1xf32>
    %61 = vector.broadcast %60 : vector<2x64x1xf32> to vector<2x64x128xf32>
    %62 = arith.mulf %57, %61 : vector<2x64x128xf32>
    %63 = vector.shape_cast %62 : vector<2x64x128xf32> to vector<128x128xf32>
    %cst_25 = arith.constant dense<0.000000e+00> : vector<8x128xf32>
    %64 = tpu.matmul %43, %63, %cst_25 {dimension_numbers = #tpu.dot_dimension_numbers<[1], [1], [0], [0], [0, 0, 1, 0], [], []>} : vector<8x128xf32>, vector<128x128xf32>, vector<8x128xf32> -> vector<8x128xf32>
    %65 = vector.extract_strided_slice %28 {offsets = [8, 0], sizes = [8, 128], strides = [1, 1]} : vector<96x128xf32> to vector<8x128xf32>
    %66 = vector.extract_strided_slice %28 {offsets = [40, 0], sizes = [8, 128], strides = [1, 1]} : vector<96x128xf32> to vector<8x128xf32>
    %67 = vector.extract_strided_slice %28 {offsets = [72, 0], sizes = [8, 128], strides = [1, 1]} : vector<96x128xf32> to vector<8x128xf32>
    %cst_26 = arith.constant dense<0.000000e+00> : vector<128x128xf32>
    %68 = tpu.matmul %65, %66, %cst_26 {dimension_numbers = #tpu.dot_dimension_numbers<[0], [0], [1], [1], [0, 1, 1, 1], [], []>} : vector<8x128xf32>, vector<8x128xf32>, vector<128x128xf32> -> vector<128x128xf32>
    %69 = vector.shape_cast %68 : vector<128x128xf32> to vector<2x64x128xf32>
    %c1_27 = arith.constant 1 : index
    %c0_28 = arith.constant 0 : index
    %c0_29 = arith.constant 0 : index
    %70 = vector.load %arg2[%c1_27, %c0_28, %c0_29] : memref<4x64x128xbf16, #tpu.memory_space<vmem>>, vector<1x64x128xbf16>
    %71 = vector.shape_cast %70 : vector<1x64x128xbf16> to vector<64x128xbf16>
    %72 = arith.extf %71 : vector<64x128xbf16> to vector<64x128xf32>
    %73 = vector.shape_cast %72 : vector<64x128xf32> to vector<1x64x128xf32>
    %74 = vector.broadcast %73 : vector<1x64x128xf32> to vector<2x64x128xf32>
    %75 = arith.addf %69, %74 : vector<2x64x128xf32>
    %76 = arith.addf %75, %40 : vector<2x64x128xf32>
    %cst_30 = arith.constant dense<0xFF800000> : vector<2x64xf32>
    %77 = vector.multi_reduction <maximumf>, %76, %cst_30 [2] : vector<2x64x128xf32> to vector<2x64xf32>
    %78 = vector.shape_cast %77 : vector<2x64xf32> to vector<2x64x1xf32>
    %79 = vector.broadcast %78 : vector<2x64x1xf32> to vector<2x64x128xf32>
    %80 = arith.subf %76, %79 : vector<2x64x128xf32>
    %81 = math.exp %80 : vector<2x64x128xf32>
    %cst_31 = arith.constant dense<0.000000e+00> : vector<2x64xf32>
    %82 = vector.multi_reduction <add>, %81, %cst_31 [2] : vector<2x64x128xf32> to vector<2x64xf32>
    %83 = vector.shape_cast %82 : vector<2x64xf32> to vector<2x64x1xf32>
    %84 = tpu.reciprocal %83 {approx = true} : vector<2x64x1xf32> -> vector<2x64x1xf32>
    %85 = vector.broadcast %84 : vector<2x64x1xf32> to vector<2x64x128xf32>
    %86 = arith.mulf %81, %85 : vector<2x64x128xf32>
    %87 = vector.shape_cast %86 : vector<2x64x128xf32> to vector<128x128xf32>
    %cst_32 = arith.constant dense<0.000000e+00> : vector<8x128xf32>
    %88 = tpu.matmul %67, %87, %cst_32 {dimension_numbers = #tpu.dot_dimension_numbers<[1], [1], [0], [0], [0, 0, 1, 0], [], []>} : vector<8x128xf32>, vector<128x128xf32>, vector<8x128xf32> -> vector<8x128xf32>
    %89 = vector.extract_strided_slice %28 {offsets = [16, 0], sizes = [8, 128], strides = [1, 1]} : vector<96x128xf32> to vector<8x128xf32>
    %90 = vector.extract_strided_slice %28 {offsets = [48, 0], sizes = [8, 128], strides = [1, 1]} : vector<96x128xf32> to vector<8x128xf32>
    %91 = vector.extract_strided_slice %28 {offsets = [80, 0], sizes = [8, 128], strides = [1, 1]} : vector<96x128xf32> to vector<8x128xf32>
    %cst_33 = arith.constant dense<0.000000e+00> : vector<128x128xf32>
    %92 = tpu.matmul %89, %90, %cst_33 {dimension_numbers = #tpu.dot_dimension_numbers<[0], [0], [1], [1], [0, 1, 1, 1], [], []>} : vector<8x128xf32>, vector<8x128xf32>, vector<128x128xf32> -> vector<128x128xf32>
    %93 = vector.shape_cast %92 : vector<128x128xf32> to vector<2x64x128xf32>
    %c2_34 = arith.constant 2 : index
    %c0_35 = arith.constant 0 : index
    %c0_36 = arith.constant 0 : index
    %94 = vector.load %arg2[%c2_34, %c0_35, %c0_36] : memref<4x64x128xbf16, #tpu.memory_space<vmem>>, vector<1x64x128xbf16>
    %95 = vector.shape_cast %94 : vector<1x64x128xbf16> to vector<64x128xbf16>
    %96 = arith.extf %95 : vector<64x128xbf16> to vector<64x128xf32>
    %97 = vector.shape_cast %96 : vector<64x128xf32> to vector<1x64x128xf32>
    %98 = vector.broadcast %97 : vector<1x64x128xf32> to vector<2x64x128xf32>
    %99 = arith.addf %93, %98 : vector<2x64x128xf32>
    %100 = arith.addf %99, %40 : vector<2x64x128xf32>
    %cst_37 = arith.constant dense<0xFF800000> : vector<2x64xf32>
    %101 = vector.multi_reduction <maximumf>, %100, %cst_37 [2] : vector<2x64x128xf32> to vector<2x64xf32>
    %102 = vector.shape_cast %101 : vector<2x64xf32> to vector<2x64x1xf32>
    %103 = vector.broadcast %102 : vector<2x64x1xf32> to vector<2x64x128xf32>
    %104 = arith.subf %100, %103 : vector<2x64x128xf32>
    %105 = math.exp %104 : vector<2x64x128xf32>
    %cst_38 = arith.constant dense<0.000000e+00> : vector<2x64xf32>
    %106 = vector.multi_reduction <add>, %105, %cst_38 [2] : vector<2x64x128xf32> to vector<2x64xf32>
    %107 = vector.shape_cast %106 : vector<2x64xf32> to vector<2x64x1xf32>
    %108 = tpu.reciprocal %107 {approx = true} : vector<2x64x1xf32> -> vector<2x64x1xf32>
    %109 = vector.broadcast %108 : vector<2x64x1xf32> to vector<2x64x128xf32>
    %110 = arith.mulf %105, %109 : vector<2x64x128xf32>
    %111 = vector.shape_cast %110 : vector<2x64x128xf32> to vector<128x128xf32>
    %cst_39 = arith.constant dense<0.000000e+00> : vector<8x128xf32>
    %112 = tpu.matmul %91, %111, %cst_39 {dimension_numbers = #tpu.dot_dimension_numbers<[1], [1], [0], [0], [0, 0, 1, 0], [], []>} : vector<8x128xf32>, vector<128x128xf32>, vector<8x128xf32> -> vector<8x128xf32>
    %113 = vector.extract_strided_slice %28 {offsets = [24, 0], sizes = [8, 128], strides = [1, 1]} : vector<96x128xf32> to vector<8x128xf32>
    %114 = vector.extract_strided_slice %28 {offsets = [56, 0], sizes = [8, 128], strides = [1, 1]} : vector<96x128xf32> to vector<8x128xf32>
    %115 = vector.extract_strided_slice %28 {offsets = [88, 0], sizes = [8, 128], strides = [1, 1]} : vector<96x128xf32> to vector<8x128xf32>
    %cst_40 = arith.constant dense<0.000000e+00> : vector<128x128xf32>
    %116 = tpu.matmul %113, %114, %cst_40 {dimension_numbers = #tpu.dot_dimension_numbers<[0], [0], [1], [1], [0, 1, 1, 1], [], []>} : vector<8x128xf32>, vector<8x128xf32>, vector<128x128xf32> -> vector<128x128xf32>
    %117 = vector.shape_cast %116 : vector<128x128xf32> to vector<2x64x128xf32>
    %c3_41 = arith.constant 3 : index
    %c0_42 = arith.constant 0 : index
    %c0_43 = arith.constant 0 : index
    %118 = vector.load %arg2[%c3_41, %c0_42, %c0_43] : memref<4x64x128xbf16, #tpu.memory_space<vmem>>, vector<1x64x128xbf16>
    %119 = vector.shape_cast %118 : vector<1x64x128xbf16> to vector<64x128xbf16>
    %120 = arith.extf %119 : vector<64x128xbf16> to vector<64x128xf32>
    %121 = vector.shape_cast %120 : vector<64x128xf32> to vector<1x64x128xf32>
    %122 = vector.broadcast %121 : vector<1x64x128xf32> to vector<2x64x128xf32>
    %123 = arith.addf %117, %122 : vector<2x64x128xf32>
    %124 = arith.addf %123, %40 : vector<2x64x128xf32>
    %cst_44 = arith.constant dense<0xFF800000> : vector<2x64xf32>
    %125 = vector.multi_reduction <maximumf>, %124, %cst_44 [2] : vector<2x64x128xf32> to vector<2x64xf32>
    %126 = vector.shape_cast %125 : vector<2x64xf32> to vector<2x64x1xf32>
    %127 = vector.broadcast %126 : vector<2x64x1xf32> to vector<2x64x128xf32>
    %128 = arith.subf %124, %127 : vector<2x64x128xf32>
    %129 = math.exp %128 : vector<2x64x128xf32>
    %cst_45 = arith.constant dense<0.000000e+00> : vector<2x64xf32>
    %130 = vector.multi_reduction <add>, %129, %cst_45 [2] : vector<2x64x128xf32> to vector<2x64xf32>
    %131 = vector.shape_cast %130 : vector<2x64xf32> to vector<2x64x1xf32>
    %132 = tpu.reciprocal %131 {approx = true} : vector<2x64x1xf32> -> vector<2x64x1xf32>
    %133 = vector.broadcast %132 : vector<2x64x1xf32> to vector<2x64x128xf32>
    %134 = arith.mulf %129, %133 : vector<2x64x128xf32>
    %135 = vector.shape_cast %134 : vector<2x64x128xf32> to vector<128x128xf32>
    %cst_46 = arith.constant dense<0.000000e+00> : vector<8x128xf32>
    %136 = tpu.matmul %115, %135, %cst_46 {dimension_numbers = #tpu.dot_dimension_numbers<[1], [1], [0], [0], [0, 0, 1, 0], [], []>} : vector<8x128xf32>, vector<128x128xf32>, vector<8x128xf32> -> vector<8x128xf32>
    %137 = tpu.concatenate %64, %88, %112, %136 in 0 : vector<8x128xf32>, vector<8x128xf32>, vector<8x128xf32>, vector<8x128xf32> -> vector<32x128xf32>
    %c96 = arith.constant 96 : index
    %c0_47 = arith.constant 0 : index
    %138 = vector.load %arg3[%c96, %c0_47] : memref<256x32xf32, #tpu.memory_space<vmem>>, vector<32x32xf32>
    %cst_48 = arith.constant dense<0.000000e+00> : vector<32x128xf32>
    %139 = tpu.matmul %138, %137, %cst_48 {dimension_numbers = #tpu.dot_dimension_numbers<[1], [0], [0], [1], [0, 0, 1, 1], [], []>} : vector<32x32xf32>, vector<32x128xf32>, vector<32x128xf32> -> vector<32x128xf32>
    %140 = vector.broadcast %5 : vector<32x1xf32> to vector<32x128xf32>
    %141 = arith.addf %139, %140 : vector<32x128xf32>
    %142 = arith.addf %0, %141 : vector<32x128xf32>
    %cst_49 = arith.constant dense<0.000000e+00> : vector<128xf32>
    %143 = vector.multi_reduction <add>, %142, %cst_49 [0] : vector<32x128xf32> to vector<128xf32>
    %144 = vector.shape_cast %143 : vector<128xf32> to vector<1x128xf32>
    %cst_50 = arith.constant 3.200000e+01 : f32
    %145 = vector.broadcast %cst_50 : f32 to vector<1x128xf32>
    %146 = arith.divf %144, %145 : vector<1x128xf32>
    %147 = vector.broadcast %146 : vector<1x128xf32> to vector<32x128xf32>
    %148 = arith.subf %142, %147 : vector<32x128xf32>
    %149 = arith.mulf %148, %148 : vector<32x128xf32>
    %cst_51 = arith.constant dense<0.000000e+00> : vector<128xf32>
    %150 = vector.multi_reduction <add>, %149, %cst_51 [0] : vector<32x128xf32> to vector<128xf32>
    %151 = vector.shape_cast %150 : vector<128xf32> to vector<1x128xf32>
    %cst_52 = arith.constant 3.200000e+01 : f32
    %152 = vector.broadcast %cst_52 : f32 to vector<1x128xf32>
    %153 = arith.divf %151, %152 : vector<1x128xf32>
    %cst_53 = arith.constant 9.99999974E-6 : f32
    %154 = vector.broadcast %cst_53 : f32 to vector<1x128xf32>
    %155 = arith.addf %153, %154 : vector<1x128xf32>
    %156 = math.rsqrt %155 : vector<1x128xf32>
    %157 = vector.broadcast %156 : vector<1x128xf32> to vector<32x128xf32>
    %158 = arith.mulf %148, %157 : vector<32x128xf32>
    %159 = vector.broadcast %3 : vector<32x1xf32> to vector<32x128xf32>
    %160 = arith.mulf %158, %159 : vector<32x128xf32>
    %161 = vector.broadcast %4 : vector<32x1xf32> to vector<32x128xf32>
    %162 = arith.addf %160, %161 : vector<32x128xf32>
    %c128 = arith.constant 128 : index
    %c0_54 = arith.constant 0 : index
    %163 = vector.load %arg3[%c128, %c0_54] : memref<256x32xf32, #tpu.memory_space<vmem>>, vector<128x32xf32>
    %cst_55 = arith.constant dense<0.000000e+00> : vector<128x128xf32>
    %164 = tpu.matmul %163, %162, %cst_55 {dimension_numbers = #tpu.dot_dimension_numbers<[1], [0], [0], [1], [0, 0, 1, 1], [], []>} : vector<128x32xf32>, vector<32x128xf32>, vector<128x128xf32> -> vector<128x128xf32>
    %c0_56 = arith.constant 0 : index
    %c0_57 = arith.constant 0 : index
    %165 = vector.load %arg6[%c0_56, %c0_57] : memref<128x1xf32, #tpu.memory_space<vmem>>, vector<128x1xf32>
    %166 = vector.broadcast %165 : vector<128x1xf32> to vector<128x128xf32>
    %167 = arith.addf %164, %166 : vector<128x128xf32>
    %cst_58 = arith.constant 5.000000e-01 : f32
    %168 = vector.broadcast %cst_58 : f32 to vector<128x128xf32>
    %169 = arith.mulf %168, %167 : vector<128x128xf32>
    %cst_59 = arith.constant 0.707106769 : f32
    %170 = vector.broadcast %cst_59 : f32 to vector<128x128xf32>
    %171 = arith.mulf %167, %170 : vector<128x128xf32>
    %172 = math.erf %171 : vector<128x128xf32>
    %cst_60 = arith.constant 1.000000e+00 : f32
    %173 = vector.broadcast %cst_60 : f32 to vector<128x128xf32>
    %174 = arith.addf %173, %172 : vector<128x128xf32>
    %175 = arith.mulf %169, %174 : vector<128x128xf32>
    %c0_61 = arith.constant 0 : index
    %c0_62 = arith.constant 0 : index
    %176 = vector.load %arg4[%c0_61, %c0_62] : memref<32x128xf32, #tpu.memory_space<vmem>>, vector<32x128xf32>
    %cst_63 = arith.constant dense<0.000000e+00> : vector<32x128xf32>
    %177 = tpu.matmul %176, %175, %cst_63 {dimension_numbers = #tpu.dot_dimension_numbers<[1], [0], [0], [1], [0, 0, 1, 1], [], []>} : vector<32x128xf32>, vector<128x128xf32>, vector<32x128xf32> -> vector<32x128xf32>
    %178 = vector.broadcast %6 : vector<32x1xf32> to vector<32x128xf32>
    %179 = arith.addf %177, %178 : vector<32x128xf32>
    %180 = arith.addf %142, %179 : vector<32x128xf32>
    %c0_64 = arith.constant 0 : index
    %c0_65 = arith.constant 0 : index
    %181 = vector.load %arg7[%c0_64, %c0_65] : memref<32x128xf32, #tpu.memory_space<vmem>>, vector<32x128xf32>
    tpu.vector_store %arg7[%c0_64, %c0_65], %180 {strides = array<i32>} : memref<32x128xf32, #tpu.memory_space<vmem>>, vector<32x128xf32>,
    return
  }
  func.func @transform_0(%arg0: i32) -> (i32, i32) {
    %c0_i32 = arith.constant 0 : i32
    %c0_i32_0 = arith.constant 0 : i32
    %c0_i32_1 = arith.constant 0 : i32
    return %c0_i32, %c0_i32_0 : i32, i32
  }
  func.func @transform_1(%arg0: i32) -> (i32, i32, i32) {
    %c0_i32 = arith.constant 0 : i32
    %c0_i32_0 = arith.constant 0 : i32
    %c0_i32_1 = arith.constant 0 : i32
    %c0_i32_2 = arith.constant 0 : i32
    return %c0_i32, %c0_i32_0, %c0_i32_1 : i32, i32, i32
  }
  func.func @transform_2(%arg0: i32) -> (i32, i32) {
    %c0_i32 = arith.constant 0 : i32
    %c0_i32_0 = arith.constant 0 : i32
    %c0_i32_1 = arith.constant 0 : i32
    return %c0_i32, %c0_i32_0 : i32, i32
  }
  func.func @transform_3(%arg0: i32) -> (i32, i32) {
    %c0_i32 = arith.constant 0 : i32
    %c0_i32_0 = arith.constant 0 : i32
    %c0_i32_1 = arith.constant 0 : i32
    return %c0_i32, %c0_i32_0 : i32, i32
  }
  func.func @transform_4(%arg0: i32) -> (i32, i32) {
    %c0_i32 = arith.constant 0 : i32
    %c0_i32_0 = arith.constant 0 : i32
    %c0_i32_1 = arith.constant 0 : i32
    return %c0_i32, %c0_i32_0 : i32, i32
  }
  func.func @transform_5(%arg0: i32) -> (i32, i32) {
    %c0_i32 = arith.constant 0 : i32
    %c0_i32_0 = arith.constant 0 : i32
    %c0_i32_1 = arith.constant 0 : i32
    return %c0_i32, %c0_i32_0 : i32, i32
  }
  func.func @transform_6(%arg0: i32) -> (i32, i32) {
    %c0_i32 = arith.constant 0 : i32
    %c0_i32_0 = arith.constant 0 : i32
    %c0_i32_1 = arith.constant 0 : i32
    return %c0_i32, %c0_i32_0 : i32, i32
  }
}

</mosaic_0001>

<bundles_post_ra>
// kernel: swin_block_forward.1
= control target key start
LH: loop header
LB: loop body
LE: loop exit
PB: predicated region body
PF: predicated region fallthrough
CT: control target
= control target key end

     0   :  { %v3440_v0 = vmov 0   ;;  %v3441_v1 = vmov 1   ;;  %v3442_v5 = vmov 32.0   ;;  %vm137_vm4 = vcmask 261120   ;;  %s5565_s4 = inlined_call_operand.vmem [shape: f32[32,6], index: 4, kind: input, shape index: {}]   ;;  %s5566_s0 = inlined_call_operand.vmem [shape: f32[32,128], index: 0, kind: input, shape index: {}]   ;;  %s5567_s2 = inlined_call_operand.vmem [shape: f32[256,32], index: 2, kind: input, shape index: {}]   ;;  %s5568_s1 = inlined_call_operand.vmem [shape: bf16[4,64,128], index: 1, kind: input, shape index: {}]   ;;  %s5569_s5 = inlined_call_operand.vmem [shape: f32[128,1], index: 5, kind: input, shape index: {}]   ;;  %s5570_s3 = inlined_call_operand.vmem [shape: f32[32,128], index: 3, kind: input, shape index: {}]   ;;  %s5571_s6 = inlined_call_operand.vmem [shape: f32[32,128], index: 6, kind: output, shape index: {}]  }
   0x1   :  { %3111 = vset.pattern.permute.xlu0 %v3440_v0  ;;  %3112 = vset.pattern.permute.xlu1 %v3441_v1  ;;  %v30_v2 = vld [vmem:[%s5565_s4 + $0x18] sm:$0xff]  ;;  %v29_v3 = vld [vmem:[%s5565_s4 + $0x10] sm:$0xff]  ;;  %v28_v4 = vld [vmem:[%s5565_s4 + $0x8] sm:$0xff]  ;;  %3134 = vrcp.f32 %v3442_v5  ;;  %vm343_vm5 = vcmask 64512   ;;  %vm3443_vm7 = vmmov 1  }
   0x2   :  { %98 = vperm.xlu0 %3111, %v30_v2   ;;  %118 = vperm.xlu1 %3112, %v30_v2   ;;  %v27_v6 = vld [vmem:[%s5565_s4] sm:$0xff]  ;;  %v24_v10 = vld [vmem:[%s5566_s0 + $0x8] sm:$0xff]  ;;  %v25_v12 = vld [vmem:[%s5566_s0 + $0x10] sm:$0xff] }
   0x3   :  { %3114 = vset.pattern.permute.xlu2 %v3441_v1  ;;  %v23_v9 = vld [vmem:[%s5566_s0] sm:$0xff]  ;;  %v26_v15 = vld [vmem:[%s5566_s0 + $0x18] sm:$0xff] }
   0x4   :  { %114 = vperm.xlu2 %3114, %v29_v3   ;;  %v31_v11 = vadd.f32 %v24_v10, %v23_v9 }
   0x6   :  { %v32_v13 = vadd.f32 %v31_v11, %v25_v12  ;;  %v126_v11 = vld [vmem:[%s5567_s2 + $0x8] sm:$0xff] }
   0x7   :  { %v3135_v7 = vpop.eup %3134 }
   0x8   :  { %v41_v8 = vmul.f32 32.0, %v3135_v7  ;;  %v33_v16 = vadd.f32 %v32_v13, %v26_v15  ;;  %vm45_vm0 = vweird.f32 %v3135_v7  ;;  %v128_v13 = vld [vmem:[%s5567_s2 + $0x18] sm:$0xff] }
   0xa   :  { %93 = vperm.xlu0 %3111, %v29_v3   ;;  %3113 = vset.pattern.permute.xlu1 %v3440_v0  ;;  %v42_v14 = vsub.f32 1.0, %v41_v8  ;;  %v34_v17 = vrot.slane %v33_v16, 4 }
   0xb   :  { %88 = vperm.xlu1 %3113, %v28_v4  }
   0xc   :  { %3115 = vset.pattern.permute.xlu2 %v3440_v0  ;;  %v43_v18 = vmul.f32 %v3135_v7, %v42_v14  ;;  %v35_v19 = vadd.f32 %v34_v17, %v33_v16  ;;  %v129_v14 = vld [vmem:[%s5567_s2 + $0x20] sm:$0xff]  ;;  %v136_v16 = vld [vmem:[%s5567_s2 + $0x58] sm:$0xff] }
   0xd   :  { %83 = vperm.xlu2 %3115, %v27_v6  }
   0xe   :  { %v36_v20 = vrot.slane %v35_v19, 2  ;;  %v44_v21 = vadd.f32 %v3135_v7, %v43_v18 }
  0x10   :  { %v37_v22 = vadd.f32 %v36_v20, %v35_v19  ;;  %v3511_v24 = vsel %vm45_vm0, %v3135_v7, %v44_v21 }
  0x12   :  { %3116 = vset.pattern.permute.xlu0 %v3441_v1  ;;  %v38_v23 = vrot.slane %v37_v22, 1 }
  0x13   :  { %110 = vperm.xlu0 %3116, %v28_v4   ;;  %3117 = vset.pattern.permute.xlu1 %v3441_v1 }
  0x14   :  { %106 = vperm.xlu1 %3117, %v27_v6   ;;  %v39_v25 = vadd.f32 %v38_v23, %v37_v22 }
  0x16   :  { %v47_v26 = vmul.f32 %v3511_v24, %v39_v25 }
  0x18   :  { %v48_v27 = vsub.f32 %v23_v9, %v47_v26  ;;  %v49_v28 = vsub.f32 %v24_v10, %v47_v26  ;;  %v50_v29 = vsub.f32 %v25_v12, %v47_v26  ;;  %v51_v32 = vsub.f32 %v26_v15, %v47_v26  ;;  %v125_v10 = vld [vmem:[%s5567_s2] sm:$0xff]  ;;  %v127_v12 = vld [vmem:[%s5567_s2 + $0x10] sm:$0xff] }
  0x1a   :  { %v52_v30 = vmul.f32 %v48_v27, %v48_v27  ;;  %v53_v31 = vmul.f32 %v49_v28, %v49_v28  ;;  %v54_v33 = vmul.f32 %v50_v29, %v50_v29  ;;  %v55_v35 = vmul.f32 %v51_v32, %v51_v32 }
  0x1c   :  { %v56_v34 = vadd.f32 %v53_v31, %v52_v30 }
  0x1e   :  { %v57_v36 = vadd.f32 %v56_v34, %v54_v33 }
  0x20   :  { %v58_v37 = vadd.f32 %v57_v36, %v55_v35 }
  0x22   :  { %v59_v38 = vrot.slane %v58_v37, 4 }
  0x24   :  { %v60_v39 = vadd.f32 %v59_v38, %v58_v37 }
  0x26   :  { %v61_v40 = vrot.slane %v60_v39, 2 }
  0x28   :  { %v62_v41 = vadd.f32 %v61_v40, %v60_v39  ;;  %v3567_v39 = vld [vmem:[%s5568_s1] sm:$0xff]  }
  0x29   :  { %v3020_v40 = vunpack.c.h.bf16 %v3567_v39 }
  0x2a   :  { %v63_v42 = vrot.slane %v62_v41, 1 }
  0x2c   :  { %v64_v43 = vadd.f32 %v63_v42, %v62_v41 }
  0x2e   :  { %v65_v44 = vmul.f32 %v64_v43, %v3511_v24  ;;  %v3081_v43 = vld [vmem:[%s5568_s1 + $0x8] sm:$0xff]  }
  0x30   :  { %v66_v45 = vadd.f32 1e-05, %v65_v44  ;;  %v3023_v44 = vunpack.c.l.bf16 %v3081_v43 }
  0x32   :  { %3136 = vrsqrt.f32 %v66_v45  ;;  %vm73_vm1 = vweird.f32 %v66_v45 }
  0x38   :  { %v3137_v46 = vpop.eup %3136 }
  0x39   :  { %v68_v47 = vmul.f32 %v3137_v46, %v66_v45  ;;  %vm74_vm2 = vweird.f32 %v3137_v46 }
  0x3a   :  { %vm75_vm3 = vmor %vm73_vm1, %vm74_vm2 }
  0x3b   :  { %v69_v48 = vmul.f32 %v3137_v46, %v68_v47 }
  0x3d   :  { %v70_v49 = vmul.f32 0.5, %v69_v48  ;;  %v3024_v48 = vunpack.c.h.bf16 %v3081_v43 }
  0x3f   :  { %v71_v50 = vsub.f32 1.5, %v70_v49 }
  0x41   :  { %v72_v51 = vmul.f32 %v3137_v46, %v71_v50 }
  0x43   :  { %v76_v52 = vsel %vm75_vm3, %v3137_v46, %v72_v51 }
  0x44   :  { %v80_v53 = vmul.f32 %v76_v52, %v51_v32  ;;  %v79_v59 = vmul.f32 %v76_v52, %v50_v29  ;;  %v77_v1 = vmul.f32 %v76_v52, %v48_v27  ;;  %v78_v2 = vmul.f32 %v76_v52, %v49_v28 }
  0x5e   :  { %v115_v57 = vpop.permute.xlu2 %114 }
  0x67   :  { %v84_v3 = vpop.permute.xlu2 %83 }
  0x68   :  { %v101_v4 = vmul.f32 %v84_v3, %v77_v1 }
  0x74   :  { %v99_v54 = vpop.permute.xlu0 %98  ;;  %v119_v55 = vpop.permute.xlu1 %118 }
  0x75   :  { %v104_v56 = vmul.f32 %v99_v54, %v80_v53 }
  0x77   :  { %v124_v58 = vadd.f32 %v119_v55, %v104_v56 }
  0x79   :  { %186 = vmatpush.msra.mxu0 %v124_v58  ;;  %3096 = vmatpush.msra.mxu1 %v124_v58 }
  0x7c   :  { %v94_v60 = vpop.permute.xlu0 %93 }
  0x7d   :  { %v103_v61 = vmul.f32 %v94_v60, %v79_v59  ;;  %v89_v62 = vpop.permute.xlu1 %88 }
  0x7e   :  { %v102_v5 = vmul.f32 %v89_v62, %v78_v2  ;;  %v3444_v62 = vmov -1e+09   ;;  %v3082_v2 = vld [vmem:[%s5568_s1 + $0x10] sm:$0xff]  }
  0x7f   :  { %v123_v63 = vadd.f32 %v115_v57, %v103_v61  ;;  %v260_v57 = vlaneseq  ;;  %v3027_v3 = vunpack.c.l.bf16 %v3082_v2 }
  0x81   :  { %187 = vmatpush.msra.mxu0 %v123_v63  ;;  %3097 = vmatpush.msra.mxu1 %v123_v63  ;;  %v261_v58 = vand.u32 127, %v260_v57 }
  0x83   :  { %vm262_vm6 = vcmp.ge.s32.totalorder %v261_v58, 64 }
  0x84   :  { %vm271_vm8 = vmxor %vm3443_vm7, %vm262_vm6 }
  0x85   :  { %v111_v6 = vpop.permute.xlu0 %110  ;;  %vm287_vm9 = vmxor %vm271_vm8, %vm3443_vm7 }
  0x86   :  { %v107_v7 = vpop.permute.xlu1 %106  ;;  %v122_v8 = vadd.f32 %v111_v6, %v102_v5  ;;  %v3581_v63 = vsel %vm287_vm9, 0.0, %v3444_v62  ;;  %vm279_vm10 = vmxor %vm262_vm6, %vm3443_vm7 }
  0x87   :  { %v121_v9 = vadd.f32 %v107_v7, %v101_v4 }
  0x88   :  { %188 = vmatpush.msra.mxu0 %v122_v8  ;;  %3098 = vmatpush.msra.mxu1 %v122_v8 }
  0x8a   :  { %189 = vmatpush.msra.mxu0 %v121_v9  ;;  %3099 = vmatpush.msra.mxu1 %v121_v9  ;;  %v3028_v9 = vunpack.c.h.bf16 %v3082_v2 }
  0x8b   :  { %2881 = vmatmul.msk.f32.vlgmr.msra.gmra.mxu0 %vm137_vm4, %v125_v10  ;;  %2892 = vmatmul.msk.f32.vlgmr.msra.gmra.mxu1 %vm137_vm4, %v136_v16  ;;  %v3019_v16 = vunpack.c.l.bf16 %v3567_v39 }
  0x93   :  { %2882 = vmatmul.msk.f32.gmra.mxu0 %vm137_vm4, %v126_v11 }
  0x9b   :  { %2883 = vmatmul.msk.f32.gmra.mxu0 %vm137_vm4, %v127_v12 }
  0xa3   :  { %2884 = vmatmul.msk.f32.gmra.mxu0 %vm137_vm4, %v128_v13 }
  0xab   :  { %2885 = vmatmul.msk.f32.gmra.mxu0 %vm137_vm4, %v129_v14 }
 0x108   :  { %v191_v15 = vpop.f32.mrf.mxu0  ;;  %v3560_v37 = vpop.f32.mrf.mxu1 }
 0x109   :  { %311 = vxpose.xlu2.b32.start.end [1/1] (short) %v191_v15, 128  ;;  %v3083_v15 = vld [vmem:[%s5568_s1 + $0x18] sm:$0xff]  }
 0x110   :  { %v3539_v17 = vpop.f32.mrf.mxu0 }
 0x118   :  { %v3541_v18 = vpop.f32.mrf.mxu0 }
 0x120   :  { %v3543_v19 = vpop.f32.mrf.mxu0 }
 0x128   :  { %v203_v20 = vpop.f32.mrf.mxu0 }
 0x129   :  { %407 = vmatpush.msrb.mxu1 %v203_v20  ;;  %v3031_v20 = vunpack.c.l.bf16 %v3083_v15 }
 0x1a2   :  { %v327_v21 = vpop.trf.xlu2 }
 0x1a3   :  { %2893 = vmatmul.msk.f32.vlgmr.msrb.gmra.mxu1 %vm343_vm5, %v327_v21 }
 0x1aa   :  { %v328_v22 = vpop.trf.xlu2 }
 0x1ab   :  { %2894 = vmatmul.msk.f32.gmra.mxu1 %vm343_vm5, %v328_v22 }
 0x1b2   :  { %v329_v23 = vpop.trf.xlu2 }
 0x1b3   :  { %2895 = vmatmul.msk.f32.gmra.mxu1 %vm343_vm5, %v329_v23 }
 0x1ba   :  { %v330_v25 = vpop.trf.xlu2 }
 0x1bb   :  { %2896 = vmatmul.msk.f32.gmra.mxu1 %vm343_vm5, %v330_v25  ;;  %v3032_v25 = vunpack.c.h.bf16 %v3083_v15 }
 0x1c2   :  { %v331_v26 = vpop.trf.xlu2 }
 0x1c3   :  { %2897 = vmatmul.msk.f32.gmra.mxu1 %vm343_vm5, %v331_v26 }
 0x1ca   :  { %v332_v27 = vpop.trf.xlu2 }
 0x1cb   :  { %2898 = vmatmul.msk.f32.gmra.mxu1 %vm343_vm5, %v332_v27 }
 0x1d2   :  { %v333_v28 = vpop.trf.xlu2 }
 0x1d3   :  { %2899 = vmatmul.msk.f32.gmra.mxu1 %vm343_vm5, %v333_v28 }
 0x1da   :  { %v334_v29 = vpop.trf.xlu2 }
 0x1db   :  { %2900 = vmatmul.msk.f32.gmra.mxu1 %vm343_vm5, %v334_v29  ;;  %v3611_v29 = vsel %vm279_vm10, 0.0, %v3444_v62 }
 0x1e2   :  { %v335_v30 = vpop.trf.xlu2 }
 0x1e3   :  { %2901 = vmatmul.msk.f32.gmra.mxu1 %vm343_vm5, %v335_v30 }
 0x1ea   :  { %v336_v31 = vpop.trf.xlu2 }
 0x1eb   :  { %2902 = vmatmul.msk.f32.gmra.mxu1 %vm343_vm5, %v336_v31 }
 0x1f2   :  { %v337_v32 = vpop.trf.xlu2 }
 0x1f3   :  { %2903 = vmatmul.msk.f32.gmra.mxu1 %vm343_vm5, %v337_v32 }
 0x1fa   :  { %v338_v33 = vpop.trf.xlu2 }
 0x1fb   :  { %2904 = vmatmul.msk.f32.gmra.mxu1 %vm343_vm5, %v338_v33 }
 0x202   :  { %v339_v34 = vpop.trf.xlu2 }
 0x203   :  { %2905 = vmatmul.msk.f32.gmra.mxu1 %vm343_vm5, %v339_v34 }
 0x20a   :  { %v340_v35 = vpop.trf.xlu2 }
 0x20b   :  { %2906 = vmatmul.msk.f32.gmra.mxu1 %vm343_vm5, %v340_v35 }
 0x212   :  { %v341_v36 = vpop.trf.xlu2 }
 0x213   :  { %2907 = vmatmul.msk.f32.gmra.mxu1 %vm343_vm5, %v341_v36 }
 0x21a   :  { %v342_v47 = vpop.trf.xlu2 }
 0x21b   :  { %2908 = vmatmul.msk.f32.gmra.mxu1 %vm343_vm5, %v342_v47 }
 0x220   :  { %v3562_v38 = vpop.f32.mrf.mxu1 }
 0x228   :  { %v412_v41 = vpop.f32.mrf.mxu1 }
 0x229   :  { %v3570_v42 = vadd.f32 %v3020_v40, %v412_v41  ;;  %v473_v41 = vadd.f32 %v3019_v16, %v3562_v38 }
 0x230   :  { %v415_v45 = vpop.f32.mrf.mxu1 }
 0x231   :  { %v3575_v46 = vadd.f32 %v3023_v44, %v415_v45 }
 0x238   :  { %v418_v49 = vpop.f32.mrf.mxu1 }
 0x239   :  { %v476_v50 = vadd.f32 %v3024_v48, %v418_v49 }
 0x23b   :  { %v3630_v39 = vadd.f32 %v476_v50, %v3611_v29 }
 0x240   :  { %v421_v51 = vpop.f32.mrf.mxu1 }
 0x241   :  { %v477_v35 = vadd.f32 %v3027_v3, %v421_v51 }
 0x243   :  { %v3626_v36 = vadd.f32 %v477_v35, %v3611_v29 }
 0x248   :  { %v424_v52 = vpop.f32.mrf.mxu1 }
 0x249   :  { %v478_v33 = vadd.f32 %v3028_v9, %v424_v52 }
 0x24b   :  { %v3622_v34 = vadd.f32 %v478_v33, %v3611_v29 }
 0x250   :  { %v427_v53 = vpop.f32.mrf.mxu1 }
 0x251   :  { %v479_v31 = vadd.f32 %v3031_v20, %v427_v53 }
 0x253   :  { %v3618_v32 = vadd.f32 %v479_v31, %v3611_v29 }
 0x258   :  { %v430_v54 = vpop.f32.mrf.mxu1 }
 0x259   :  { %v480_v28 = vadd.f32 %v3032_v25, %v430_v54 }
 0x25b   :  { %v3614_v30 = vadd.f32 %v480_v28, %v3611_v29 }
 0x260   :  { %v433_v55 = vpop.f32.mrf.mxu1 }
 0x261   :  { %v481_v21 = vadd.f32 %v3019_v16, %v433_v55 }
 0x263   :  { %v497_v26 = vadd.f32 %v481_v21, %v3581_v63 }
 0x268   :  { %v436_v56 = vpop.f32.mrf.mxu1 }
 0x269   :  { %v482_v4 = vadd.f32 %v3020_v40, %v436_v56  ;;  %v3636_v40 = vadd.f32 %v3570_v42, %v3611_v29 }
 0x26b   :  { %v498_v7 = vadd.f32 %v482_v4, %v3581_v63 }
 0x270   :  { %v439_v59 = vpop.f32.mrf.mxu1 }
 0x271   :  { %v483_v10 = vadd.f32 %v3023_v44, %v439_v59  ;;  %v3641_v44 = vadd.f32 %v473_v41, %v3611_v29 }
 0x273   :  { %v499_v13 = vadd.f32 %v483_v10, %v3581_v63 }
 0x278   :  { %v442_v60 = vpop.f32.mrf.mxu1 }
 0x279   :  { %v484_v61 = vadd.f32 %v3024_v48, %v442_v60 }
 0x27b   :  { %v3584_v1 = vadd.f32 %v484_v61, %v3581_v63 }
 0x27d   :  { %527 = vmax.xlane.f32.xlu0 %v3584_v1 }
 0x280   :  { %v445_v5 = vpop.f32.mrf.mxu1 }
 0x281   :  { %v485_v6 = vadd.f32 %v3027_v3, %v445_v5 }
 0x283   :  { %v3592_v8 = vadd.f32 %v485_v6, %v3581_v63 }
 0x285   :  { %523 = vmax.xlane.f32.xlu0 %v498_v7  ;;  %529 = vmax.xlane.f32.xlu1 %v3592_v8 }
 0x288   :  { %v448_v11 = vpop.f32.mrf.mxu1 }
 0x289   :  { %v486_v12 = vadd.f32 %v3028_v9, %v448_v11 }
 0x28b   :  { %v3597_v14 = vadd.f32 %v486_v12, %v3581_v63 }
 0x28d   :  { %525 = vmax.xlane.f32.xlu1 %v499_v13  ;;  %531 = vmax.xlane.f32.xlu2 %v3597_v14 }
 0x290   :  { %v451_v22 = vpop.f32.mrf.mxu1 }
 0x291   :  { %v487_v23 = vadd.f32 %v3031_v20, %v451_v22 }
 0x293   :  { %v3606_v27 = vadd.f32 %v487_v23, %v3581_v63 }
 0x295   :  { %521 = vmax.xlane.f32.xlu1 %v497_v26  ;;  %533 = vmax.xlane.f32.xlu0 %v3606_v27 }
 0x298   :  { %v454_v43 = vpop.f32.mrf.mxu1 }
 0x299   :  { %v488_v45 = vadd.f32 %v3032_v25, %v454_v43 }
 0x29b   :  { %v504_v47 = vadd.f32 %v488_v45, %v3581_v63 }
 0x29d   :  { %519 = vmax.xlane.f32.xlu1 %v3614_v30 }
 0x2a5   :  { %517 = vmax.xlane.f32.xlu1 %v3618_v32 }
 0x2ad   :  { %515 = vmax.xlane.f32.xlu1 %v3622_v34 }
 0x2b5   :  { %513 = vmax.xlane.f32.xlu1 %v3626_v36 }
 0x2bd   :  { %511 = vmax.xlane.f32.xlu1 %v3630_v39 }
 0x2be   :  { %669 = vxpose.xlu0.b32.start.end [1/1] (short) %v3539_v17, 128  ;;  %v130_v17 = vld [vmem:[%s5567_s2 + $0x28] sm:$0xff] }
 0x2bf   :  { %2886 = vmatmul.msk.f32.gmra.mxu0 %vm137_vm4, %v130_v17 }
 0x2c5   :  { %507 = vmax.xlane.f32.xlu1 %v3636_v40 }
 0x2cd   :  { %505 = vmax.xlane.f32.xlu1 %v3641_v44 }
 0x2d5   :  { %535 = vmax.xlane.f32.xlu1 %v504_v47 }
 0x2f0   :  { %v528_v48 = vpop.xlane.xlu0 %527 }
 0x2f1   :  { %v548_v61 = vsub.f32 %v3584_v1, %v528_v48 }
 0x2f3   :  { %v575_v2 = vmul.f32 1.442695, %v548_v61 }
 0x2f8   :  { %v530_v42 = vpop.xlane.xlu1 %529  ;;  %v524_v51 = vpop.xlane.xlu0 %523 }
 0x2f9   :  { %v546_v53 = vsub.f32 %v498_v7, %v524_v51  ;;  %v549_v4 = vsub.f32 %v3592_v8, %v530_v42 }
 0x2fb   :  { %v571_v55 = vmul.f32 1.442695, %v546_v53  ;;  %v577_v6 = vmul.f32 1.442695, %v549_v4 }
 0x300   :  { %v526_v49 = vpop.xlane.xlu1 %525  ;;  %v532_v7 = vpop.xlane.xlu2 %531 }
 0x301   :  { %v547_v57 = vsub.f32 %v499_v13, %v526_v49  ;;  %v550_v1 = vsub.f32 %v3597_v14, %v532_v7 }
 0x303   :  { %v573_v59 = vmul.f32 1.442695, %v547_v57  ;;  %v579_v11 = vmul.f32 1.442695, %v550_v1 }
 0x308   :  { %v522_v38 = vpop.xlane.xlu1 %521  ;;  %v534_v12 = vpop.xlane.xlu0 %533 }
 0x309   :  { %v545_v50 = vsub.f32 %v497_v26, %v522_v38  ;;  %v551_v8 = vsub.f32 %v3606_v27, %v534_v12 }
 0x30b   :  { %v569_v52 = vmul.f32 1.442695, %v545_v50  ;;  %v581_v16 = vmul.f32 1.442695, %v551_v8 }
 0x30d   :  { %3138 = vpow2.f32 %v569_v52 }
 0x30e   :  { %3140 = vpow2.f32 %v571_v55 }
 0x30f   :  { %3142 = vpow2.f32 %v573_v59 }
 0x310   :  { %v520_v54 = vpop.xlane.xlu1 %519  ;;  %3144 = vpow2.f32 %v575_v2 }
 0x311   :  { %3146 = vpow2.f32 %v577_v6  ;;  %v544_v26 = vsub.f32 %v3614_v30, %v520_v54 }
 0x312   :  { %3148 = vpow2.f32 %v579_v11 }
 0x313   :  { %v3649_v56 = vpop.eup %3138  ;;  %3150 = vpow2.f32 %v581_v16  ;;  %v567_v27 = vmul.f32 1.442695, %v544_v26 }
 0x314   :  { %601 = vadd.xlane.f32.xlu1 %v3649_v56  ;;  %v3652_v60 = vpop.eup %3140 }
 0x315   :  { %v3656_v3 = vpop.eup %3142 }
 0x316   :  { %v3660_v9 = vpop.eup %3144 }
 0x317   :  { %v3664_v13 = vpop.eup %3146 }
 0x318   :  { %v518_v58 = vpop.xlane.xlu1 %517  ;;  %v3670_v20 = vpop.eup %3148 }
 0x319   :  { %v3675_v14 = vpop.eup %3150  ;;  %v543_v31 = vsub.f32 %v3618_v32, %v518_v58 }
 0x31b   :  { %v565_v33 = vmul.f32 1.442695, %v543_v31 }
 0x31c   :  { %603 = vadd.xlane.f32.xlu1 %v3652_v60 }
 0x320   :  { %v516_v62 = vpop.xlane.xlu1 %515 }
 0x321   :  { %v542_v41 = vsub.f32 %v3622_v34, %v516_v62  ;;  %v3719_v62 = vadd.f32 %v3575_v46, %v3611_v29 }
 0x323   :  { %v563_v43 = vmul.f32 1.442695, %v542_v41 }
 0x324   :  { %605 = vadd.xlane.f32.xlu1 %v3656_v3 }
 0x328   :  { %v514_v5 = vpop.xlane.xlu1 %513 }
 0x329   :  { %v541_v32 = vsub.f32 %v3626_v36, %v514_v5 }
 0x32b   :  { %v561_v17 = vmul.f32 1.442695, %v541_v32 }
 0x32c   :  { %607 = vadd.xlane.f32.xlu1 %v3660_v9 }
 0x330   :  { %v512_v10 = vpop.xlane.xlu1 %511 }
 0x331   :  { %v540_v34 = vsub.f32 %v3630_v39, %v512_v10 }
 0x333   :  { %v559_v49 = vmul.f32 1.442695, %v540_v34 }
 0x334   :  { %609 = vadd.xlane.f32.xlu1 %v3664_v13 }
 0x338   :  { %v3668_v15 = vpop.xlane.xlu1 %507 }
 0x33c   :  { %611 = vadd.xlane.f32.xlu1 %v3670_v20  ;;  %v3689_v30 = vpop.f32.mrf.mxu0 }
 0x33d   :  { %3100 = vmatpush.msra.mxu3 %v3689_v30 }
 0x340   :  { %v3673_v21 = vpop.xlane.xlu1 %505 }
 0x344   :  { %613 = vadd.xlane.f32.xlu1 %v3675_v14 }
 0x348   :  { %v536_v22 = vpop.xlane.xlu1 %535 }
 0x349   :  { %v552_v23 = vsub.f32 %v504_v47, %v536_v22 }
 0x34b   :  { %v583_v25 = vmul.f32 1.442695, %v552_v23 }
 0x34d   :  { %3152 = vpow2.f32 %v583_v25 }
 0x34e   :  { %3154 = vpow2.f32 %v567_v27 }
 0x34f   :  { %3156 = vpow2.f32 %v565_v33 }
 0x350   :  { %3158 = vpow2.f32 %v563_v43 }
 0x351   :  { %3160 = vpow2.f32 %v561_v17 }
 0x352   :  { %3162 = vpow2.f32 %v559_v49 }
 0x353   :  { %v3679_v28 = vpop.eup %3152 }
 0x354   :  { %615 = vadd.xlane.f32.xlu1 %v3679_v28  ;;  %v3683_v35 = vpop.eup %3154 }
 0x355   :  { %v3691_v47 = vpop.eup %3156 }
 0x356   :  { %v3698_v48 = vpop.eup %3158 }
 0x357   :  { %v3704_v50 = vpop.eup %3160 }
 0x358   :  { %v3709_v36 = vpop.eup %3162 }
 0x35c   :  { %599 = vadd.xlane.f32.xlu1 %v3683_v35 }
 0x362   :  { %v3687_v45 = vpop.trf.xlu0 }
 0x364   :  { %597 = vadd.xlane.f32.xlu1 %v3691_v47 }
 0x36a   :  { %v3696_v42 = vpop.trf.xlu0 }
 0x36c   :  { %595 = vadd.xlane.f32.xlu1 %v3698_v48 }
 0x372   :  { %v3702_v38 = vpop.trf.xlu0 }
 0x374   :  { %593 = vadd.xlane.f32.xlu1 %v3704_v50 }
 0x37a   :  { %v3707_v51 = vpop.trf.xlu0 }
 0x37c   :  { %591 = vadd.xlane.f32.xlu1 %v3709_v36 }
 0x382   :  { %v689_v52 = vpop.trf.xlu0 }
 0x383   :  { %2913 = vmatmul.msk.f32.vlgmr.msra.gmra.mxu3 %vm343_vm5, %v689_v52 }
 0x387   :  { %v602_v53 = vpop.xlane.xlu1 %601 }
 0x38a   :  { %v690_v54 = vpop.trf.xlu0 }
 0x38b   :  { %2914 = vmatmul.msk.f32.gmra.mxu3 %vm343_vm5, %v690_v54 }
 0x38f   :  { %v604_v39 = vpop.xlane.xlu1 %603 }
 0x392   :  { %v691_v55 = vpop.trf.xlu0 }
 0x393   :  { %2915 = vmatmul.msk.f32.gmra.mxu3 %vm343_vm5, %v691_v55 }
 0x397   :  { %v606_v57 = vpop.xlane.xlu1 %605 }
 0x39a   :  { %v692_v58 = vpop.trf.xlu0 }
 0x39b   :  { %2916 = vmatmul.msk.f32.gmra.mxu3 %vm343_vm5, %v692_v58 }
 0x39f   :  { %v608_v59 = vpop.xlane.xlu1 %607 }
 0x3a2   :  { %v693_v61 = vpop.trf.xlu0 }
 0x3a3   :  { %2917 = vmatmul.msk.f32.gmra.mxu3 %vm343_vm5, %v693_v61 }
 0x3a7   :  { %509 = vmax.xlane.f32.xlu0 %v3719_v62  ;;  %v610_v4 = vpop.xlane.xlu1 %609 }
 0x3aa   :  { %v694_v2 = vpop.trf.xlu0 }
 0x3ab   :  { %2918 = vmatmul.msk.f32.gmra.mxu3 %vm343_vm5, %v694_v2 }
 0x3af   :  { %v612_v6 = vpop.xlane.xlu1 %611 }
 0x3b2   :  { %v695_v5 = vpop.trf.xlu0 }
 0x3b3   :  { %2919 = vmatmul.msk.f32.gmra.mxu3 %vm343_vm5, %v695_v5 }
 0x3b7   :  { %v614_v1 = vpop.xlane.xlu1 %613 }
 0x3ba   :  { %v696_v7 = vpop.trf.xlu0 }
 0x3bb   :  { %2920 = vmatmul.msk.f32.gmra.mxu3 %vm343_vm5, %v696_v7 }
 0x3c2   :  { %v697_v10 = vpop.trf.xlu0 }
 0x3c3   :  { %2921 = vmatmul.msk.f32.gmra.mxu3 %vm343_vm5, %v697_v10 }
 0x3c7   :  { %v616_v11 = vpop.xlane.xlu1 %615 }
 0x3c8   :  { %3164 = vrcp.f32 %v616_v11 }
 0x3c9   :  { %3166 = vrcp.f32 %v614_v1  ;;  %v538_v1 = vsub.f32 %v3636_v40, %v3668_v15 }
 0x3ca   :  { %v698_v46 = vpop.trf.xlu0  ;;  %3168 = vrcp.f32 %v612_v6 }
 0x3cb   :  { %2922 = vmatmul.msk.f32.gmra.mxu3 %vm343_vm5, %v698_v46  ;;  %3170 = vrcp.f32 %v610_v4  ;;  %v555_v10 = vmul.f32 1.442695, %v538_v1 }
 0x3cc   :  { %3172 = vrcp.f32 %v608_v59 }
 0x3cd   :  { %3174 = vrcp.f32 %v606_v57 }
 0x3ce   :  { %v3165_v12 = vpop.eup %3164  ;;  %3176 = vrcp.f32 %v604_v39 }
 0x3cf   :  { %v600_v8 = vpop.xlane.xlu1 %599  ;;  %v648_v16 = vmul.f32 %v3165_v12, %v3679_v28  ;;  %v3167_v22 = vpop.eup %3166  ;;  %3178 = vrcp.f32 %v602_v53  ;;  %v537_v12 = vsub.f32 %v3641_v44, %v3673_v21  ;;  %v3778_v44 = vld [vmem:[%s5568_s1 + $0x28] sm:$0xff]  }
 0x3d0   :  { %v647_v25 = vmul.f32 %v3167_v22, %v3675_v14  ;;  %v3169_v26 = vpop.eup %3168  ;;  %3180 = vrcp.f32 %v600_v8 }
 0x3d1   :  { %649 = vmatpush.xpose.msra.mxu2 %v648_v16  ;;  %v646_v31 = vmul.f32 %v3169_v26, %v3670_v20  ;;  %v3171_v33 = vpop.eup %3170  ;;  %v553_v8 = vmul.f32 1.442695, %v537_v12 }
 0x3d2   :  { %v699_v23 = vpop.trf.xlu0  ;;  %v645_v28 = vmul.f32 %v3171_v33, %v3664_v13  ;;  %v3173_v43 = vpop.eup %3172 }
 0x3d3   :  { %2923 = vmatmul.msk.f32.gmra.mxu3 %vm343_vm5, %v699_v23  ;;  %v644_v14 = vmul.f32 %v3173_v43, %v3660_v9  ;;  %v3175_v17 = vpop.eup %3174 }
 0x3d4   :  { %v643_v34 = vmul.f32 %v3175_v17, %v3656_v3  ;;  %v3177_v20 = vpop.eup %3176 }
 0x3d5   :  { %650 = vmatpush.xpose.msra.mxu2 %v647_v25  ;;  %v642_v49 = vmul.f32 %v3177_v20, %v3652_v60  ;;  %v3179_v52 = vpop.eup %3178  ;;  %v3086_v25 = vld [vmem:[%s5568_s1 + $0x30] sm:$0xff]  }
 0x3d6   :  { %v641_v13 = vmul.f32 %v3179_v52, %v3649_v56  ;;  %v3181_v39 = vpop.eup %3180  ;;  %v3044_v21 = vunpack.c.h.bf16 %v3086_v25 }
 0x3d7   :  { %v598_v27 = vpop.xlane.xlu1 %597  ;;  %v640_v9 = vmul.f32 %v3181_v39, %v3683_v35 }
 0x3d8   :  { %3182 = vrcp.f32 %v598_v27  ;;  %v3040_v27 = vunpack.c.h.bf16 %v3778_v44 }
 0x3d9   :  { %651 = vmatpush.xpose.msra.mxu2 %v646_v31 }
 0x3da   :  { %v700_v41 = vpop.trf.xlu0 }
 0x3db   :  { %2924 = vmatmul.msk.f32.gmra.mxu3 %vm343_vm5, %v700_v41 }
 0x3dd   :  { %652 = vmatpush.xpose.msra.mxu2 %v645_v28  ;;  %v3790_v28 = vld [vmem:[%s5568_s1 + $0x20] sm:$0xff]  }
 0x3de   :  { %v3183_v55 = vpop.eup %3182 }
 0x3df   :  { %v596_v32 = vpop.xlane.xlu1 %595  ;;  %v639_v53 = vmul.f32 %v3183_v55, %v3691_v47  ;;  %v131_v47 = vld [vmem:[%s5567_s2 + $0x30] sm:$0xff] }
 0x3e0   :  { %3184 = vrcp.f32 %v596_v32  ;;  %2887 = vmatmul.msk.f32.gmra.mxu0 %vm137_vm4, %v131_v47  ;;  %v3036_v32 = vunpack.c.h.bf16 %v3790_v28 }
 0x3e1   :  { %653 = vmatpush.xpose.msra.mxu2 %v644_v14 }
 0x3e5   :  { %654 = vmatpush.xpose.msra.mxu2 %v643_v34  ;;  %v3087_v34 = vld [vmem:[%s5568_s1 + $0x38] sm:$0xff]  }
 0x3e6   :  { %v3185_v57 = vpop.eup %3184  ;;  %v3048_v20 = vunpack.c.h.bf16 %v3087_v34 }
 0x3e7   :  { %v594_v54 = vpop.xlane.xlu1 %593  ;;  %v638_v60 = vmul.f32 %v3185_v57, %v3698_v48  ;;  %v132_v48 = vld [vmem:[%s5567_s2 + $0x38] sm:$0xff] }
 0x3e8   :  { %3186 = vrcp.f32 %v594_v54  ;;  %2888 = vmatmul.msk.f32.gmra.mxu0 %vm137_vm4, %v132_v48  ;;  %v3035_v48 = vunpack.c.l.bf16 %v3790_v28 }
 0x3e9   :  { %655 = vmatpush.xpose.msra.mxu2 %v642_v49 }
 0x3ed   :  { %656 = vmatpush.xpose.msra.mxu2 %v641_v13  ;;  %v3047_v13 = vunpack.c.l.bf16 %v3087_v34 }
 0x3ee   :  { %v3187_v58 = vpop.eup %3186 }
 0x3ef   :  { %v592_v3 = vpop.xlane.xlu1 %591  ;;  %v637_v56 = vmul.f32 %v3187_v58, %v3704_v50 }
 0x3f0   :  { %3188 = vrcp.f32 %v592_v3 }
 0x3f1   :  { %657 = vmatpush.xpose.msra.mxu2 %v640_v9 }
 0x3f5   :  { %658 = vmatpush.xpose.msra.mxu2 %v639_v53  ;;  %v3043_v53 = vunpack.c.l.bf16 %v3086_v25 }
 0x3f6   :  { %v3189_v59 = vpop.eup %3188 }
 0x3f7   :  { %v636_v61 = vmul.f32 %v3189_v59, %v3709_v36  ;;  %v133_v36 = vld [vmem:[%s5567_s2 + $0x40] sm:$0xff]  ;;  %v3039_v59 = vunpack.c.l.bf16 %v3778_v44 }
 0x3f8   :  { %2889 = vmatmul.msk.f32.gmra.mxu0 %vm137_vm4, %v133_v36 }
 0x3f9   :  { %659 = vmatpush.xpose.msra.mxu2 %v638_v60 }
 0x3fd   :  { %660 = vmatpush.xpose.msra.mxu2 %v637_v56 }
 0x401   :  { %661 = vmatpush.xpose.msra.mxu2 %v636_v61 }
 0x406   :  { %v3742_v35 = vpop.f32.mrf.mxu3 }
 0x40e   :  { %v781_v2 = vpop.f32.mrf.mxu3 }
 0x40f   :  { %v836_v58 = vadd.f32 %v3044_v21, %v781_v2 }
 0x411   :  { %v3817_v61 = vadd.f32 %v836_v58, %v3611_v29 }
 0x416   :  { %v3752_v50 = vpop.f32.mrf.mxu3 }
 0x41a   :  { %v510_v4 = vpop.xlane.xlu0 %509 }
 0x41b   :  { %v539_v5 = vsub.f32 %v3719_v62, %v510_v4 }
 0x41d   :  { %v557_v6 = vmul.f32 1.442695, %v539_v5  ;;  %v837_v5 = vadd.f32 %v3047_v13, %v3752_v50 }
 0x41e   :  { %v787_v7 = vpop.f32.mrf.mxu3 }
 0x41f   :  { %3190 = vpow2.f32 %v557_v6  ;;  %v838_v55 = vadd.f32 %v3048_v20, %v787_v7  ;;  %v3836_v6 = vadd.f32 %v837_v5, %v3611_v29  ;;  %v835_v7 = vadd.f32 %v3043_v53, %v3742_v35 }
 0x420   :  { %3192 = vpow2.f32 %v555_v10 }
 0x421   :  { %3194 = vpow2.f32 %v553_v8  ;;  %v3809_v57 = vadd.f32 %v838_v55, %v3611_v29  ;;  %v3841_v1 = vadd.f32 %v835_v7, %v3611_v29 }
 0x425   :  { %v3761_v11 = vpop.eup %3190 }
 0x426   :  { %589 = vadd.xlane.f32.xlu1 %v3761_v11  ;;  %v790_v46 = vpop.f32.mrf.mxu3  ;;  %v3766_v16 = vpop.eup %3192 }
 0x427   :  { %v3769_v22 = vpop.eup %3194  ;;  %v839_v2 = vadd.f32 %v3035_v48, %v790_v46 }
 0x429   :  { %v3831_v4 = vadd.f32 %v839_v2, %v3581_v63 }
 0x42e   :  { %587 = vadd.xlane.f32.xlu1 %v3766_v16  ;;  %v793_v62 = vpop.f32.mrf.mxu3 }
 0x42f   :  { %v840_v17 = vadd.f32 %v3036_v32, %v793_v62 }
 0x431   :  { %v856_v54 = vadd.f32 %v840_v17, %v3581_v63 }
 0x436   :  { %585 = vadd.xlane.f32.xlu1 %v3769_v22  ;;  %v796_v40 = vpop.f32.mrf.mxu3 }
 0x437   :  { %v841_v47 = vadd.f32 %v3039_v59, %v796_v40 }
 0x439   :  { %v3825_v36 = vadd.f32 %v841_v47, %v3581_v63 }
 0x43e   :  { %v799_v15 = vpop.f32.mrf.mxu3 }
 0x43f   :  { %v842_v41 = vadd.f32 %v3040_v27, %v799_v15 }
 0x441   :  { %v3794_v14 = vadd.f32 %v842_v41, %v3581_v63 }
 0x446   :  { %v802_v23 = vpop.f32.mrf.mxu3 }
 0x447   :  { %v843_v60 = vadd.f32 %v3043_v53, %v802_v23 }
 0x449   :  { %v3813_v56 = vadd.f32 %v843_v60, %v3581_v63 }
 0x44e   :  { %v805_v26 = vpop.f32.mrf.mxu3 }
 0x44f   :  { %v844_v31 = vadd.f32 %v3044_v21, %v805_v26 }
 0x451   :  { %v3782_v33 = vadd.f32 %v844_v31, %v3581_v63 }
 0x453   :  { %889 = vmax.xlane.f32.xlu2 %v3782_v33 }
 0x456   :  { %v808_v43 = vpop.f32.mrf.mxu3 }
 0x457   :  { %v845_v9 = vadd.f32 %v3047_v13, %v808_v43 }
 0x459   :  { %v861_v3 = vadd.f32 %v845_v9, %v3581_v63 }
 0x45b   :  { %885 = vmax.xlane.f32.xlu2 %v3794_v14 }
 0x45d   :  { %v209_v46 = vpop.f32.mrf.mxu0 }
 0x45e   :  { %v811_v49 = vpop.f32.mrf.mxu3 }
 0x45f   :  { %v846_v52 = vadd.f32 %v3048_v20, %v811_v49 }
 0x461   :  { %v3804_v39 = vadd.f32 %v846_v52, %v3581_v63 }
 0x463   :  { %881 = vmax.xlane.f32.xlu2 %v856_v54  ;;  %893 = vmax.xlane.f32.xlu1 %v3804_v39 }
 0x465   :  { %v3846_v23 = vpop.f32.mrf.mxu0 }
 0x46b   :  { %877 = vmax.xlane.f32.xlu2 %v3809_v57  ;;  %891 = vmax.xlane.f32.xlu1 %v861_v3 }
 0x473   :  { %873 = vmax.xlane.f32.xlu2 %v3817_v61  ;;  %887 = vmax.xlane.f32.xlu1 %v3813_v56 }
 0x475   :  { %v215_v21 = vpop.f32.mrf.mxu0 }
 0x47b   :  { %883 = vmax.xlane.f32.xlu1 %v3825_v36 }
 0x483   :  { %879 = vmax.xlane.f32.xlu1 %v3831_v4 }
 0x48b   :  { %875 = vmax.xlane.f32.xlu1 %v3836_v6 }
 0x493   :  { %871 = vmax.xlane.f32.xlu1 %v3841_v1 }
 0x499   :  { %v590_v10 = vpop.xlane.xlu1 %589 }
 0x49a   :  { %3196 = vrcp.f32 %v590_v10 }
 0x4a0   :  { %v3197_v12 = vpop.eup %3196 }
 0x4a1   :  { %v588_v8 = vpop.xlane.xlu1 %587  ;;  %v635_v62 = vmul.f32 %v3197_v12, %v3761_v11 }
 0x4a2   :  { %3198 = vrcp.f32 %v588_v8 }
 0x4a3   :  { %662 = vmatpush.xpose.msra.mxu2 %v635_v62 }
 0x4a8   :  { %v3199_v50 = vpop.eup %3198 }
 0x4a9   :  { %v586_v40 = vpop.xlane.xlu1 %585  ;;  %v634_v15 = vmul.f32 %v3199_v50, %v3766_v16 }
 0x4aa   :  { %3200 = vrcp.f32 %v586_v40 }
 0x4ab   :  { %663 = vmatpush.xpose.msra.mxu2 %v634_v15 }
 0x4b0   :  { %v3201_v35 = vpop.eup %3200 }
 0x4b1   :  { %v633_v25 = vmul.f32 %v3201_v35, %v3769_v22 }
 0x4b3   :  { %664 = vmatpush.xpose.msra.mxu2 %v633_v25 }
 0x4b6   :  { %665 = vmatmul.f32.vlgmr.msra.gmra.mxu2 %v215_v21 }
 0x4b7   :  { %764 = vmatpush.msrb.mxu2 %v3689_v30 }
 0x4b9   :  { %1122 = vmatpush.msra.mxu2 %v209_v46 }
 0x4be   :  { %2909 = vmatmul.msk.f32.vlgmr.msrb.gmra.mxu2 %vm343_vm5, %v3687_v45 }
 0x4c6   :  { %v890_v11 = vpop.xlane.xlu2 %889  ;;  %2910 = vmatmul.msk.f32.gmra.mxu2 %vm343_vm5, %v3696_v42 }
 0x4ce   :  { %v3854_v16 = vpop.xlane.xlu2 %885  ;;  %2911 = vmatmul.msk.f32.gmra.mxu2 %vm343_vm5, %v3702_v38 }
 0x4d6   :  { %v882_v26 = vpop.xlane.xlu2 %881  ;;  %v894_v22 = vpop.xlane.xlu1 %893  ;;  %2912 = vmatmul.msk.f32.gmra.mxu2 %vm343_vm5, %v3707_v51  ;;  %v908_v51 = vsub.f32 %v3782_v33, %v890_v11 }
 0x4d7   :  { %v904_v30 = vsub.f32 %v856_v54, %v882_v26  ;;  %v910_v42 = vsub.f32 %v3804_v39, %v894_v22 }
 0x4d8   :  { %v937_v52 = vmul.f32 1.442695, %v908_v51 }
 0x4d9   :  { %v929_v31 = vmul.f32 1.442695, %v904_v30  ;;  %v941_v38 = vmul.f32 1.442695, %v910_v42  ;;  %v906_v30 = vsub.f32 %v3794_v14, %v3854_v16 }
 0x4db   :  { %3202 = vpow2.f32 %v929_v31  ;;  %v933_v44 = vmul.f32 1.442695, %v906_v30 }
 0x4de   :  { %v892_v41 = vpop.xlane.xlu1 %891  ;;  %v878_v58 = vpop.xlane.xlu2 %877 }
 0x4df   :  { %v909_v43 = vsub.f32 %v861_v3, %v892_v41 }
 0x4e1   :  { %v3860_v45 = vpop.eup %3202  ;;  %v939_v17 = vmul.f32 1.442695, %v909_v43 }
 0x4e2   :  { %961 = vadd.xlane.f32.xlu0 %v3860_v45 }
 0x4e3   :  { %3204 = vpow2.f32 %v939_v17 }
 0x4e4   :  { %3206 = vpow2.f32 %v941_v38 }
 0x4e5   :  { %3208 = vpow2.f32 %v937_v52 }
 0x4e6   :  { %v888_v34 = vpop.xlane.xlu1 %887  ;;  %v874_v28 = vpop.xlane.xlu2 %873 }
 0x4e7   :  { %v907_v13 = vsub.f32 %v3813_v56, %v888_v34  ;;  %v902_v56 = vsub.f32 %v3809_v57, %v878_v58 }
 0x4e9   :  { %v3864_v20 = vpop.eup %3204  ;;  %v935_v55 = vmul.f32 1.442695, %v907_v13  ;;  %v925_v5 = vmul.f32 1.442695, %v902_v56 }
 0x4ea   :  { %971 = vadd.xlane.f32.xlu1 %v3864_v20  ;;  %v3207_v54 = vpop.eup %3206 }
 0x4eb   :  { %v3869_v39 = vpop.eup %3208  ;;  %3210 = vpow2.f32 %v935_v55 }
 0x4ee   :  { %v884_v49 = vpop.xlane.xlu1 %883 }
 0x4ef   :  { %v905_v3 = vsub.f32 %v3825_v36, %v884_v49 }
 0x4f1   :  { %v931_v60 = vmul.f32 1.442695, %v905_v3  ;;  %v3874_v2 = vpop.eup %3210 }
 0x4f2   :  { %973 = vadd.xlane.f32.xlu1 %v3207_v54 }
 0x4f6   :  { %v880_v9 = vpop.xlane.xlu1 %879 }
 0x4f7   :  { %v903_v43 = vsub.f32 %v3831_v4, %v880_v9  ;;  %v900_v4 = vsub.f32 %v3817_v61, %v874_v28 }
 0x4f9   :  { %v927_v14 = vmul.f32 1.442695, %v903_v43  ;;  %v921_v49 = vmul.f32 1.442695, %v900_v4 }
 0x4fa   :  { %969 = vadd.xlane.f32.xlu1 %v3869_v39 }
 0x4fe   :  { %v876_v53 = vpop.xlane.xlu1 %875 }
 0x4ff   :  { %v901_v33 = vsub.f32 %v3836_v6, %v876_v53 }
 0x501   :  { %v923_v47 = vmul.f32 1.442695, %v901_v33 }
 0x502   :  { %967 = vadd.xlane.f32.xlu1 %v3874_v2 }
 0x503   :  { %3212 = vpow2.f32 %v923_v47 }
 0x504   :  { %3214 = vpow2.f32 %v931_v60 }
 0x505   :  { %3216 = vpow2.f32 %v925_v5 }
 0x506   :  { %v872_v10 = vpop.xlane.xlu1 %871 }
 0x507   :  { %v899_v36 = vsub.f32 %v3841_v1, %v872_v10 }
 0x509   :  { %v3878_v7 = vpop.eup %3212  ;;  %v919_v6 = vmul.f32 1.442695, %v899_v36 }
 0x50a   :  { %v3880_v46 = vpop.eup %3214  ;;  %955 = vadd.xlane.f32.xlu0 %v3878_v7 }
 0x50b   :  { %963 = vadd.xlane.f32.xlu1 %v3880_v46  ;;  %v3885_v12 = vpop.eup %3216  ;;  %3218 = vpow2.f32 %v919_v6 }
 0x511   :  { %v3888_v57 = vpop.eup %3218 }
 0x513   :  { %957 = vadd.xlane.f32.xlu1 %v3885_v12 }
 0x51b   :  { %951 = vadd.xlane.f32.xlu1 %v3888_v57 }
 0x539   :  { %v3891_v8 = vpop.f32.mrf.mxu2 }
 0x541   :  { %v766_v62 = vpop.f32.mrf.mxu2 }
 0x542   :  { %v831_v31 = vadd.f32 %v3035_v48, %v766_v62 }
 0x549   :  { %v769_v50 = vpop.f32.mrf.mxu2 }
 0x54a   :  { %v832_v26 = vadd.f32 %v3036_v32, %v769_v50 }
 0x54c   :  { %v848_v22 = vadd.f32 %v832_v26, %v3611_v29 }
 0x551   :  { %v772_v40 = vpop.f32.mrf.mxu2 }
 0x552   :  { %v833_v15 = vadd.f32 %v3039_v59, %v772_v40 }
 0x554   :  { %v849_v1 = vadd.f32 %v833_v15, %v3611_v29  ;;  %v134_v15 = vld [vmem:[%s5567_s2 + $0x48] sm:$0xff] }
 0x555   :  { %v962_v40 = vpop.xlane.xlu0 %961  ;;  %2890 = vmatmul.msk.f32.gmra.mxu0 %vm137_vm4, %v134_v15 }
 0x556   :  { %867 = vmax.xlane.f32.xlu2 %v849_v1 }
 0x559   :  { %v775_v35 = vpop.f32.mrf.mxu2 }
 0x55a   :  { %v834_v25 = vadd.f32 %v3040_v27, %v775_v35  ;;  %v847_v27 = vadd.f32 %v831_v31, %v3611_v29 }
 0x55c   :  { %v850_v21 = vadd.f32 %v834_v25, %v3611_v29 }
 0x55d   :  { %v972_v11 = vpop.xlane.xlu1 %971 }
 0x55e   :  { %869 = vmax.xlane.f32.xlu2 %v850_v21 }
 0x565   :  { %v974_v59 = vpop.xlane.xlu1 %973 }
 0x566   :  { %865 = vmax.xlane.f32.xlu2 %v848_v22  ;;  %3220 = vrcp.f32 %v974_v59 }
 0x567   :  { %3222 = vrcp.f32 %v972_v11 }
 0x568   :  { %3224 = vpow2.f32 %v933_v44 }
 0x56c   :  { %v3221_v41 = vpop.eup %3220 }
 0x56d   :  { %v970_v32 = vpop.xlane.xlu1 %969  ;;  %v1006_v17 = vmul.f32 %v3221_v41, %v3207_v54  ;;  %v3223_v42 = vpop.eup %3222 }
 0x56e   :  { %863 = vmax.xlane.f32.xlu2 %v847_v27  ;;  %3226 = vrcp.f32 %v970_v32  ;;  %v1005_v16 = vmul.f32 %v3223_v42, %v3864_v20  ;;  %v3225_v34 = vpop.eup %3224 }
 0x56f   :  { %1007 = vmatpush.xpose.msrb.mxu0 %v1006_v17  ;;  %3228 = vpow2.f32 %v927_v14 }
 0x573   :  { %1008 = vmatpush.xpose.msrb.mxu0 %v1005_v16 }
 0x574   :  { %v3227_v48 = vpop.eup %3226 }
 0x575   :  { %v968_v38 = vpop.xlane.xlu1 %967  ;;  %v1004_v51 = vmul.f32 %v3227_v48, %v3869_v39  ;;  %v3229_v52 = vpop.eup %3228 }
 0x576   :  { %965 = vadd.xlane.f32.xlu2 %v3225_v34  ;;  %3230 = vrcp.f32 %v968_v38 }
 0x577   :  { %1009 = vmatpush.xpose.msrb.mxu0 %v1004_v51  ;;  %3232 = vpow2.f32 %v921_v49 }
 0x57c   :  { %v3231_v54 = vpop.eup %3230 }
 0x57d   :  { %v1003_v13 = vmul.f32 %v3231_v54, %v3874_v2  ;;  %v3912_v20 = vpop.eup %3232  ;;  %v956_v30 = vpop.xlane.xlu0 %955 }
 0x57e   :  { %959 = vadd.xlane.f32.xlu2 %v3229_v52  ;;  %v964_v6 = vpop.xlane.xlu1 %963 }
 0x57f   :  { %1010 = vmatpush.xpose.msrb.mxu0 %v1003_v13 }
 0x586   :  { %953 = vadd.xlane.f32.xlu2 %v3912_v20  ;;  %v958_v11 = vpop.xlane.xlu1 %957 }
 0x58e   :  { %v952_v43 = vpop.xlane.xlu1 %951 }
 0x5c9   :  { %v868_v9 = vpop.xlane.xlu2 %867 }
 0x5ca   :  { %v897_v55 = vsub.f32 %v849_v1, %v868_v9 }
 0x5cc   :  { %v915_v3 = vmul.f32 1.442695, %v897_v55 }
 0x5ce   :  { %3234 = vpow2.f32 %v915_v3 }
 0x5d1   :  { %v870_v39 = vpop.xlane.xlu2 %869 }
 0x5d2   :  { %v898_v61 = vsub.f32 %v850_v21, %v870_v39  ;;  %v218_v54 = vpop.f32.mrf.mxu0 }
 0x5d4   :  { %v3915_v53 = vpop.eup %3234  ;;  %v917_v33 = vmul.f32 1.442695, %v898_v61 }
 0x5d5   :  { %947 = vadd.xlane.f32.xlu2 %v3915_v53 }
 0x5d6   :  { %3236 = vpow2.f32 %v917_v33 }
 0x5d9   :  { %v866_v60 = vpop.xlane.xlu2 %865 }
 0x5da   :  { %v896_v58 = vsub.f32 %v848_v22, %v866_v60 }
 0x5dc   :  { %v3918_v47 = vpop.eup %3236  ;;  %v913_v2 = vmul.f32 1.442695, %v896_v58 }
 0x5dd   :  { %949 = vadd.xlane.f32.xlu0 %v3918_v47 }
 0x5de   :  { %3238 = vpow2.f32 %v913_v2 }
 0x5e1   :  { %v864_v56 = vpop.xlane.xlu2 %863 }
 0x5e2   :  { %v895_v5 = vsub.f32 %v847_v27, %v864_v56 }
 0x5e4   :  { %v3921_v10 = vpop.eup %3238  ;;  %v911_v36 = vmul.f32 1.442695, %v895_v5 }
 0x5e5   :  { %945 = vadd.xlane.f32.xlu1 %v3921_v10 }
 0x5e6   :  { %3240 = vpow2.f32 %v911_v36 }
 0x5e9   :  { %v966_v62 = vpop.xlane.xlu2 %965 }
 0x5ea   :  { %3242 = vrcp.f32 %v966_v62 }
 0x5eb   :  { %3244 = vrcp.f32 %v964_v6 }
 0x5ec   :  { %v3924_v50 = vpop.eup %3240  ;;  %3246 = vrcp.f32 %v962_v40 }
 0x5ed   :  { %943 = vadd.xlane.f32.xlu0 %v3924_v50 }
 0x5f0   :  { %v3243_v1 = vpop.eup %3242 }
 0x5f1   :  { %v960_v35 = vpop.xlane.xlu2 %959  ;;  %v1002_v25 = vmul.f32 %v3243_v1, %v3225_v34  ;;  %v3245_v21 = vpop.eup %3244 }
 0x5f2   :  { %3248 = vrcp.f32 %v960_v35  ;;  %v1001_v26 = vmul.f32 %v3245_v21, %v3880_v46  ;;  %v3247_v22 = vpop.eup %3246 }
 0x5f3   :  { %1011 = vmatpush.xpose.msrb.mxu0 %v1002_v25  ;;  %3250 = vrcp.f32 %v958_v11  ;;  %v1000_v59 = vmul.f32 %v3247_v22, %v3860_v45  ;;  %v3978_v25 = vld [vmem:[%s5568_s1 + $0x60] sm:$0xff]  }
 0x5f4   :  { %3252 = vrcp.f32 %v956_v30  ;;  %v3067_v21 = vunpack.c.l.bf16 %v3978_v25  ;;  %v3068_v30 = vunpack.c.h.bf16 %v3978_v25 }
 0x5f7   :  { %1012 = vmatpush.xpose.msrb.mxu0 %v1001_v26 }
 0x5f8   :  { %v3249_v31 = vpop.eup %3248 }
 0x5f9   :  { %v954_v44 = vpop.xlane.xlu2 %953  ;;  %v999_v27 = vmul.f32 %v3249_v31, %v3229_v52  ;;  %v3251_v41 = vpop.eup %3250 }
 0x5fa   :  { %3254 = vrcp.f32 %v954_v44  ;;  %v998_v32 = vmul.f32 %v3251_v41, %v3885_v12  ;;  %v3253_v46 = vpop.eup %3252 }
 0x5fb   :  { %1013 = vmatpush.xpose.msrb.mxu0 %v1000_v59  ;;  %3256 = vrcp.f32 %v952_v43  ;;  %v997_v17 = vmul.f32 %v3253_v46, %v3878_v7 }
 0x5fe   :  { %1385 = vxpose.xlu2.b32.start.end [1/1] (short) %v3543_v19, 128  ;;  %v135_v19 = vld [vmem:[%s5567_s2 + $0x50] sm:$0xff] }
 0x5ff   :  { %1014 = vmatpush.xpose.msrb.mxu0 %v999_v27  ;;  %v3093_v27 = vld [vmem:[%s5568_s1 + $0x68] sm:$0xff]  }
 0x600   :  { %v3255_v42 = vpop.eup %3254  ;;  %2891 = vmatmul.msk.f32.gmra.mxu0 %vm137_vm4, %v135_v19  ;;  %v3071_v43 = vunpack.c.l.bf16 %v3093_v27 }
 0x601   :  { %v996_v45 = vmul.f32 %v3255_v42, %v3912_v20  ;;  %v3257_v14 = vpop.eup %3256 }
 0x602   :  { %v995_v16 = vmul.f32 %v3257_v14, %v3888_v57 }
 0x603   :  { %1015 = vmatpush.xpose.msrb.mxu0 %v998_v32 }
 0x607   :  { %1016 = vmatpush.xpose.msrb.mxu0 %v997_v17  ;;  %v3072_v17 = vunpack.c.h.bf16 %v3093_v27 }
 0x60b   :  { %1017 = vmatpush.xpose.msrb.mxu0 %v996_v45 }
 0x60f   :  { %1018 = vmatpush.xpose.msrb.mxu0 %v995_v16  ;;  %v4004_v16 = vld [vmem:[%s5568_s1 + $0x70] sm:$0xff]  }
 0x61f   :  { %1027 = vxpose.xlu1.b32.start.end [1/1] (short) %v3541_v18, 128 }
 0x648   :  { %v948_v12 = vpop.xlane.xlu2 %947 }
 0x650   :  { %v950_v34 = vpop.xlane.xlu0 %949 }
 0x651   :  { %3258 = vrcp.f32 %v950_v34 }
 0x652   :  { %3260 = vrcp.f32 %v948_v12  ;;  %v3075_v12 = vunpack.c.l.bf16 %v4004_v16 }
 0x657   :  { %v3259_v7 = vpop.eup %3258 }
 0x658   :  { %v946_v28 = vpop.xlane.xlu1 %945  ;;  %v994_v48 = vmul.f32 %v3259_v7, %v3918_v47  ;;  %v3261_v38 = vpop.eup %3260 }
 0x659   :  { %3262 = vrcp.f32 %v946_v28  ;;  %v993_v57 = vmul.f32 %v3261_v38, %v3915_v53 }
 0x65a   :  { %1019 = vmatpush.xpose.msrb.mxu0 %v994_v48 }
 0x65e   :  { %1020 = vmatpush.xpose.msrb.mxu0 %v993_v57 }
 0x65f   :  { %v3263_v18 = vpop.eup %3262 }
 0x660   :  { %v944_v51 = vpop.xlane.xlu0 %943  ;;  %v992_v4 = vmul.f32 %v3263_v18, %v3921_v10 }
 0x661   :  { %3264 = vrcp.f32 %v944_v51 }
 0x662   :  { %1021 = vmatpush.xpose.msrb.mxu0 %v992_v4  ;;  %v4020_v4 = vld [vmem:[%s5568_s1 + $0x48] sm:$0xff]  }
 0x667   :  { %v3265_v49 = vpop.eup %3264 }
 0x668   :  { %v991_v52 = vmul.f32 %v3265_v49, %v3924_v50  ;;  %v3055_v49 = vunpack.c.l.bf16 %v4020_v4 }
 0x66a   :  { %1022 = vmatpush.xpose.msrb.mxu0 %v991_v52 }
 0x66d   :  { %1023 = vmatmul.f32.vlgmr.msrb.gmra.mxu0 %v218_v54 }
 0x66e   :  { %1480 = vmatpush.msra.mxu0 %v3846_v23 }
 0x67d   :  { %v3969_v40 = vpop.f32.mrf.mxu0 }
 0x697   :  { %v1401_v13 = vpop.trf.xlu2 }
 0x698   :  { %2957 = vmatmul.msk.f32.vlgmr.msra.gmra.mxu0 %vm343_vm5, %v1401_v13 }
 0x69f   :  { %v1402_v20 = vpop.trf.xlu2 }
 0x6a0   :  { %2958 = vmatmul.msk.f32.gmra.mxu0 %vm343_vm5, %v1402_v20  ;;  %v3056_v20 = vunpack.c.h.bf16 %v4020_v4 }
 0x6a7   :  { %v1403_v9 = vpop.trf.xlu2 }
 0x6a8   :  { %2959 = vmatmul.msk.f32.gmra.mxu0 %vm343_vm5, %v1403_v9 }
 0x6af   :  { %v1404_v55 = vpop.trf.xlu2 }
 0x6b0   :  { %2960 = vmatmul.msk.f32.gmra.mxu0 %vm343_vm5, %v1404_v55 }
 0x6b7   :  { %v1405_v3 = vpop.trf.xlu2 }
 0x6b8   :  { %2961 = vmatmul.msk.f32.gmra.mxu0 %vm343_vm5, %v1405_v3 }
 0x6bf   :  { %v1406_v39 = vpop.trf.xlu2 }
 0x6c0   :  { %2962 = vmatmul.msk.f32.gmra.mxu0 %vm343_vm5, %v1406_v39  ;;  %v3090_v39 = vld [vmem:[%s5568_s1 + $0x50] sm:$0xff]  }
 0x6c3   :  { %v1043_v23 = vpop.trf.xlu1 }
 0x6c4   :  { %2933 = vmatmul.msk.f32.vlgmr.msra.gmra.mxu2 %vm343_vm5, %v1043_v23  ;;  %v3059_v23 = vunpack.c.l.bf16 %v3090_v39 }
 0x6c7   :  { %v1407_v61 = vpop.trf.xlu2 }
 0x6c8   :  { %2963 = vmatmul.msk.f32.gmra.mxu0 %vm343_vm5, %v1407_v61 }
 0x6cb   :  { %v1044_v53 = vpop.trf.xlu1 }
 0x6cc   :  { %2934 = vmatmul.msk.f32.gmra.mxu2 %vm343_vm5, %v1044_v53 }
 0x6cf   :  { %v1408_v33 = vpop.trf.xlu2 }
 0x6d0   :  { %2964 = vmatmul.msk.f32.gmra.mxu0 %vm343_vm5, %v1408_v33 }
 0x6d3   :  { %v1045_v60 = vpop.trf.xlu1 }
 0x6d4   :  { %2935 = vmatmul.msk.f32.gmra.mxu2 %vm343_vm5, %v1045_v60 }
 0x6d7   :  { %v1409_v58 = vpop.trf.xlu2 }
 0x6d8   :  { %2965 = vmatmul.msk.f32.gmra.mxu0 %vm343_vm5, %v1409_v58 }
 0x6db   :  { %v1046_v47 = vpop.trf.xlu1 }
 0x6dc   :  { %2936 = vmatmul.msk.f32.gmra.mxu2 %vm343_vm5, %v1046_v47  ;;  %v3060_v47 = vunpack.c.h.bf16 %v3090_v39 }
 0x6df   :  { %v1410_v2 = vpop.trf.xlu2 }
 0x6e0   :  { %2966 = vmatmul.msk.f32.gmra.mxu0 %vm343_vm5, %v1410_v2 }
 0x6e3   :  { %v1047_v56 = vpop.trf.xlu1 }
 0x6e4   :  { %2937 = vmatmul.msk.f32.gmra.mxu2 %vm343_vm5, %v1047_v56 }
 0x6e7   :  { %v1411_v5 = vpop.trf.xlu2 }
 0x6e8   :  { %2967 = vmatmul.msk.f32.gmra.mxu0 %vm343_vm5, %v1411_v5 }
 0x6ea   :  { %v3972_v35 = vpop.f32.mrf.mxu0 }
 0x6eb   :  { %v1048_v10 = vpop.trf.xlu1 }
 0x6ec   :  { %2938 = vmatmul.msk.f32.gmra.mxu2 %vm343_vm5, %v1048_v10 }
 0x6ef   :  { %v1412_v36 = vpop.trf.xlu2 }
 0x6f0   :  { %2968 = vmatmul.msk.f32.gmra.mxu0 %vm343_vm5, %v1412_v36  ;;  %v3091_v36 = vld [vmem:[%s5568_s1 + $0x58] sm:$0xff]  }
 0x6f1   :  { %v3064_v27 = vunpack.c.h.bf16 %v3091_v36 }
 0x6f3   :  { %v1049_v6 = vpop.trf.xlu1 }
 0x6f4   :  { %2939 = vmatmul.msk.f32.gmra.mxu2 %vm343_vm5, %v1049_v6  ;;  %v3063_v6 = vunpack.c.l.bf16 %v3091_v36 }
 0x6f7   :  { %v1413_v62 = vpop.trf.xlu2 }
 0x6f8   :  { %2969 = vmatmul.msk.f32.gmra.mxu0 %vm343_vm5, %v1413_v62 }
 0x6fb   :  { %v1050_v50 = vpop.trf.xlu1 }
 0x6fc   :  { %2940 = vmatmul.msk.f32.gmra.mxu2 %vm343_vm5, %v1050_v50 }
 0x703   :  { %v1051_v15 = vpop.trf.xlu1 }
 0x704   :  { %2941 = vmatmul.msk.f32.gmra.mxu2 %vm343_vm5, %v1051_v15  ;;  %v3088_v15 = vld [vmem:[%s5568_s1 + $0x40] sm:$0xff]  }
 0x70b   :  { %v1052_v1 = vpop.trf.xlu1 }
 0x70c   :  { %2942 = vmatmul.msk.f32.gmra.mxu2 %vm343_vm5, %v1052_v1 }
 0x713   :  { %v1053_v11 = vpop.trf.xlu1 }
 0x714   :  { %2943 = vmatmul.msk.f32.gmra.mxu2 %vm343_vm5, %v1053_v11  ;;  %v3052_v11 = vunpack.c.h.bf16 %v3088_v15 }
 0x715   :  { %v1482_v26 = vpop.f32.mrf.mxu0 }
 0x716   :  { %v3984_v22 = vadd.f32 %v3067_v21, %v1482_v26 }
 0x71b   :  { %v1054_v59 = vpop.trf.xlu1 }
 0x71c   :  { %2944 = vmatmul.msk.f32.gmra.mxu2 %vm343_vm5, %v1054_v59 }
 0x71d   :  { %v1485_v31 = vpop.f32.mrf.mxu0 }
 0x71e   :  { %v3990_v44 = vadd.f32 %v3068_v30, %v1485_v31 }
 0x723   :  { %v1055_v41 = vpop.trf.xlu1 }
 0x724   :  { %2945 = vmatmul.msk.f32.gmra.mxu2 %vm343_vm5, %v1055_v41 }
 0x725   :  { %v1488_v32 = vpop.f32.mrf.mxu0 }
 0x726   :  { %v3996_v46 = vadd.f32 %v3071_v43, %v1488_v32 }
 0x72b   :  { %v1056_v42 = vpop.trf.xlu1 }
 0x72c   :  { %2946 = vmatmul.msk.f32.gmra.mxu2 %vm343_vm5, %v1056_v42 }
 0x72d   :  { %v1491_v45 = vpop.f32.mrf.mxu0 }
 0x72e   :  { %v3999_v14 = vadd.f32 %v3072_v17, %v1491_v45 }
 0x733   :  { %v1057_v19 = vpop.trf.xlu1 }
 0x734   :  { %2947 = vmatmul.msk.f32.gmra.mxu2 %vm343_vm5, %v1057_v19 }
 0x735   :  { %v1494_v34 = vpop.f32.mrf.mxu0 }
 0x736   :  { %v4008_v7 = vadd.f32 %v3075_v12, %v1494_v34 }
 0x73b   :  { %v1058_v28 = vpop.trf.xlu1 }
 0x73c   :  { %2948 = vmatmul.msk.f32.gmra.mxu2 %vm343_vm5, %v1058_v28 }
 0x73d   :  { %v4011_v48 = vpop.f32.mrf.mxu0 }
 0x745   :  { %v4013_v38 = vpop.f32.mrf.mxu0 }
 0x747   :  { %v1124_v57 = vpop.f32.mrf.mxu2 }
 0x74d   :  { %v4015_v18 = vpop.f32.mrf.mxu0 }
 0x74f   :  { %v1127_v51 = vpop.f32.mrf.mxu2 }
 0x750   :  { %v1190_v31 = vadd.f32 %v3052_v11, %v1127_v51 }
 0x752   :  { %v4060_v32 = vadd.f32 %v1190_v31, %v3611_v29 }
 0x755   :  { %v4023_v52 = vpop.f32.mrf.mxu0 }
 0x757   :  { %v1130_v54 = vpop.f32.mrf.mxu2 }
 0x758   :  { %v4027_v13 = vadd.f32 %v3055_v49, %v1130_v54 }
 0x75d   :  { %v4030_v9 = vpop.f32.mrf.mxu0 }
 0x75f   :  { %v1133_v55 = vpop.f32.mrf.mxu2 }
 0x760   :  { %v4034_v3 = vadd.f32 %v3056_v20, %v1133_v55 }
 0x765   :  { %v1512_v61 = vpop.f32.mrf.mxu0 }
 0x766   :  { %v1557_v53 = vadd.f32 %v3071_v43, %v1512_v61  ;;  %v3051_v43 = vunpack.c.l.bf16 %v3088_v15  ;;  %v1414_v61 = vpop.trf.xlu2 }
 0x767   :  { %v1136_v33 = vpop.f32.mrf.mxu2  ;;  %2970 = vmatmul.msk.f32.gmra.mxu0 %vm343_vm5, %v1414_v61 }
 0x768   :  { %v4040_v60 = vadd.f32 %v1557_v53, %v3581_v63  ;;  %v4042_v58 = vadd.f32 %v3059_v23, %v1136_v33  ;;  %v1189_v42 = vadd.f32 %v3051_v43, %v1124_v57 }
 0x76a   :  { %1599 = vmax.xlane.f32.xlu1 %v4040_v60  ;;  %v4064_v19 = vadd.f32 %v1189_v42, %v3611_v29 }
 0x76d   :  { %v1515_v2 = vpop.f32.mrf.mxu0 }
 0x76e   :  { %v1558_v56 = vadd.f32 %v3072_v17, %v1515_v2  ;;  %v1415_v2 = vpop.trf.xlu2 }
 0x76f   :  { %v1139_v5 = vpop.f32.mrf.mxu2  ;;  %2971 = vmatmul.msk.f32.gmra.mxu0 %vm343_vm5, %v1415_v2  ;;  %v4172_v2 = vadd.f32 %v3999_v14, %v3611_v29 }
 0x770   :  { %v4045_v10 = vadd.f32 %v3060_v47, %v1139_v5 }
 0x775   :  { %v1518_v62 = vpop.f32.mrf.mxu0 }
 0x776   :  { %v1559_v50 = vadd.f32 %v3075_v12, %v1518_v62 }
 0x777   :  { %v1142_v1 = vpop.f32.mrf.mxu2 }
 0x778   :  { %v4053_v26 = vadd.f32 %v3063_v6, %v1142_v1  ;;  %v4056_v59 = vadd.f32 %v1559_v50, %v3581_v63  ;;  %v1416_v50 = vpop.trf.xlu2  ;;  %v1574_v1 = vadd.f32 %v1558_v56, %v3581_v63 }
 0x779   :  { %2972 = vmatmul.msk.f32.gmra.mxu0 %vm343_vm5, %v1416_v50  ;;  %v4182_v50 = vadd.f32 %v4042_v58, %v3611_v29 }
 0x77a   :  { %1603 = vmax.xlane.f32.xlu2 %v4056_v59 }
 0x77f   :  { %v1145_v41 = vpop.f32.mrf.mxu2 }
 0x780   :  { %v1196_v17 = vadd.f32 %v3064_v27, %v1145_v41 }
 0x782   :  { %1223 = vmax.xlane.f32.xlu2 %v4060_v32 }
 0x787   :  { %v1148_v45 = vpop.f32.mrf.mxu2 }
 0x788   :  { %v1197_v12 = vadd.f32 %v3051_v43, %v1148_v45 }
 0x78a   :  { %1221 = vmax.xlane.f32.xlu2 %v4064_v19 }
 0x78f   :  { %v1151_v34 = vpop.f32.mrf.mxu2 }
 0x790   :  { %v1198_v28 = vadd.f32 %v3052_v11, %v1151_v34 }
 0x797   :  { %v1154_v51 = vpop.f32.mrf.mxu2 }
 0x79f   :  { %v1157_v54 = vpop.f32.mrf.mxu2 }
 0x7a7   :  { %v1160_v55 = vpop.f32.mrf.mxu2 }
 0x7a8   :  { %v1201_v11 = vadd.f32 %v3059_v23, %v1160_v55  ;;  %v1199_v23 = vadd.f32 %v3055_v49, %v1154_v51  ;;  %v4117_v49 = vadd.f32 %v1198_v28, %v3581_v63  ;;  %v4141_v28 = vadd.f32 %v1196_v17, %v3611_v29 }
 0x7a9   :  { %v4160_v55 = vadd.f32 %v4008_v7, %v3611_v29 }
 0x7aa   :  { %v4084_v31 = vadd.f32 %v1201_v11, %v3581_v63  ;;  %v4100_v56 = vadd.f32 %v1199_v23, %v3581_v63  ;;  %v4190_v11 = vadd.f32 %v3996_v46, %v3611_v29 }
 0x7af   :  { %v1163_v39 = vpop.f32.mrf.mxu2 }
 0x7b0   :  { %v1202_v15 = vadd.f32 %v3060_v47, %v1163_v39  ;;  %v1556_v47 = vadd.f32 %v3068_v30, %v4030_v9  ;;  %v4113_v30 = vld [vmem:[%s5568_s1 + $0x78] sm:$0xff]   ;;  %v4129_v9 = vadd.f32 %v1197_v12, %v3581_v63  ;;  %v4167_v39 = vadd.f32 %v4045_v10, %v3611_v29 }
 0x7b1   :  { %v3080_v4 = vunpack.c.h.bf16 %v4113_v30 }
 0x7b2   :  { %v4094_v43 = vadd.f32 %v1556_v47, %v3581_v63  ;;  %v4200_v47 = vadd.f32 %v4034_v3, %v3611_v29 }
 0x7b3   :  { %v1554_v25 = vadd.f32 %v3080_v4, %v4015_v18  ;;  %v3076_v18 = vunpack.c.h.bf16 %v4004_v16 }
 0x7b5   :  { %v1552_v12 = vadd.f32 %v3076_v18, %v4011_v48 }
 0x7b7   :  { %v1166_v53 = vpop.f32.mrf.mxu2  ;;  %v4148_v51 = vadd.f32 %v1552_v12, %v3611_v29 }
 0x7b8   :  { %v1203_v33 = vadd.f32 %v3063_v6, %v1166_v53  ;;  %v4079_v6 = vadd.f32 %v1202_v15, %v3581_v63 }
 0x7ba   :  { %v4069_v57 = vadd.f32 %v1203_v33, %v3581_v63 }
 0x7bc   :  { %1249 = vmax.xlane.f32.xlu0 %v4069_v57 }
 0x7bf   :  { %v1169_v5 = vpop.f32.mrf.mxu2 }
 0x7c0   :  { %v1204_v36 = vadd.f32 %v3064_v27, %v1169_v5  ;;  %v1200_v27 = vadd.f32 %v3056_v20, %v1157_v54  ;;  %v1555_v20 = vadd.f32 %v3067_v21, %v4023_v52  ;;  %v4124_v21 = vadd.f32 %v1554_v25, %v3611_v29 }
 0x7c1   :  { %v3079_v52 = vunpack.c.l.bf16 %v4113_v30  ;;  %v4155_v54 = vadd.f32 %v4053_v26, %v3611_v29  ;;  %v4208_v25 = vadd.f32 %v3990_v44, %v3611_v29 }
 0x7c2   :  { %v4074_v62 = vadd.f32 %v1204_v36, %v3581_v63  ;;  %v1216_v41 = vadd.f32 %v1200_v27, %v3581_v63  ;;  %v4107_v42 = vadd.f32 %v1555_v20, %v3581_v63 }
 0x7c3   :  { %v1553_v45 = vadd.f32 %v3079_v52, %v4013_v38 }
 0x7c4   :  { %1251 = vmax.xlane.f32.xlu0 %v4074_v62 }
 0x7c5   :  { %v4136_v34 = vadd.f32 %v1553_v45, %v3611_v29 }
 0x7cc   :  { %1247 = vmax.xlane.f32.xlu0 %v4079_v6 }
 0x7d4   :  { %1601 = vmax.xlane.f32.xlu0 %v1574_v1 }
 0x7dc   :  { %1245 = vmax.xlane.f32.xlu0 %v4084_v31 }
 0x7dd   :  { %v1600_v53 = vpop.xlane.xlu1 %1599 }
 0x7de   :  { %v1621_v7 = vsub.f32 %v4040_v60, %v1600_v53 }
 0x7e0   :  { %v1647_v36 = vmul.f32 1.442695, %v1621_v7  ;;  %v4231_v7 = vadd.f32 %v3984_v22, %v3611_v29 }
 0x7e4   :  { %1243 = vmax.xlane.f32.xlu0 %v1216_v41 }
 0x7ec   :  { %1597 = vmax.xlane.f32.xlu0 %v4094_v43 }
 0x7f4   :  { %1241 = vmax.xlane.f32.xlu0 %v4100_v56 }
 0x7fc   :  { %1595 = vmax.xlane.f32.xlu0 %v4107_v42 }
 0x804   :  { %1239 = vmax.xlane.f32.xlu0 %v4117_v49 }
 0x80c   :  { %1593 = vmax.xlane.f32.xlu0 %v4124_v21 }
 0x814   :  { %1237 = vmax.xlane.f32.xlu0 %v4129_v9 }
 0x81c   :  { %1591 = vmax.xlane.f32.xlu0 %v4136_v34 }
 0x824   :  { %1235 = vmax.xlane.f32.xlu0 %v4141_v28 }
 0x82c   :  { %1589 = vmax.xlane.f32.xlu0 %v4148_v51 }
 0x82f   :  { %v4151_v38 = vpop.xlane.xlu0 %1249 }
 0x834   :  { %1233 = vmax.xlane.f32.xlu0 %v4155_v54 }
 0x837   :  { %v1252_v17 = vpop.xlane.xlu0 %1251 }
 0x838   :  { %v1268_v46 = vsub.f32 %v4074_v62, %v1252_v17  ;;  %v4224_v17 = vadd.f32 %v4027_v13, %v3611_v29 }
 0x83a   :  { %v1299_v20 = vmul.f32 1.442695, %v1268_v46 }
 0x83c   :  { %1587 = vmax.xlane.f32.xlu0 %v4160_v55 }
 0x83f   :  { %v4163_v48 = vpop.xlane.xlu0 %1247 }
 0x844   :  { %1231 = vmax.xlane.f32.xlu0 %v4167_v39 }
 0x847   :  { %v1602_v61 = vpop.xlane.xlu0 %1601 }
 0x848   :  { %v1622_v26 = vsub.f32 %v1574_v1, %v1602_v61 }
 0x84a   :  { %v1649_v33 = vmul.f32 1.442695, %v1622_v26 }
 0x84c   :  { %3266 = vpow2.f32 %v1649_v33  ;;  %1585 = vmax.xlane.f32.xlu0 %v4172_v2 }
 0x84d   :  { %3268 = vpow2.f32 %v1647_v36 }
 0x84f   :  { %v4176_v5 = vpop.xlane.xlu0 %1245 }
 0x852   :  { %v4178_v10 = vpop.eup %3266 }
 0x853   :  { %1681 = vadd.xlane.f32.xlu1 %v4178_v10  ;;  %v4186_v60 = vpop.eup %3268 }
 0x854   :  { %1229 = vmax.xlane.f32.xlu0 %v4182_v50 }
 0x857   :  { %v1244_v14 = vpop.xlane.xlu0 %1243 }
 0x858   :  { %v1264_v15 = vsub.f32 %v1216_v41, %v1244_v14 }
 0x85a   :  { %v1291_v1 = vmul.f32 1.442695, %v1264_v15 }
 0x85b   :  { %1679 = vadd.xlane.f32.xlu1 %v4186_v60 }
 0x85c   :  { %3270 = vpow2.f32 %v1291_v1  ;;  %1583 = vmax.xlane.f32.xlu0 %v4190_v11 }
 0x85f   :  { %v4194_v58 = vpop.xlane.xlu0 %1597 }
 0x862   :  { %v4196_v27 = vpop.eup %3270 }
 0x863   :  { %1323 = vadd.xlane.f32.xlu2 %v4196_v27 }
 0x864   :  { %1227 = vmax.xlane.f32.xlu0 %v4200_v47 }
 0x867   :  { %v1242_v41 = vpop.xlane.xlu0 %1241 }
 0x868   :  { %v1263_v23 = vsub.f32 %v4100_v56, %v1242_v41 }
 0x86a   :  { %v1289_v45 = vmul.f32 1.442695, %v1263_v23 }
 0x86c   :  { %3272 = vpow2.f32 %v1289_v45  ;;  %1581 = vmax.xlane.f32.xlu0 %v4208_v25 }
 0x86d   :  { %3274 = vpow2.f32 %v1299_v20  ;;  %v1267_v20 = vsub.f32 %v4069_v57, %v4151_v38 }
 0x86f   :  { %v1596_v3 = vpop.xlane.xlu0 %1595 }
 0x870   :  { %v1619_v12 = vsub.f32 %v4107_v42, %v1596_v3  ;;  %v1521_v42 = vpop.f32.mrf.mxu0 }
 0x871   :  { %v1560_v13 = vadd.f32 %v3076_v18, %v1521_v42  ;;  %v1266_v42 = vsub.f32 %v4079_v6, %v4163_v48 }
 0x872   :  { %v4212_v61 = vpop.eup %3272  ;;  %v1643_v26 = vmul.f32 1.442695, %v1619_v12  ;;  %v1297_v12 = vmul.f32 1.442695, %v1267_v20 }
 0x873   :  { %v4214_v62 = vpop.eup %3274  ;;  %1321 = vadd.xlane.f32.xlu1 %v4212_v61  ;;  %v4238_v46 = vadd.f32 %v1560_v13, %v3581_v63 }
 0x874   :  { %3276 = vpow2.f32 %v1643_v26  ;;  %1331 = vadd.xlane.f32.xlu0 %v4214_v62 }
 0x877   :  { %v4218_v44 = vpop.xlane.xlu0 %1239 }
 0x878   :  { %v1524_v15 = vpop.f32.mrf.mxu0 }
 0x879   :  { %v1561_v29 = vadd.f32 %v3079_v52, %v1524_v15 }
 0x87a   :  { %v4220_v56 = vpop.eup %3276 }
 0x87b   :  { %1675 = vadd.xlane.f32.xlu2 %v4220_v56  ;;  %v4249_v16 = vadd.f32 %v1561_v29, %v3581_v63 }
 0x87c   :  { %1225 = vmax.xlane.f32.xlu0 %v4224_v17 }
 0x87f   :  { %v1594_v53 = vpop.xlane.xlu0 %1593 }
 0x880   :  { %v1618_v33 = vsub.f32 %v4124_v21, %v1594_v53  ;;  %v1295_v53 = vmul.f32 1.442695, %v1266_v42 }
 0x882   :  { %v1641_v36 = vmul.f32 1.442695, %v1618_v33 }
 0x884   :  { %3278 = vpow2.f32 %v1641_v36  ;;  %1579 = vmax.xlane.f32.xlu0 %v4231_v7 }
 0x887   :  { %v1238_v14 = vpop.xlane.xlu0 %1237 }
 0x888   :  { %v1261_v1 = vsub.f32 %v4129_v9, %v1238_v14  ;;  %v1527_v9 = vpop.f32.mrf.mxu0 }
 0x889   :  { %v1562_v23 = vadd.f32 %v3080_v4, %v1527_v9 }
 0x88a   :  { %v4240_v41 = vpop.eup %3278  ;;  %v1285_v21 = vmul.f32 1.442695, %v1261_v1 }
 0x88b   :  { %1673 = vadd.xlane.f32.xlu1 %v4240_v41  ;;  %v4261_v3 = vadd.f32 %v1562_v23, %v3581_v63  ;;  %v1604_v63 = vpop.xlane.xlu2 %1603 }
 0x88c   :  { %3280 = vpow2.f32 %v1285_v21  ;;  %1605 = vmax.xlane.f32.xlu0 %v4238_v46  ;;  %v1623_v33 = vsub.f32 %v4056_v59, %v1604_v63 }
 0x88e   :  { %v1651_v6 = vmul.f32 1.442695, %v1623_v33 }
 0x88f   :  { %v4246_v22 = vpop.xlane.xlu0 %1591 }
 0x892   :  { %v4251_v18 = vpop.eup %3280 }
 0x893   :  { %1317 = vadd.xlane.f32.xlu2 %v4251_v18 }
 0x894   :  { %1607 = vmax.xlane.f32.xlu0 %v4249_v16 }
 0x897   :  { %v1236_v45 = vpop.xlane.xlu0 %1235 }
 0x898   :  { %v1260_v52 = vsub.f32 %v4141_v28, %v1236_v45 }
 0x89a   :  { %v1283_v26 = vmul.f32 1.442695, %v1260_v52 }
 0x89c   :  { %3282 = vpow2.f32 %v1283_v26  ;;  %1609 = vmax.xlane.f32.xlu0 %v4261_v3 }
 0x89d   :  { %3284 = vpow2.f32 %v1297_v12 }
 0x89f   :  { %v1590_v30 = vpop.xlane.xlu0 %1589 }
 0x8a0   :  { %v1616_v4 = vsub.f32 %v4148_v51, %v1590_v30 }
 0x8a2   :  { %v4267_v57 = vpop.eup %3282  ;;  %v1637_v38 = vmul.f32 1.442695, %v1616_v4 }
 0x8a3   :  { %v4269_v28 = vpop.eup %3284  ;;  %1315 = vadd.xlane.f32.xlu1 %v4267_v57 }
 0x8a4   :  { %3286 = vpow2.f32 %v1637_v38  ;;  %1329 = vadd.xlane.f32.xlu0 %v4269_v28  ;;  %v1224_v38 = vpop.xlane.xlu2 %1223 }
 0x8a5   :  { %3288 = vpow2.f32 %v1295_v53  ;;  %v1254_v33 = vsub.f32 %v4060_v32, %v1224_v38 }
 0x8a6   :  { %3290 = vpow2.f32 %v1651_v6 }
 0x8a7   :  { %v4274_v36 = vpop.xlane.xlu0 %1233  ;;  %v1271_v6 = vmul.f32 1.442695, %v1254_v33 }
 0x8aa   :  { %v4276_v48 = vpop.eup %3286 }
 0x8ab   :  { %v4278_v51 = vpop.eup %3288  ;;  %1669 = vadd.xlane.f32.xlu2 %v4276_v48 }
 0x8ac   :  { %1327 = vadd.xlane.f32.xlu0 %v4278_v51  ;;  %v4283_v1 = vpop.eup %3290 }
 0x8af   :  { %v1588_v13 = vpop.xlane.xlu0 %1587 }
 0x8b0   :  { %v1615_v14 = vsub.f32 %v4160_v55, %v1588_v13 }
 0x8b2   :  { %v1635_v15 = vmul.f32 1.442695, %v1615_v14 }
 0x8b4   :  { %3292 = vpow2.f32 %v1635_v15  ;;  %1683 = vadd.xlane.f32.xlu0 %v4283_v1 }
 0x8b7   :  { %v1232_v59 = vpop.xlane.xlu0 %1231 }
 0x8b8   :  { %v1258_v21 = vsub.f32 %v4167_v39, %v1232_v59 }
 0x8ba   :  { %v4287_v29 = vpop.eup %3292  ;;  %v1279_v9 = vmul.f32 1.442695, %v1258_v21 }
 0x8bb   :  { %1667 = vadd.xlane.f32.xlu1 %v4287_v29 }
 0x8bc   :  { %3294 = vpow2.f32 %v1279_v9 }
 0x8bf   :  { %v4290_v23 = vpop.xlane.xlu0 %1585 }
 0x8c2   :  { %v4292_v20 = vpop.eup %3294 }
 0x8c3   :  { %1311 = vadd.xlane.f32.xlu2 %v4292_v20 }
 0x8c7   :  { %v1230_v55 = vpop.xlane.xlu0 %1229 }
 0x8c8   :  { %v1257_v45 = vsub.f32 %v4182_v50, %v1230_v55 }
 0x8ca   :  { %v1277_v52 = vmul.f32 1.442695, %v1257_v45 }
 0x8cc   :  { %3296 = vpow2.f32 %v1277_v52 }
 0x8cf   :  { %v1584_v12 = vpop.xlane.xlu0 %1583 }
 0x8d0   :  { %v1613_v39 = vsub.f32 %v4190_v11, %v1584_v12 }
 0x8d2   :  { %v4297_v26 = vpop.eup %3296  ;;  %v1631_v42 = vmul.f32 1.442695, %v1613_v39 }
 0x8d3   :  { %1309 = vadd.xlane.f32.xlu1 %v4297_v26 }
 0x8d4   :  { %3298 = vpow2.f32 %v1631_v42 }
 0x8d7   :  { %v4300_v30 = vpop.xlane.xlu0 %1227 }
 0x8da   :  { %v4302_v4 = vpop.eup %3298 }
 0x8db   :  { %1663 = vadd.xlane.f32.xlu2 %v4302_v4 }
 0x8df   :  { %v1582_v53 = vpop.xlane.xlu0 %1581 }
 0x8e0   :  { %v1612_v50 = vsub.f32 %v4208_v25, %v1582_v53  ;;  %v1222_v25 = vpop.xlane.xlu2 %1221 }
 0x8e1   :  { %v1253_v55 = vsub.f32 %v4064_v19, %v1222_v25 }
 0x8e2   :  { %v1629_v63 = vmul.f32 1.442695, %v1612_v50 }
 0x8e3   :  { %v1269_v52 = vmul.f32 1.442695, %v1253_v55 }
 0x8e4   :  { %3300 = vpow2.f32 %v1629_v63 }
 0x8e7   :  { %v1332_v11 = vpop.xlane.xlu0 %1331 }
 0x8e8   :  { %3302 = vrcp.f32 %v1332_v11 }
 0x8e9   :  { %3304 = vpow2.f32 %v1271_v6  ;;  %v1265_v6 = vsub.f32 %v4084_v31, %v4176_v5  ;;  %v1262_v31 = vsub.f32 %v4117_v49, %v4218_v44  ;;  %v1259_v49 = vsub.f32 %v4155_v54, %v4274_v36 }
 0x8ea   :  { %v4307_v13 = vpop.eup %3300 }
 0x8eb   :  { %1661 = vadd.xlane.f32.xlu1 %v4307_v13  ;;  %v1281_v44 = vmul.f32 1.442695, %v1259_v49 }
 0x8ee   :  { %v3303_v14 = vpop.eup %3302 }
 0x8ef   :  { %v1226_v15 = vpop.xlane.xlu0 %1225  ;;  %v1364_v59 = vmul.f32 %v3303_v14, %v4214_v62  ;;  %v4312_v9 = vpop.eup %3304 }
 0x8f0   :  { %v1255_v21 = vsub.f32 %v4224_v17, %v1226_v15 }
 0x8f1   :  { %1365 = vmatpush.xpose.msra.mxu1 %v1364_v59  ;;  %v1620_v59 = vsub.f32 %v4094_v43, %v4194_v58  ;;  %v1617_v58 = vsub.f32 %v4136_v34, %v4246_v22  ;;  %v1256_v22 = vsub.f32 %v4200_v47, %v4300_v30 }
 0x8f2   :  { %v1273_v32 = vmul.f32 1.442695, %v1255_v21 }
 0x8f3   :  { %1303 = vadd.xlane.f32.xlu1 %v4312_v9 }
 0x8f4   :  { %3306 = vpow2.f32 %v1273_v32  ;;  %v1645_v32 = vmul.f32 1.442695, %v1620_v59 }
 0x8f5   :  { %3308 = vpow2.f32 %v1269_v52 }
 0x8f7   :  { %v4316_v45 = vpop.xlane.xlu0 %1579 }
 0x8f8   :  { %v1611_v36 = vsub.f32 %v4231_v7, %v4316_v45 }
 0x8fa   :  { %v4318_v12 = vpop.eup %3306 }
 0x8fb   :  { %1305 = vadd.xlane.f32.xlu2 %v4318_v12  ;;  %v4322_v39 = vpop.eup %3308 }
 0x8ff   :  { %v1606_v62 = vpop.xlane.xlu0 %1605 }
 0x900   :  { %v1624_v17 = vsub.f32 %v4238_v46, %v1606_v62  ;;  %v1287_v62 = vmul.f32 1.442695, %v1262_v31 }
 0x902   :  { %v1653_v42 = vmul.f32 1.442695, %v1624_v17 }
 0x903   :  { %1301 = vadd.xlane.f32.xlu2 %v4322_v39 }
 0x904   :  { %3310 = vpow2.f32 %v1653_v42  ;;  %v1614_v42 = vsub.f32 %v4172_v2, %v4290_v23 }
 0x907   :  { %v1608_v53 = vpop.xlane.xlu0 %1607 }
 0x908   :  { %v1625_v19 = vsub.f32 %v4249_v16, %v1608_v53  ;;  %v1293_v16 = vmul.f32 1.442695, %v1265_v6  ;;  %v1633_v53 = vmul.f32 1.442695, %v1614_v42 }
 0x90a   :  { %v4326_v50 = vpop.eup %3310  ;;  %v1655_v38 = vmul.f32 1.442695, %v1625_v19  ;;  %v1275_v19 = vmul.f32 1.442695, %v1256_v22 }
 0x90b   :  { %1685 = vadd.xlane.f32.xlu0 %v4326_v50 }
 0x90c   :  { %3312 = vpow2.f32 %v1655_v38  ;;  %v1627_v38 = vmul.f32 1.442695, %v1611_v36 }
 0x90f   :  { %v1610_v63 = vpop.xlane.xlu0 %1609 }
 0x910   :  { %v1626_v33 = vsub.f32 %v4261_v3, %v1610_v63  ;;  %v1682_v63 = vpop.xlane.xlu1 %1681 }
 0x912   :  { %v4330_v11 = vpop.eup %3312  ;;  %v1657_v46 = vmul.f32 1.442695, %v1626_v33 }
 0x913   :  { %1687 = vadd.xlane.f32.xlu0 %v4330_v11 }
 0x914   :  { %3314 = vpow2.f32 %v1657_v46 }
 0x917   :  { %v1330_v14 = vpop.xlane.xlu0 %1329 }
 0x918   :  { %3316 = vrcp.f32 %v1330_v14  ;;  %v1680_v6 = vpop.xlane.xlu1 %1679  ;;  %v1324_v14 = vpop.xlane.xlu2 %1323 }
 0x919   :  { %3318 = vpow2.f32 %v1293_v16 }
 0x91a   :  { %v3315_v15 = vpop.eup %3314 }
 0x91b   :  { %1689 = vadd.xlane.f32.xlu0 %v3315_v15 }
 0x91e   :  { %v3317_v21 = vpop.eup %3316 }
 0x91f   :  { %v1328_v3 = vpop.xlane.xlu0 %1327  ;;  %v1363_v25 = vmul.f32 %v3317_v21, %v4269_v28  ;;  %v4338_v55 = vpop.eup %3318  ;;  %v1639_v28 = vmul.f32 1.442695, %v1617_v58 }
 0x920   :  { %3320 = vrcp.f32 %v1328_v3  ;;  %v1322_v21 = vpop.xlane.xlu1 %1321 }
 0x921   :  { %1366 = vmatpush.xpose.msra.mxu1 %v1363_v25  ;;  %3322 = vpow2.f32 %v1645_v32  ;;  %v1676_v32 = vpop.xlane.xlu2 %1675 }
 0x922   :  { %3324 = vpow2.f32 %v1287_v62 }
 0x923   :  { %1325 = vadd.xlane.f32.xlu0 %v4338_v55  ;;  %3326 = vpow2.f32 %v1639_v28 }
 0x924   :  { %3328 = vpow2.f32 %v1281_v44 }
 0x925   :  { %3330 = vpow2.f32 %v1633_v53 }
 0x926   :  { %v3321_v5 = vpop.eup %3320  ;;  %3332 = vpow2.f32 %v1275_v19 }
 0x927   :  { %v1362_v52 = vmul.f32 %v3321_v5, %v4278_v51  ;;  %v4344_v43 = vpop.eup %3322  ;;  %3334 = vpow2.f32 %v1627_v38  ;;  %v1684_v47 = vpop.xlane.xlu0 %1683 }
 0x928   :  { %v4349_v17 = vpop.eup %3324  ;;  %v1674_v28 = vpop.xlane.xlu1 %1673 }
 0x929   :  { %1367 = vmatpush.xpose.msra.mxu1 %v1362_v52  ;;  %v4354_v51 = vpop.eup %3326  ;;  %v1318_v53 = vpop.xlane.xlu2 %1317 }
 0x92a   :  { %v4359_v34 = vpop.eup %3328 }
 0x92b   :  { %1677 = vadd.xlane.f32.xlu0 %v4344_v43  ;;  %v4364_v54 = vpop.eup %3330 }
 0x92c   :  { %v4369_v2 = vpop.eup %3332 }
 0x92d   :  { %v4372_v23 = vpop.eup %3334 }
 0x930   :  { %v1316_v36 = vpop.xlane.xlu1 %1315 }
 0x931   :  { %v1670_v38 = vpop.xlane.xlu2 %1669 }
 0x933   :  { %1319 = vadd.xlane.f32.xlu0 %v4349_v17 }
 0x93b   :  { %1671 = vadd.xlane.f32.xlu0 %v4354_v51 }
 0x943   :  { %1313 = vadd.xlane.f32.xlu0 %v4359_v34 }
 0x94b   :  { %1665 = vadd.xlane.f32.xlu0 %v4364_v54 }
 0x953   :  { %1307 = vadd.xlane.f32.xlu0 %v4369_v2 }
 0x95b   :  { %1659 = vadd.xlane.f32.xlu0 %v4372_v23 }
 0x97e   :  { %v1686_v30 = vpop.xlane.xlu0 %1685 }
 0x986   :  { %v1688_v33 = vpop.xlane.xlu0 %1687 }
 0x98e   :  { %v1690_v46 = vpop.xlane.xlu0 %1689 }
 0x98f   :  { %3336 = vrcp.f32 %v1690_v46  ;;  %v1668_v46 = vpop.xlane.xlu1 %1667 }
 0x990   :  { %3338 = vrcp.f32 %v1688_v33 }
 0x991   :  { %3340 = vrcp.f32 %v1686_v30 }
 0x995   :  { %v3337_v7 = vpop.eup %3336 }
 0x996   :  { %v1326_v45 = vpop.xlane.xlu0 %1325  ;;  %v1722_v16 = vmul.f32 %v3337_v7, %v3315_v15  ;;  %v3339_v59 = vpop.eup %3338 }
 0x997   :  { %3342 = vrcp.f32 %v1326_v45  ;;  %v1721_v3 = vmul.f32 %v3339_v59, %v4330_v11  ;;  %v3341_v25 = vpop.eup %3340  ;;  %v1312_v45 = vpop.xlane.xlu2 %1311 }
 0x998   :  { %3344 = vrcp.f32 %v1324_v14  ;;  %1723 = vmatpush.xpose.msrb.mxu3 %v1722_v16  ;;  %v1720_v15 = vmul.f32 %v3341_v25, %v4326_v50 }
 0x999   :  { %3346 = vrcp.f32 %v1684_v47 }
 0x99a   :  { %3348 = vrcp.f32 %v1682_v63 }
 0x99b   :  { %3350 = vrcp.f32 %v1322_v21  ;;  %v1310_v21 = vpop.xlane.xlu1 %1309 }
 0x99c   :  { %1724 = vmatpush.xpose.msrb.mxu3 %v1721_v3  ;;  %3352 = vrcp.f32 %v1680_v6 }
 0x99d   :  { %v3343_v31 = vpop.eup %3342 }
 0x99e   :  { %v3345_v5 = vpop.eup %3344  ;;  %v1678_v52 = vpop.xlane.xlu0 %1677  ;;  %v1361_v62 = vmul.f32 %v3343_v31, %v4338_v55 }
 0x99f   :  { %v3347_v58 = vpop.eup %3346  ;;  %v1360_v11 = vmul.f32 %v3345_v5, %v4196_v27  ;;  %3354 = vrcp.f32 %v1678_v52  ;;  %v1664_v3 = vpop.xlane.xlu2 %1663 }
 0x9a0   :  { %1368 = vmatpush.xpose.msra.mxu1 %v1361_v62  ;;  %1725 = vmatpush.xpose.msrb.mxu3 %v1720_v15  ;;  %v3349_v49 = vpop.eup %3348  ;;  %v1719_v44 = vmul.f32 %v3347_v58, %v4283_v1 }
 0x9a1   :  { %v3351_v42 = vpop.eup %3350  ;;  %v1718_v50 = vmul.f32 %v3349_v49, %v4178_v10 }
 0x9a2   :  { %v1359_v55 = vmul.f32 %v3351_v42, %v4212_v61  ;;  %v3353_v19 = vpop.eup %3352 }
 0x9a3   :  { %v1717_v27 = vmul.f32 %v3353_v19, %v4186_v60  ;;  %v1662_v52 = vpop.xlane.xlu1 %1661 }
 0x9a4   :  { %1369 = vmatpush.xpose.msra.mxu1 %v1360_v11  ;;  %1726 = vmatpush.xpose.msrb.mxu3 %v1719_v44 }
 0x9a5   :  { %v3355_v1 = vpop.eup %3354 }
 0x9a6   :  { %v1320_v22 = vpop.xlane.xlu0 %1319  ;;  %v1716_v10 = vmul.f32 %v3355_v1, %v4344_v43 }
 0x9a7   :  { %3356 = vrcp.f32 %v1320_v22  ;;  %v1306_v58 = vpop.xlane.xlu2 %1305 }
 0x9a8   :  { %3358 = vrcp.f32 %v1676_v32  ;;  %1370 = vmatpush.xpose.msra.mxu1 %v1359_v55  ;;  %1727 = vmatpush.xpose.msrb.mxu3 %v1718_v50 }
 0x9a9   :  { %3360 = vrcp.f32 %v1318_v53 }
 0x9aa   :  { %3362 = vrcp.f32 %v1674_v28 }
 0x9ab   :  { %3364 = vrcp.f32 %v1316_v36  ;;  %v1304_v44 = vpop.xlane.xlu1 %1303 }
 0x9ac   :  { %1728 = vmatpush.xpose.msrb.mxu3 %v1717_v27 }
 0x9ad   :  { %v3357_v47 = vpop.eup %3356 }
 0x9ae   :  { %v3359_v30 = vpop.eup %3358  ;;  %v1672_v63 = vpop.xlane.xlu0 %1671  ;;  %v1358_v61 = vmul.f32 %v3357_v47, %v4349_v17  ;;  %v1743_v47 = vld [vmem:[%s5567_s2 + $0x60] sm:$0xff] }
 0x9af   :  { %v3361_v33 = vpop.eup %3360  ;;  %3366 = vrcp.f32 %v1672_v63  ;;  %v1715_v14 = vmul.f32 %v3359_v30, %v4220_v56  ;;  %v1302_v53 = vpop.xlane.xlu2 %1301  ;;  %v3447_v30 = vmov 3   ;;  %v1744_v63 = vld [vmem:[%s5567_s2 + $0x68] sm:$0xff] }
 0x9b0   :  { %1371 = vmatpush.xpose.msra.mxu1 %v1358_v61  ;;  %1729 = vmatpush.xpose.msrb.mxu3 %v1716_v10  ;;  %v3363_v6 = vpop.eup %3362  ;;  %v1357_v60 = vmul.f32 %v3361_v33, %v4251_v18  ;;  %3368 = vrcp.f32 %v1670_v38 }
 0x9b1   :  { %v3365_v7 = vpop.eup %3364  ;;  %v1714_v43 = vmul.f32 %v3363_v6, %v4240_v41 }
 0x9b2   :  { %v1356_v17 = vmul.f32 %v3365_v7, %v4267_v57 }
 0x9b4   :  { %1372 = vmatpush.xpose.msra.mxu1 %v1357_v60  ;;  %1730 = vmatpush.xpose.msrb.mxu3 %v1715_v14 }
 0x9b5   :  { %v3367_v59 = vpop.eup %3366 }
 0x9b6   :  { %v1314_v16 = vpop.xlane.xlu0 %1313  ;;  %v1713_v18 = vmul.f32 %v3367_v59, %v4354_v51  ;;  %v3369_v56 = vpop.eup %3368  ;;  %v3434_v59 = vld [vmem:[%s5566_s0 + $0x10] sm:$0xff] }
 0x9b7   :  { %3370 = vrcp.f32 %v1314_v16  ;;  %v1712_v41 = vmul.f32 %v3369_v56, %v4276_v48  ;;  %v3432_v16 = vld [vmem:[%s5566_s0 + $0x8] sm:$0xff] }
 0x9b8   :  { %3372 = vrcp.f32 %v1668_v46  ;;  %1373 = vmatpush.xpose.msra.mxu1 %v1356_v17  ;;  %1731 = vmatpush.xpose.msrb.mxu3 %v1714_v43  ;;  %v3433_v43 = vld [vmem:[%s5566_s0] sm:$0xff] }
 0x9b9   :  { %3374 = vrcp.f32 %v1312_v45 }
 0x9ba   :  { %3376 = vrcp.f32 %v1310_v21 }
 0x9bc   :  { %1732 = vmatpush.xpose.msrb.mxu3 %v1713_v18 }
 0x9bd   :  { %v3371_v25 = vpop.eup %3370 }
 0x9be   :  { %v3373_v32 = vpop.eup %3372  ;;  %v1666_v31 = vpop.xlane.xlu0 %1665  ;;  %v1355_v57 = vmul.f32 %v3371_v25, %v4359_v34 }
 0x9bf   :  { %v3375_v5 = vpop.eup %3374  ;;  %3378 = vrcp.f32 %v1666_v31  ;;  %v1711_v51 = vmul.f32 %v3373_v32, %v4287_v29  ;;  %v3435_v31 = vld [vmem:[%s5566_s0 + $0x18] sm:$0xff] }
 0x9c0   :  { %1374 = vmatpush.xpose.msra.mxu1 %v1355_v57  ;;  %1733 = vmatpush.xpose.msrb.mxu3 %v1712_v41  ;;  %3380 = vrcp.f32 %v1664_v3  ;;  %v1354_v62 = vmul.f32 %v3375_v5, %v4292_v20  ;;  %v3377_v15 = vpop.eup %3376 }
 0x9c1   :  { %3382 = vrcp.f32 %v1662_v52  ;;  %v1353_v34 = vmul.f32 %v3377_v15, %v4297_v26 }
 0x9c4   :  { %1375 = vmatpush.xpose.msra.mxu1 %v1354_v62  ;;  %1734 = vmatpush.xpose.msrb.mxu3 %v1711_v51 }
 0x9c5   :  { %v3379_v28 = vpop.eup %3378 }
 0x9c6   :  { %v1308_v49 = vpop.xlane.xlu0 %1307  ;;  %v1710_v48 = vmul.f32 %v3379_v28, %v4364_v54  ;;  %v3381_v11 = vpop.eup %3380 }
 0x9c7   :  { %3384 = vrcp.f32 %v1308_v49  ;;  %v1709_v20 = vmul.f32 %v3381_v11, %v4302_v4  ;;  %v3383_v29 = vpop.eup %3382 }
 0x9c8   :  { %1376 = vmatpush.xpose.msra.mxu1 %v1353_v34  ;;  %1735 = vmatpush.xpose.msrb.mxu3 %v1710_v48  ;;  %3386 = vrcp.f32 %v1306_v58  ;;  %v1708_v26 = vmul.f32 %v3383_v29, %v4307_v13  ;;  %v3445_v13 = vmov 4   ;;  %v1921_v29 = vld [vmem:[%s5569_s5 + $0x70] sm:$0xff] }
 0x9c9   :  { %3388 = vrcp.f32 %v1304_v44  ;;  %3119 = vset.pattern.permute.xlu1 %v3445_v13  ;;  %3118 = vset.pattern.permute.xlu0 %v3445_v13 }
 0x9ca   :  { %3120 = vset.pattern.permute.xlu2 %v3445_v13 }
 0x9cc   :  { %1736 = vmatpush.xpose.msrb.mxu3 %v1709_v20 }
 0x9cd   :  { %v3385_v42 = vpop.eup %3384 }
 0x9ce   :  { %v1660_v22 = vpop.xlane.xlu0 %1659  ;;  %v1352_v55 = vmul.f32 %v3385_v42, %v4369_v2  ;;  %v3387_v50 = vpop.eup %3386 }
 0x9cf   :  { %3390 = vrcp.f32 %v1660_v22  ;;  %v1351_v54 = vmul.f32 %v3387_v50, %v4318_v12  ;;  %v3389_v19 = vpop.eup %3388  ;;  %v3428_v12 = vld [vmem:[%s5565_s4 + $0x8] sm:$0xff] }
 0x9d0   :  { %1377 = vmatpush.xpose.msra.mxu1 %v1352_v55  ;;  %1737 = vmatpush.xpose.msrb.mxu3 %v1708_v26  ;;  %3392 = vrcp.f32 %v1302_v53  ;;  %v1350_v36 = vmul.f32 %v3389_v19, %v4312_v9  ;;  %v3429_v9 = vld [vmem:[%s5565_s4] sm:$0xff] }
 0x9d1   :  { %1752 = vperm.xlu1 %3119, %v3428_v12   ;;  %1748 = vperm.xlu0 %3118, %v3429_v9  }
 0x9d4   :  { %1378 = vmatpush.xpose.msra.mxu1 %v1351_v54  ;;  %v1919_v54 = vld [vmem:[%s5569_s5 + $0x60] sm:$0xff] }
 0x9d5   :  { %v3391_v4 = vpop.eup %3390 }
 0x9d6   :  { %v1707_v27 = vmul.f32 %v3391_v4, %v4372_v23  ;;  %v3393_v1 = vpop.eup %3392  ;;  %v3446_v23 = vmov 2  }
 0x9d7   :  { %v1349_v2 = vmul.f32 %v3393_v1, %v4322_v39  ;;  %v1922_v1 = vld [vmem:[%s5569_s5 + $0x78] sm:$0xff] }
 0x9d8   :  { %1379 = vmatpush.xpose.msra.mxu1 %v1350_v36  ;;  %1738 = vmatpush.xpose.msrb.mxu3 %v1707_v27  ;;  %v1916_v27 = vld [vmem:[%s5569_s5 + $0x48] sm:$0xff] }
 0x9d9   :  { %3124 = vset.pattern.permute.xlu0 %v3446_v23 }
 0x9da   :  { %1856 = vperm.xlu0 %3124, %v3428_v12  }
 0x9db   :  { %1739 = vmatmul.f32.vlgmr.msrb.gmra.mxu3 %v3560_v37  ;;  %v3430_v37 = vld [vmem:[%s5565_s4 + $0x10] sm:$0xff] }
 0x9dc   :  { %1380 = vmatpush.xpose.msra.mxu1 %v1349_v2  ;;  %1756 = vperm.xlu2 %3120, %v3430_v37  }
 0x9df   :  { %1381 = vmatmul.f32.vlgmr.msra.gmra.mxu1 %v3969_v40  ;;  %v3431_v40 = vld [vmem:[%s5565_s4 + $0x18] sm:$0xff] }
 0x9e0   :  { %1760 = vperm.xlu1 %3119, %v3431_v40  }
 0x9e2   :  { %3128 = vset.pattern.permute.xlu0 %v3440_v0 }
 0x9e3   :  { %2000 = vperm.xlu0 %3128, %v1922_v1   ;;  %v1905_v1 = vld [vmem:[%s5567_s2 + $0xf0] sm:$0xff] }
 0x9e4   :  { %3121 = vset.pattern.permute.xlu2 %v3446_v23 }
 0x9e5   :  { %1864 = vperm.xlu2 %3121, %v3431_v40  }
 0x9e8   :  { %3122 = vset.pattern.permute.xlu1 %v3446_v23 }
 0x9e9   :  { %1860 = vperm.xlu1 %3122, %v3430_v37  }
 0x9ed   :  { %3123 = vset.pattern.permute.xlu2 %v3447_v30 }
 0x9ee   :  { %1884 = vperm.xlu2 %3123, %v3431_v40   ;;  %v1913_v40 = vld [vmem:[%s5569_s5 + $0x30] sm:$0xff] }
 0x9f1   :  { %3125 = vset.pattern.permute.xlu1 %v3447_v30 }
 0x9f2   :  { %1880 = vperm.xlu1 %3125, %v3430_v37  }
 0x9f6   :  { %3126 = vset.pattern.permute.xlu2 %v3446_v23 }
 0x9f7   :  { %1852 = vperm.xlu2 %3126, %v3429_v9  }
 0x9fa   :  { %1876 = vperm.xlu1 %3125, %v3428_v12  }
 0x9ff   :  { %3127 = vset.pattern.permute.xlu2 %v3447_v30 }
 0xa00   :  { %1872 = vperm.xlu2 %3127, %v3429_v9  }
 0xa02   :  { %3129 = vset.pattern.permute.xlu1 %v3440_v0 }
 0xa03   :  { %1995 = vperm.xlu1 %3129, %v1921_v29   ;;  %v1895_v29 = vld [vmem:[%s5567_s2 + $0xa0] sm:$0xff] }
 0xa08   :  { %3130 = vset.pattern.permute.xlu2 %v3440_v0 }
 0xa0b   :  { %1985 = vperm.xlu1 %3129, %v1919_v54   ;;  %v1902_v54 = vld [vmem:[%s5567_s2 + $0xd8] sm:$0xff] }
 0xa13   :  { %1970 = vperm.xlu1 %3129, %v1916_v27  }
 0xa1b   :  { %1955 = vperm.xlu1 %3129, %v1913_v40  }
 0xa36   :  { %v1757_v60 = vpop.permute.xlu2 %1756 }
 0xa3f   :  { %v1865_v12 = vpop.permute.xlu2 %1864 }
 0xa43   :  { %v1753_v33 = vpop.permute.xlu1 %1752  ;;  %v1749_v46 = vpop.permute.xlu0 %1748 }
 0xa52   :  { %v1761_v18 = vpop.permute.xlu1 %1760 }
 0xa5b   :  { %v1861_v23 = vpop.permute.xlu1 %1860 }
 0xa5c   :  { %v1382_v38 = vpop.f32.mrf.mxu1 }
 0xa5e   :  { %v1740_v39 = vpop.f32.mrf.mxu3 }
 0xa5f   :  { %1787 = vmatpush.msrb.mxu1 %v1740_v39  ;;  %v1917_v39 = vld [vmem:[%s5569_s5 + $0x50] sm:$0xff] }
 0xa60   :  { %1975 = vperm.xlu0 %3128, %v1917_v39  }
 0xa61   :  { %1788 = vmatpush.msrb.mxu1 %v1382_v38  ;;  %v1885_v38 = vpop.permute.xlu2 %1884 }
 0xa63   :  { %1789 = vmatpush.msrb.mxu1 %v3972_v35  ;;  %v1746_v35 = vld [vmem:[%s5567_s2 + $0x78] sm:$0xff] }
 0xa65   :  { %1790 = vmatpush.msrb.mxu1 %v3891_v8  ;;  %v1745_v8 = vld [vmem:[%s5567_s2 + $0x70] sm:$0xff] }
 0xa66   :  { %2981 = vmatmul.msk.f32.vlgmr.msrb.gmra.mxu1 %vm137_vm4, %v1743_v47 }
 0xa6e   :  { %2982 = vmatmul.msk.f32.gmra.mxu1 %vm137_vm4, %v1744_v63  ;;  %v1914_v63 = vld [vmem:[%s5569_s5 + $0x38] sm:$0xff] }
 0xa6f   :  { %1960 = vperm.xlu0 %3128, %v1914_v63  }
 0xa76   :  { %2983 = vmatmul.msk.f32.gmra.mxu1 %vm137_vm4, %v1745_v8 }
 0xa7e   :  { %2984 = vmatmul.msk.f32.gmra.mxu1 %vm137_vm4, %v1746_v35 }
 0xae3   :  { %v1792_v61 = vpop.f32.mrf.mxu1 }
 0xae4   :  { %v1793_v7 = vadd.f32 %v1792_v61, %v1749_v46  ;;  %v1853_v46 = vpop.permute.xlu2 %1852 }
 0xae6   :  { %v4446_v0 = vadd.f32 %v3433_v43, %v1793_v7  ;;  %v1857_v43 = vpop.permute.xlu0 %1856 }
 0xae8   :  { %5620 = vst [vmem:[#allocation3_spill] sm:$0xff] %v4446_v0 }
 0xaeb   :  { %v1795_v10 = vpop.f32.mrf.mxu1 }
 0xaec   :  { %v1796_v14 = vadd.f32 %v1795_v10, %v1753_v33  ;;  %v1881_v33 = vpop.permute.xlu1 %1880 }
 0xaee   :  { %v4441_v17 = vadd.f32 %v3432_v16, %v1796_v14 }
 0xaf0   :  { %5619 = vst [vmem:[#allocation2_spill] sm:$0xff] %v4441_v17  ;;  %v1808_v3 = vadd.f32 %v4441_v17, %v4446_v0 }
 0xaf3   :  { %v1798_v6 = vpop.f32.mrf.mxu1 }
 0xaf4   :  { %v1799_v45 = vadd.f32 %v1798_v6, %v1757_v60  ;;  %v1907_v6 = vld [vmem:[%s5569_s5] sm:$0xff] }
 0xaf5   :  { %v1911_v60 = vld [vmem:[%s5569_s5 + $0x20] sm:$0xff] }
 0xaf6   :  { %v4451_v21 = vadd.f32 %v3434_v59, %v1799_v45  ;;  %1945 = vperm.xlu0 %3128, %v1911_v60  }
 0xaf8   :  { %5621 = vst [vmem:[#allocation4_spill] sm:$0xff] %v4451_v21  ;;  %v1809_v32 = vadd.f32 %v1808_v3, %v4451_v21 }
 0xafb   :  { %v1801_v56 = vpop.f32.mrf.mxu1 }
 0xafc   :  { %v1802_v25 = vadd.f32 %v1801_v56, %v1761_v18 }
 0xafe   :  { %v4459_v57 = vadd.f32 %v3435_v31, %v1802_v25  ;;  %v1908_v31 = vld [vmem:[%s5569_s5 + $0x8] sm:$0xff] }
 0xaff   :  { %1930 = vperm.xlu0 %3128, %v1908_v31  }
 0xb00   :  { %5622 = vst [vmem:[#allocation5_spill] sm:$0xff] %v4459_v57  ;;  %v1810_v41 = vadd.f32 %v1809_v32, %v4459_v57  ;;  %v1920_v32 = vld [vmem:[%s5569_s5 + $0x68] sm:$0xff] }
 0xb01   :  { %1990 = vperm.xlu2 %3130, %v1920_v32  }
 0xb02   :  { %v1811_v5 = vrot.slane %v1810_v41, 4 }
 0xb04   :  { %v1812_v52 = vadd.f32 %v1811_v5, %v1810_v41 }
 0xb06   :  { %v1813_v62 = vrot.slane %v1812_v52, 2 }
 0xb08   :  { %v1814_v51 = vadd.f32 %v1813_v62, %v1812_v52  ;;  %v1877_v52 = vpop.permute.xlu1 %1876  ;;  %v1873_v62 = vpop.permute.xlu2 %1872 }
 0xb0a   :  { %v1815_v15 = vrot.slane %v1814_v51, 1 }
 0xb0c   :  { %v1816_v58 = vadd.f32 %v1815_v15, %v1814_v51 }
 0xb0e   :  { %v1817_v28 = vmul.f32 %v1816_v58, %v3511_v24  ;;  %v1891_v58 = vld [vmem:[%s5567_s2 + $0x80] sm:$0xff] }
 0xb10   :  { %v1818_v49 = vsub.f32 %v4446_v0, %v1817_v28  ;;  %v1819_v34 = vsub.f32 %v4441_v17, %v1817_v28  ;;  %v1820_v48 = vsub.f32 %v4451_v21, %v1817_v28  ;;  %v1821_v11 = vsub.f32 %v4459_v57, %v1817_v28  ;;  %v1918_v28 = vld [vmem:[%s5569_s5 + $0x58] sm:$0xff] }
 0xb11   :  { %1980 = vperm.xlu2 %3130, %v1918_v28  }
 0xb12   :  { %v1822_v44 = vmul.f32 %v1818_v49, %v1818_v49  ;;  %v1823_v20 = vmul.f32 %v1819_v34, %v1819_v34  ;;  %v1824_v42 = vmul.f32 %v1820_v48, %v1820_v48  ;;  %v1825_v22 = vmul.f32 %v1821_v11, %v1821_v11 }
 0xb14   :  { %v1826_v53 = vadd.f32 %v1823_v20, %v1822_v44  ;;  %v1894_v44 = vld [vmem:[%s5567_s2 + $0x98] sm:$0xff]  ;;  %v1909_v20 = vld [vmem:[%s5569_s5 + $0x10] sm:$0xff] }
 0xb16   :  { %v1827_v55 = vadd.f32 %v1826_v53, %v1824_v42  ;;  %v1896_v42 = vld [vmem:[%s5567_s2 + $0xa8] sm:$0xff]  ;;  %v1897_v53 = vld [vmem:[%s5567_s2 + $0xb0] sm:$0xff] }
 0xb18   :  { %v1828_v26 = vadd.f32 %v1827_v55, %v1825_v22  ;;  %v1898_v22 = vld [vmem:[%s5567_s2 + $0xb8] sm:$0xff]  ;;  %v1899_v55 = vld [vmem:[%s5567_s2 + $0xc0] sm:$0xff] }
 0xb1a   :  { %v1829_v50 = vrot.slane %v1828_v26, 4 }
 0xb1c   :  { %v1830_v19 = vadd.f32 %v1829_v50, %v1828_v26  ;;  %v1900_v26 = vld [vmem:[%s5567_s2 + $0xc8] sm:$0xff]  ;;  %v1901_v50 = vld [vmem:[%s5567_s2 + $0xd0] sm:$0xff] }
 0xb1e   :  { %v1831_v4 = vrot.slane %v1830_v19, 2 }
 0xb20   :  { %v1832_v36 = vadd.f32 %v1831_v4, %v1830_v19  ;;  %v4564_v19 = vpop.permute.xlu1 %1995  ;;  %v1903_v4 = vld [vmem:[%s5567_s2 + $0xe0] sm:$0xff] }
 0xb22   :  { %v1833_v2 = vrot.slane %v1832_v36, 1 }
 0xb24   :  { %v1834_v13 = vadd.f32 %v1833_v2, %v1832_v36  ;;  %v1904_v36 = vld [vmem:[%s5567_s2 + $0xe8] sm:$0xff]  ;;  %v4579_v2 = vpop.permute.xlu0 %2000 }
 0xb26   :  { %v1835_v9 = vmul.f32 %v1834_v13, %v3511_v24  ;;  %v1910_v24 = vld [vmem:[%s5569_s5 + $0x18] sm:$0xff] }
 0xb27   :  { %1940 = vperm.xlu1 %3129, %v1910_v24  }
 0xb28   :  { %v1836_v37 = vadd.f32 1e-05, %v1835_v9  ;;  %v4573_v27 = vpop.permute.xlu1 %1985 }
 0xb2a   :  { %3394 = vrsqrt.f32 %v1836_v37  ;;  %vm1843_vm12 = vweird.f32 %v1836_v37 }
 0xb2f   :  { %1925 = vperm.xlu1 %3129, %v1907_v6  }
 0xb30   :  { %v3395_v47 = vpop.eup %3394  ;;  %v4582_v13 = vpop.permute.xlu1 %1970 }
 0xb31   :  { %v1838_v30 = vmul.f32 %v3395_v47, %v1836_v37  ;;  %vm1844_vm11 = vweird.f32 %v3395_v47  ;;  %v4590_v37 = vpop.permute.xlu0 %1975 }
 0xb32   :  { %vm1845_vm13 = vmor %vm1843_vm12, %vm1844_vm11 }
 0xb33   :  { %v1839_v8 = vmul.f32 %v3395_v47, %v1838_v30 }
 0xb35   :  { %v1840_v35 = vmul.f32 0.5, %v1839_v8 }
 0xb37   :  { %v1841_v61 = vsub.f32 1.5, %v1840_v35 }
 0xb38   :  { %v4592_v40 = vpop.permute.xlu1 %1955 }
 0xb39   :  { %v1842_v10 = vmul.f32 %v3395_v47, %v1841_v61 }
 0xb3b   :  { %v1846_v14 = vsel %vm1845_vm13, %v3395_v47, %v1842_v10 }
 0xb3c   :  { %v1850_v7 = vmul.f32 %v1846_v14, %v1821_v11  ;;  %v1849_v45 = vmul.f32 %v1846_v14, %v1820_v48  ;;  %v1848_v16 = vmul.f32 %v1846_v14, %v1819_v34  ;;  %v1847_v56 = vmul.f32 %v1846_v14, %v1818_v49  ;;  %v1892_v49 = vld [vmem:[%s5567_s2 + $0x88] sm:$0xff]  ;;  %v1915_v34 = vld [vmem:[%s5569_s5 + $0x40] sm:$0xff]  ;;  %v1893_v48 = vld [vmem:[%s5567_s2 + $0x90] sm:$0xff] }
 0xb3d   :  { %1965 = vperm.xlu2 %3130, %v1915_v34   ;;  %v1912_v11 = vld [vmem:[%s5569_s5 + $0x28] sm:$0xff] }
 0xb3e   :  { %v1870_v59 = vmul.f32 %v1865_v12, %v1850_v7  ;;  %v1869_v18 = vmul.f32 %v1861_v23, %v1849_v45  ;;  %v1868_v25 = vmul.f32 %v1857_v43, %v1848_v16  ;;  %v1867_v5 = vmul.f32 %v1853_v46, %v1847_v56  ;;  %v1906_v12 = vld [vmem:[%s5567_s2 + $0xf8] sm:$0xff] }
 0xb40   :  { %v1890_v3 = vadd.f32 %v1885_v38, %v1870_v59  ;;  %v1889_v41 = vadd.f32 %v1881_v33, %v1869_v18  ;;  %v1888_v51 = vadd.f32 %v1877_v52, %v1868_v25  ;;  %v1887_v15 = vadd.f32 %v1873_v62, %v1867_v5  ;;  %v4596_v38 = vpop.permute.xlu0 %1960 }
 0xb42   :  { %2063 = vmatpush.msra.mxu3 %v1890_v3 }
 0xb44   :  { %2064 = vmatpush.msra.mxu3 %v1889_v41 }
 0xb45   :  { %1950 = vperm.xlu2 %3130, %v1912_v11  }
 0xb46   :  { %2065 = vmatpush.msra.mxu3 %v1888_v51 }
 0xb48   :  { %2066 = vmatpush.msra.mxu3 %v1887_v15 }
 0xb49   :  { %2985 = vmatmul.msk.f32.vlgmr.msra.gmra.mxu3 %vm137_vm4, %v1891_v58 }
 0xb4d   :  { %1935 = vperm.xlu2 %3130, %v1909_v20  }
 0xb51   :  { %2986 = vmatmul.msk.f32.gmra.mxu3 %vm137_vm4, %v1892_v49 }
 0xb59   :  { %2987 = vmatmul.msk.f32.gmra.mxu3 %vm137_vm4, %v1893_v48 }
 0xb5b   :  { %v4588_v9 = vpop.permute.xlu2 %1990 }
 0xb61   :  { %2988 = vmatmul.msk.f32.gmra.mxu3 %vm137_vm4, %v1894_v44 }
 0xb68   :  { %v1946_v63 = vpop.permute.xlu0 %1945 }
 0xb69   :  { %2989 = vmatmul.msk.f32.gmra.mxu3 %vm137_vm4, %v1895_v29 }
 0xb6b   :  { %v4594_v39 = vpop.permute.xlu2 %1980 }
 0xb71   :  { %2990 = vmatmul.msk.f32.gmra.mxu3 %vm137_vm4, %v1896_v42  ;;  %v1931_v46 = vpop.permute.xlu0 %1930 }
 0xb79   :  { %2991 = vmatmul.msk.f32.gmra.mxu3 %vm137_vm4, %v1897_v53 }
 0xb81   :  { %2992 = vmatmul.msk.f32.gmra.mxu3 %vm137_vm4, %v1898_v22 }
 0xb89   :  { %2993 = vmatmul.msk.f32.gmra.mxu3 %vm137_vm4, %v1899_v55 }
 0xb91   :  { %2994 = vmatmul.msk.f32.gmra.mxu3 %vm137_vm4, %v1900_v26 }
 0xb97   :  { %v4598_v24 = vpop.permute.xlu2 %1965 }
 0xb99   :  { %2995 = vmatmul.msk.f32.gmra.mxu3 %vm137_vm4, %v1901_v50  ;;  %v1941_v47 = vpop.permute.xlu1 %1940 }
 0xb9f   :  { %v1951_v33 = vpop.permute.xlu2 %1950 }
 0xba1   :  { %2996 = vmatmul.msk.f32.gmra.mxu3 %vm137_vm4, %v1902_v54  ;;  %v1926_v8 = vpop.permute.xlu1 %1925 }
 0xba7   :  { %v1936_v16 = vpop.permute.xlu2 %1935 }
 0xba9   :  { %2997 = vmatmul.msk.f32.gmra.mxu3 %vm137_vm4, %v1903_v4 }
 0xbb1   :  { %2998 = vmatmul.msk.f32.gmra.mxu3 %vm137_vm4, %v1904_v36 }
 0xbb9   :  { %2999 = vmatmul.msk.f32.gmra.mxu3 %vm137_vm4, %v1905_v1 }
 0xbc1   :  { %3000 = vmatmul.msk.f32.gmra.mxu3 %vm137_vm4, %v1906_v12 }
 0xbcc   :  { %v2068_v23 = vpop.f32.mrf.mxu3 }
 0xbcd   :  { %v4600_v35 = vadd.f32 %v2068_v23, %v1926_v8 }
 0xbcf   :  { %5623 = vst [vmem:[#allocation6_spill] sm:$0xff] %v4600_v35  ;;  %v4603_v10 = vmul.f32 0.70710677, %v4600_v35 }
 0xbd1   :  { %5624 = vst [vmem:[#allocation7_spill] sm:$0xff] %v4603_v10  ;;  %v2148_v6 = vmul.f32 %v4603_v10, %v4603_v10 }
 0xbd3   :  { %v4609_v7 = vmin.f32 %v2148_v6, 16.0 }
 0xbd4   :  { %v2071_v30 = vpop.f32.mrf.mxu3 }
 0xbd5   :  { %v4607_v60 = vadd.f32 %v2071_v30, %v1931_v46  ;;  %v2161_v43 = vmul.f32 3.8918573e-05, %v4609_v7  ;;  %v2150_v11 = vmul.f32 2.1237322e-06, %v4609_v7 }
 0xbd7   :  { %5625 = vst [vmem:[#allocation8_spill] sm:$0xff] %v4607_v60  ;;  %v4612_v45 = vmul.f32 0.70710677, %v4607_v60  ;;  %v2162_v3 = vadd.f32 0.001143296, %v2161_v43 }
 0xbd8   :  { %v2151_v22 = vadd.f32 0.00028619796, %v2150_v11 }
 0xbd9   :  { %5626 = vst [vmem:[#allocation9_spill] sm:$0xff] %v4612_v45  ;;  %v2188_v59 = vmul.f32 %v4612_v45, %v4612_v45  ;;  %v2163_v31 = vmul.f32 %v2162_v3, %v4609_v7 }
 0xbda   :  { %v2152_v12 = vmul.f32 %v2151_v22, %v4609_v7 }
 0xbdb   :  { %v4619_v25 = vmin.f32 %v2188_v59, 16.0  ;;  %v2164_v51 = vadd.f32 0.014752088, %v2163_v31 }
 0xbdc   :  { %v2074_v61 = vpop.f32.mrf.mxu3 }
 0xbdd   :  { %v4617_v56 = vadd.f32 %v2074_v61, %v1936_v16  ;;  %v2201_v5 = vmul.f32 3.8918573e-05, %v4619_v25  ;;  %v2165_v49 = vmul.f32 %v2164_v51, %v4609_v7  ;;  %v2190_v55 = vmul.f32 2.1237322e-06, %v4619_v25 }
 0xbdf   :  { %5627 = vst [vmem:[#allocation10_spill] sm:$0xff] %v4617_v56  ;;  %v4622_v32 = vmul.f32 0.70710677, %v4617_v56  ;;  %v2202_v58 = vadd.f32 0.001143296, %v2201_v5 }
 0xbe0   :  { %v2166_v29 = vadd.f32 0.112945676, %v2165_v49  ;;  %v2191_v23 = vadd.f32 0.00028619796, %v2190_v55 }
 0xbe1   :  { %5628 = vst [vmem:[#allocation11_spill] sm:$0xff] %v4622_v32  ;;  %v2228_v62 = vmul.f32 %v4622_v32, %v4622_v32  ;;  %v2203_v48 = vmul.f32 %v2202_v58, %v4619_v25 }
 0xbe2   :  { %v2167_v50 = vmul.f32 %v2166_v29, %v4609_v7 }
 0xbe3   :  { %v4633_v28 = vmin.f32 %v2228_v62, 16.0  ;;  %v2204_v53 = vadd.f32 0.014752088, %v2203_v48 }
 0xbe4   :  { %v2077_v14 = vpop.f32.mrf.mxu3  ;;  %v2168_v30 = vadd.f32 0.4994258, %v2167_v50 }
 0xbe5   :  { %v4625_v41 = vadd.f32 %v2077_v14, %v1941_v47  ;;  %v2241_v44 = vmul.f32 3.8918573e-05, %v4633_v28  ;;  %v2205_v36 = vmul.f32 %v2204_v53, %v4619_v25  ;;  %v2153_v14 = vadd.f32 0.0036580483, %v2152_v12 }
 0xbe6   :  { %v2230_v43 = vmul.f32 2.1237322e-06, %v4633_v28  ;;  %v2169_v59 = vmul.f32 %v2168_v30, %v4609_v7 }
 0xbe7   :  { %5629 = vst [vmem:[#allocation12_spill] sm:$0xff] %v4625_v41  ;;  %v4631_v15 = vmul.f32 0.70710677, %v4625_v41  ;;  %v2242_v26 = vadd.f32 0.001143296, %v2241_v44 }
 0xbe8   :  { %v2206_v6 = vadd.f32 0.112945676, %v2205_v36  ;;  %v2231_v49 = vadd.f32 0.00028619796, %v2230_v43 }
 0xbe9   :  { %5630 = vst [vmem:[#allocation13_spill] sm:$0xff] %v4631_v15  ;;  %v2268_v34 = vmul.f32 %v4631_v15, %v4631_v15  ;;  %v2243_v47 = vmul.f32 %v2242_v26, %v4633_v28 }
 0xbea   :  { %v2207_v31 = vmul.f32 %v2206_v6, %v4619_v25 }
 0xbeb   :  { %v4641_v42 = vmin.f32 %v2268_v34, 16.0  ;;  %v2244_v16 = vadd.f32 0.014752088, %v2243_v47  ;;  %v4675_v34 = vadd.f32 1.0, %v2169_v59 }
 0xbec   :  { %v2080_v18 = vpop.f32.mrf.mxu3  ;;  %v2208_v29 = vadd.f32 0.4994258, %v2207_v31 }
 0xbed   :  { %v2281_v54 = vmul.f32 3.8918573e-05, %v4641_v42  ;;  %v4646_v4 = vadd.f32 %v2080_v18, %v1946_v63  ;;  %v2245_v51 = vmul.f32 %v2244_v16, %v4633_v28  ;;  %5636 = vst [vmem:[#allocation19_spill] sm:$0xff] %v4675_v34  ;;  %v2270_v48 = vmul.f32 2.1237322e-06, %v4641_v42 }
 0xbee   :  { %3396 = vrcp.f32 %v4675_v34  ;;  %vm2176_vm14 = vweird.f32 %v4675_v34 }
 0xbef   :  { %5631 = vst [vmem:[#allocation14_spill] sm:$0xff] %v4646_v4  ;;  %v2282_v8 = vadd.f32 0.001143296, %v2281_v54  ;;  %v4654_v61 = vmul.f32 0.70710677, %v4646_v4 }
 0xbf0   :  { %v2246_v26 = vadd.f32 0.112945676, %v2245_v51  ;;  %v2271_v54 = vadd.f32 0.00028619796, %v2270_v48 }
 0xbf1   :  { %5633 = vst [vmem:[#allocation16_spill] sm:$0xff] %v4654_v61  ;;  %v2283_v18 = vmul.f32 %v2282_v8, %v4641_v42  ;;  %v2308_v3 = vmul.f32 %v4654_v61, %v4654_v61 }
 0xbf2   :  { %v2247_v6 = vmul.f32 %v2246_v26, %v4633_v28  ;;  %v2272_v16 = vmul.f32 %v2271_v54, %v4641_v42 }
 0xbf3   :  { %v2284_v11 = vadd.f32 0.014752088, %v2283_v18  ;;  %v4678_v44 = vmin.f32 %v2308_v3, 16.0 }
 0xbf4   :  { %v2083_v52 = vpop.f32.mrf.mxu3  ;;  %v4701_v31 = vpop.eup %3396  ;;  %v2273_v48 = vadd.f32 0.0036580483, %v2272_v16 }
 0xbf5   :  { %v4649_v1 = vadd.f32 %v2083_v52, %v1951_v33  ;;  %v2192_v33 = vmul.f32 %v2191_v23, %v4619_v25  ;;  %v2154_v52 = vmul.f32 %v2153_v14, %v4609_v7  ;;  %v2285_v36 = vmul.f32 %v2284_v11, %v4641_v42  ;;  %5639 = vst [vmem:[#allocation22_spill] sm:$0xff] %v4701_v31 }
 0xbf6   :  { %v2321_v12 = vmul.f32 3.8918573e-05, %v4678_v44  ;;  %v2209_v23 = vmul.f32 %v2208_v29, %v4619_v25  ;;  %v2310_v26 = vmul.f32 2.1237322e-06, %v4678_v44  ;;  %vm2177_vm15 = vweird.f32 %v4701_v31 }
 0xbf7   :  { %5632 = vst [vmem:[#allocation15_spill] sm:$0xff] %v4649_v1  ;;  %v4659_v63 = vmul.f32 0.70710677, %v4649_v1  ;;  %v2193_v62 = vadd.f32 0.0036580483, %v2192_v33  ;;  %vm4781_vm0 = vmor %vm2176_vm14, %vm2177_vm15 }
 0xbf8   :  { %v2155_v22 = vadd.f32 0.05243302, %v2154_v52  ;;  %v2286_v43 = vadd.f32 0.112945676, %v2285_v36  ;;  %v2322_v59 = vadd.f32 0.001143296, %v2321_v12 }
 0xbf9   :  { %5634 = vst [vmem:[#allocation17_spill] sm:$0xff] %v4659_v63  ;;  %v2348_v5 = vmul.f32 %v4659_v63, %v4659_v63  ;;  %v2194_v55 = vmul.f32 %v2193_v62, %v4619_v25  ;;  %v4699_v18 = vadd.f32 1.0, %v2209_v23  ;;  %v2248_v62 = vadd.f32 0.4994258, %v2247_v6 }
 0xbfa   :  { %v2156_v30 = vmul.f32 %v2155_v22, %v4609_v7  ;;  %v2287_v11 = vmul.f32 %v2286_v43, %v4641_v42  ;;  %v2323_v29 = vmul.f32 %v2322_v59, %v4678_v44  ;;  %v2311_v16 = vadd.f32 0.00028619796, %v2310_v26 }
 0xbfb   :  { %v4680_v53 = vmin.f32 %v2348_v5, 16.0  ;;  %v2195_v8 = vadd.f32 0.05243302, %v2194_v55  ;;  %5638 = vst [vmem:[#allocation21_spill] sm:$0xff] %v4699_v18  ;;  %v2172_v55 = vmul.f32 %v4701_v31, %v4675_v34  ;;  %3398 = vrcp.f32 %v4699_v18 }
 0xbfc   :  { %v2086_v20 = vpop.f32.mrf.mxu3  ;;  %v2157_v5 = vadd.f32 0.18741608, %v2156_v30  ;;  %v2249_v12 = vmul.f32 %v2248_v62, %v4633_v28  ;;  %v2288_v6 = vadd.f32 0.4994258, %v2287_v11  ;;  %v2312_v26 = vmul.f32 %v2311_v16, %v4678_v44 }
 0xbfd   :  { %v4673_v58 = vadd.f32 %v2086_v20, %v4592_v40  ;;  %v2232_v20 = vmul.f32 %v2231_v49, %v4633_v28  ;;  %v2361_v47 = vmul.f32 3.8918573e-05, %v4680_v53  ;;  %v2196_v52 = vmul.f32 %v2195_v8, %v4619_v25 }
 0xbfe   :  { %v2158_v54 = vmul.f32 %v2157_v5, %v4609_v7  ;;  %v2274_v8 = vmul.f32 %v2273_v48, %v4641_v42  ;;  %v2289_v11 = vmul.f32 %v2288_v6, %v4641_v42 }
 0xbff   :  { %5635 = vst [vmem:[#allocation18_spill] sm:$0xff] %v4673_v58  ;;  %v4684_v50 = vmul.f32 0.70710677, %v4673_v58  ;;  %v2233_v33 = vadd.f32 0.0036580483, %v2232_v20 }
 0xc00   :  { %v2362_v3 = vadd.f32 0.001143296, %v2361_v47  ;;  %v2197_v36 = vadd.f32 0.18741608, %v2196_v52  ;;  %v4722_v59 = vadd.f32 1.1283791, %v2158_v54 }
 0xc01   :  { %5637 = vst [vmem:[#allocation20_spill] sm:$0xff] %v4684_v50  ;;  %v2388_v14 = vmul.f32 %v4684_v50, %v4684_v50  ;;  %v2234_v49 = vmul.f32 %v2233_v33, %v4633_v28  ;;  %v2173_v33 = vsub.f32 1.0, %v2172_v55  ;;  %v4727_v52 = vpop.eup %3398  ;;  %v2275_v48 = vadd.f32 0.05243302, %v2274_v8 }
 0xc02   :  { %v2363_v20 = vmul.f32 %v2362_v3, %v4680_v53  ;;  %5641 = vst [vmem:[#allocation24_spill] sm:$0xff] %v4722_v59  ;;  %v2198_v7 = vmul.f32 %v2197_v36, %v4619_v25  ;;  %v4725_v3 = vadd.f32 1.0, %v2249_v12  ;;  %v2212_v36 = vmul.f32 %v4727_v52, %v4699_v18 }
 0xc03   :  { %v4704_v51 = vmin.f32 %v2388_v14, 16.0  ;;  %v2235_v47 = vadd.f32 0.05243302, %v2234_v49  ;;  %v2324_v14 = vadd.f32 0.014752088, %v2323_v29  ;;  %v2174_v55 = vmul.f32 %v4701_v31, %v2173_v33 }
 0xc04   :  { %v4656_v46 = vpop.f32.mrf.mxu3  ;;  %v2364_v43 = vadd.f32 0.014752088, %v2363_v20  ;;  %5642 = vst [vmem:[#allocation25_spill] sm:$0xff] %v4725_v3  ;;  %v2350_v29 = vmul.f32 2.1237322e-06, %v4680_v53  ;;  %3400 = vrcp.f32 %v4725_v3  ;;  %v2276_v33 = vmul.f32 %v2275_v48, %v4641_v42 }
 0xc05   :  { %v2401_v23 = vmul.f32 3.8918573e-05, %v4704_v51  ;;  %v4719_v30 = vadd.f32 %v4656_v46, %v4596_v38  ;;  %v2182_v46 = vand.u32 2147483648, %v4675_v34  ;;  %v2236_v62 = vmul.f32 %v2235_v47, %v4633_v28 }
 0xc06   :  { %v2325_v25 = vmul.f32 %v2324_v14, %v4678_v44  ;;  %v2365_v20 = vmul.f32 %v2364_v43, %v4680_v53  ;;  %v4743_v54 = vadd.f32 1.1283791, %v2198_v7  ;;  %v4757_v16 = vadd.f32 1.0, %v2289_v11 }
 0xc07   :  { %5640 = vst [vmem:[#allocation23_spill] sm:$0xff] %v4719_v30  ;;  %v2402_v5 = vadd.f32 0.001143296, %v2401_v23  ;;  %v4734_v49 = vmul.f32 0.70710677, %v4719_v30  ;;  %v4760_v38 = vadd.f32 %v4701_v31, %v2174_v55  ;;  %v4765_v47 = vor.u32 1.1754944e-38, %v2182_v46 }
 0xc08   :  { %5644 = vst [vmem:[#allocation27_spill] sm:$0xff] %v4743_v54  ;;  %v2237_v8 = vadd.f32 0.18741608, %v2236_v62  ;;  %v2326_v43 = vadd.f32 0.112945676, %v2325_v25  ;;  %v2213_v21 = vsub.f32 1.0, %v2212_v36  ;;  %3402 = vrcp.f32 %v4757_v16 }
 0xc09   :  { %5643 = vst [vmem:[#allocation26_spill] sm:$0xff] %v4734_v49  ;;  %v2403_v12 = vmul.f32 %v2402_v5, %v4704_v51  ;;  %v2428_v6 = vmul.f32 %v4734_v49, %v4734_v49  ;;  %v2351_v7 = vadd.f32 0.00028619796, %v2350_v29  ;;  %v2313_v5 = vadd.f32 0.0036580483, %v2312_v26 }
 0xc0a   :  { %5646 = vst [vmem:[#allocation29_spill] sm:$0xff] %v4760_v38  ;;  %v2366_v57 = vadd.f32 0.112945676, %v2365_v20  ;;  %v2238_v11 = vmul.f32 %v2237_v8, %v4633_v28  ;;  %v4775_v55 = vpop.eup %3400  ;;  %v2327_v28 = vmul.f32 %v2326_v43, %v4678_v44  ;;  %v2214_v8 = vmul.f32 %v4727_v52, %v2213_v21 }
 0xc0b   :  { %5648 = vst [vmem:[#allocation31_spill] sm:$0xff] %v4765_v47  ;;  %v4770_v25 = vmin.f32 %v2428_v6, 16.0  ;;  %v2352_v46 = vmul.f32 %v2351_v7, %v4680_v53  ;;  %v2314_v20 = vmul.f32 %v2313_v5, %v4678_v44  ;;  %v2262_v6 = vand.u32 2147483648, %v4725_v3 }
 0xc0c   :  { %v4686_v40 = vpop.f32.mrf.mxu3  ;;  %5650 = vst [vmem:[#allocation33_spill] sm:$0xff] %v4775_v55  ;;  %v2367_v36 = vmul.f32 %v2366_v57, %v4680_v53  ;;  %v4800_v7 = vadd.f32 1.1283791, %v2238_v11  ;;  %v2252_v48 = vmul.f32 %v4775_v55, %v4725_v3  ;;  %v2328_v17 = vadd.f32 0.4994258, %v2327_v28 }
 0xc0d   :  { %v4754_v14 = vadd.f32 %v4686_v40, %v4598_v24  ;;  %v2390_v24 = vmul.f32 2.1237322e-06, %v4704_v51  ;;  %v2404_v40 = vadd.f32 0.014752088, %v2403_v12  ;;  %v2441_v26 = vmul.f32 3.8918573e-05, %v4770_v25 }
 0xc0e   :  { %5654 = vst [vmem:[#allocation35_spill] sm:$0xff] %v4800_v7  ;;  %v2353_v0 = vadd.f32 0.0036580483, %v2352_v46  ;;  %v2315_v11 = vadd.f32 0.05243302, %v2314_v20  ;;  %v4814_v56 = vpop.eup %3402  ;;  %v4817_v41 = vadd.f32 %v4727_v52, %v2214_v8  ;;  %v4819_v4 = vor.u32 1.1754944e-38, %v2262_v6 }
 0xc0f   :  { %5645 = vst [vmem:[#allocation28_spill] sm:$0xff] %v4754_v14  ;;  %v4773_v29 = vmul.f32 0.70710677, %v4754_v14  ;;  %v2405_v43 = vmul.f32 %v2404_v40, %v4704_v51  ;;  %v2368_v35 = vadd.f32 0.4994258, %v2367_v36  ;;  %v2329_v36 = vmul.f32 %v2328_v17, %v4678_v44 }
 0xc10   :  { %5656 = vst [vmem:[#allocation37_spill] sm:$0xff] %v4814_v56  ;;  %v2442_v28 = vadd.f32 0.001143296, %v2441_v26  ;;  %v2354_v40 = vmul.f32 %v2353_v0, %v4680_v53  ;;  %vm2257_vm1 = vweird.f32 %v4775_v55  ;;  %v2292_v6 = vmul.f32 %v4814_v56, %v4757_v16 }
 0xc11   :  { %5649 = vst [vmem:[#allocation32_spill] sm:$0xff] %v4773_v29  ;;  %v2468_v57 = vmul.f32 %v4773_v29, %v4773_v29  ;;  %v2369_v26 = vmul.f32 %v2368_v35, %v4680_v53  ;;  %vm2256_vm2 = vweird.f32 %v4725_v3  ;;  %v4848_v35 = vadd.f32 1.0, %v2329_v36 }
 0xc12   :  { %5657 = vst [vmem:[#allocation38_spill] sm:$0xff] %v4817_v41  ;;  %v2443_v58 = vmul.f32 %v2442_v28, %v4770_v25  ;;  %vm4886_vm3 = vmor %vm2256_vm2, %vm2257_vm1  ;;  %vm2297_vm4 = vweird.f32 %v4814_v56  ;;  %vm2296_vm5 = vweird.f32 %v4757_v16 }
 0xc13   :  { %5658 = vst [vmem:[#allocation39_spill] sm:$0xff] %v4819_v4  ;;  %v4823_v46 = vmin.f32 %v2468_v57, 16.0  ;;  %3404 = vrcp.f32 %v4848_v35  ;;  %vm4949_vm6 = vmor %vm2296_vm5, %vm2297_vm4 }
 0xc14   :  { %v2095_v22 = vpop.f32.mrf.mxu3 }
 0xc15   :  { %v4763_v62 = vadd.f32 %v2095_v22, %v4582_v13  ;;  %v5651_v13 = vmov 0  ;;  %v2277_v22 = vadd.f32 0.18741608, %v2276_v33  ;;  %v2391_v33 = vadd.f32 0.00028619796, %v2390_v24 }
 0xc16   :  { %v5652_v13 = vsel %vm4781_vm0, 4294967295, %v5651_v13 }
 0xc17   :  { %5647 = vst [vmem:[#allocation30_spill] sm:$0xff] %v4763_v62  ;;  %v4795_v12 = vmul.f32 0.70710677, %v4763_v62  ;;  %v2278_v5 = vmul.f32 %v2277_v22, %v4641_v42  ;;  %v2392_v42 = vmul.f32 %v2391_v33, %v4704_v51  ;;  %v2406_v22 = vadd.f32 0.112945676, %v2405_v43 }
 0xc18   :  { %5653 = vst [vmem:[#allocation34_spill] sm:$0xff] %v5652_v13  ;;  %v2481_v43 = vmul.f32 3.8918573e-05, %v4823_v46 }
 0xc19   :  { %v2508_v60 = vmul.f32 %v4795_v12, %v4795_v12  ;;  %v4825_v20 = vadd.f32 1.1283791, %v2278_v5  ;;  %v2393_v57 = vadd.f32 0.0036580483, %v2392_v42  ;;  %v2407_v17 = vmul.f32 %v2406_v22, %v4704_v51 }
 0xc1a   :  { %v2293_v22 = vsub.f32 1.0, %v2292_v6  ;;  %v2444_v6 = vadd.f32 0.014752088, %v2443_v58  ;;  %v2482_v54 = vadd.f32 0.001143296, %v2481_v43 }
 0xc1b   :  { %5659 = vst [vmem:[#allocation40_spill] sm:$0xff] %v4825_v20  ;;  %v4837_v33 = vmin.f32 %v2508_v60, 16.0  ;;  %v2355_v60 = vadd.f32 0.05243302, %v2354_v40  ;;  %v2394_v28 = vmul.f32 %v2393_v57, %v4704_v51  ;;  %v2408_v59 = vadd.f32 0.4994258, %v2407_v17 }
 0xc1c   :  { %v2098_v23 = vpop.f32.mrf.mxu3  ;;  %v2294_v57 = vmul.f32 %v4814_v56, %v2293_v22 }
 0xc1d   :  { %v4809_v21 = vadd.f32 %v2098_v23, %v4590_v37  ;;  %v2253_v37 = vsub.f32 1.0, %v2252_v48  ;;  %v2430_v23 = vmul.f32 2.1237322e-06, %v4770_v25  ;;  %v2316_v48 = vmul.f32 %v2315_v11, %v4678_v44 }
 0xc1e   :  { %v2470_v11 = vmul.f32 2.1237322e-06, %v4823_v46  ;;  %v2409_v38 = vmul.f32 %v2408_v59, %v4704_v51  ;;  %v2510_v22 = vmul.f32 2.1237322e-06, %v4837_v33 }
 0xc1f   :  { %5655 = vst [vmem:[#allocation36_spill] sm:$0xff] %v4809_v21  ;;  %v4830_v8 = vmul.f32 0.70710677, %v4809_v21  ;;  %v2254_v5 = vmul.f32 %v4775_v55, %v2253_v37  ;;  %v2431_v1 = vadd.f32 0.00028619796, %v2430_v23  ;;  %v2302_v23 = vand.u32 2147483648, %v4757_v16 }
 0xc20   :  { %v2521_v37 = vmul.f32 3.8918573e-05, %v4837_v33  ;;  %v2511_v14 = vadd.f32 0.00028619796, %v2510_v22 }
 0xc21   :  { %v2548_v42 = vmul.f32 %v4830_v8, %v4830_v8  ;;  %v4862_v10 = vadd.f32 %v4775_v55, %v2254_v5  ;;  %v2432_v30 = vmul.f32 %v2431_v1, %v4770_v25  ;;  %v2395_v5 = vadd.f32 0.05243302, %v2394_v28 }
 0xc22   :  { %v2522_v47 = vadd.f32 0.001143296, %v2521_v37 }
 0xc23   :  { %5661 = vst [vmem:[#allocation42_spill] sm:$0xff] %v4862_v10  ;;  %v4867_v45 = vmin.f32 %v2548_v42, 16.0  ;;  %v2433_v43 = vadd.f32 0.0036580483, %v2432_v30 }
 0xc24   :  { %v2101_v24 = vpop.f32.mrf.mxu3 }
 0xc25   :  { %v4842_v0 = vadd.f32 %v2101_v24, %v4594_v39  ;;  %v2317_v39 = vadd.f32 0.18741608, %v2316_v48  ;;  %v4853_v24 = vadd.f32 1.0, %v2369_v26  ;;  %v2471_v48 = vadd.f32 0.00028619796, %v2470_v11 }
 0xc26   :  { %v2356_v26 = vmul.f32 %v2355_v60, %v4680_v53  ;;  %v4878_v11 = vor.u32 1.1754944e-38, %v2302_v23  ;;  %v2445_v60 = vmul.f32 %v2444_v6, %v4770_v25  ;;  %v2561_v30 = vmul.f32 3.8918573e-05, %v4867_v45 }
 0xc27   :  { %5660 = vst [vmem:[#allocation41_spill] sm:$0xff] %v4842_v0  ;;  %v4859_v36 = vmul.f32 0.70710677, %v4842_v0  ;;  %v2318_v17 = vmul.f32 %v2317_v39, %v4678_v44  ;;  %3406 = vrcp.f32 %v4853_v24  ;;  %v2472_v42 = vmul.f32 %v2471_v48, %v4823_v46 }
 0xc28   :  { %5663 = vst [vmem:[#allocation44_spill] sm:$0xff] %v4878_v11  ;;  %v5664_v44 = vmov 0  ;;  %v2357_v59 = vadd.f32 0.18741608, %v2356_v26  ;;  %v2523_v23 = vmul.f32 %v2522_v47, %v4837_v33  ;;  %v4906_v6 = vadd.f32 %v4814_v56, %v2294_v57 }
 0xc29   :  { %v2588_v1 = vmul.f32 %v4859_v36, %v4859_v36  ;;  %v5665_v44 = vsel %vm4886_vm3, 4294967295, %v5664_v44  ;;  %v4898_v37 = vadd.f32 1.1283791, %v2318_v17  ;;  %v4910_v48 = vadd.f32 1.0, %v2409_v38 }
 0xc2a   :  { %5666 = vst [vmem:[#allocation45_spill] sm:$0xff] %v5665_v44  ;;  %v2446_v39 = vadd.f32 0.112945676, %v2445_v60  ;;  %v2473_v31 = vadd.f32 0.0036580483, %v2472_v42  ;;  %v2358_v57 = vmul.f32 %v2357_v59, %v4680_v53  ;;  %v2382_v60 = vand.u32 2147483648, %v4853_v24 }
 0xc2b   :  { %5667 = vst [vmem:[#allocation46_spill] sm:$0xff] %v4898_v37  ;;  %v4901_v28 = vmin.f32 %v2588_v1, 16.0  ;;  %v2434_v1 = vmul.f32 %v2433_v43, %v4770_v25  ;;  %v2562_v7 = vadd.f32 0.001143296, %v2561_v30  ;;  %v2524_v62 = vadd.f32 0.014752088, %v2523_v23 }
 0xc2c   :  { %v2104_v40 = vpop.f32.mrf.mxu3  ;;  %5668 = vst [vmem:[#allocation47_spill] sm:$0xff] %v4906_v6  ;;  %3408 = vrcp.f32 %v4910_v48  ;;  %v2447_v59 = vmul.f32 %v2446_v39, %v4770_v25  ;;  %v4932_v22 = vadd.f32 1.1283791, %v2358_v57  ;;  %v2512_v23 = vmul.f32 %v2511_v14, %v4837_v33 }
 0xc2d   :  { %v4876_v58 = vadd.f32 %v2104_v40, %v4573_v27  ;;  %v2483_v27 = vmul.f32 %v2482_v54, %v4823_v46  ;;  %v4903_v40 = vpop.eup %3404  ;;  %v2396_v54 = vmul.f32 %v2395_v5, %v4704_v51  ;;  %v2601_v20 = vmul.f32 3.8918573e-05, %v4901_v28 }
 0xc2e   :  { %v4915_v17 = vpop.eup %3406  ;;  %v2332_v38 = vmul.f32 %v4903_v40, %v4848_v35  ;;  %v2435_v42 = vadd.f32 0.05243302, %v2434_v1  ;;  %5670 = vst [vmem:[#allocation49_spill] sm:$0xff] %v4932_v22  ;;  %v2525_v15 = vmul.f32 %v2524_v62, %v4837_v33  ;;  %v5672_v14 = vmov 0 }
 0xc2f   :  { %5662 = vst [vmem:[#allocation43_spill] sm:$0xff] %v4876_v58  ;;  %v4913_v26 = vmul.f32 0.70710677, %v4876_v58  ;;  %v2484_v13 = vadd.f32 0.014752088, %v2483_v27  ;;  %v2372_v47 = vmul.f32 %v4915_v17, %v4853_v24  ;;  %v2474_v27 = vmul.f32 %v2473_v31, %v4823_v46 }
 0xc30   :  { %5669 = vst [vmem:[#allocation48_spill] sm:$0xff] %v4915_v17  ;;  %v2397_v43 = vadd.f32 0.18741608, %v2396_v54  ;;  %v2563_v54 = vmul.f32 %v2562_v7, %v4867_v45  ;;  %v2333_v5 = vsub.f32 1.0, %v2332_v38  ;;  %v2602_v4 = vadd.f32 0.001143296, %v2601_v20 }
 0xc31   :  { %v2628_v53 = vmul.f32 %v4913_v26, %v4913_v26  ;;  %v2485_v30 = vmul.f32 %v2484_v13, %v4823_v46  ;;  %v2373_v1 = vsub.f32 1.0, %v2372_v47  ;;  %v5673_v14 = vsel %vm4949_vm6, 4294967295, %v5672_v14 }
 0xc32   :  { %v2398_v31 = vmul.f32 %v2397_v43, %v4704_v51  ;;  %5674 = vst [vmem:[#allocation51_spill] sm:$0xff] %v5673_v14  ;;  %v4953_v62 = vor.u32 1.1754944e-38, %v2382_v60  ;;  %v2475_v13 = vadd.f32 0.05243302, %v2474_v27  ;;  %v4956_v7 = vpop.eup %3408  ;;  %v2513_v47 = vadd.f32 0.0036580483, %v2512_v23 }
 0xc33   :  { %v4943_v57 = vmin.f32 %v2628_v53, 16.0  ;;  %5676 = vst [vmem:[#allocation53_spill] sm:$0xff] %v4956_v7  ;;  %v2486_v20 = vadd.f32 0.112945676, %v2485_v30  ;;  %v2564_v38 = vadd.f32 0.014752088, %v2563_v54  ;;  %v2334_v43 = vmul.f32 %v4903_v40, %v2333_v5 }
 0xc34   :  { %v2107_v32 = vpop.f32.mrf.mxu3  ;;  %5675 = vst [vmem:[#allocation52_spill] sm:$0xff] %v4953_v62  ;;  %vm2376_vm7 = vweird.f32 %v4853_v24  ;;  %v2526_v53 = vadd.f32 0.112945676, %v2525_v15  ;;  %v2603_v60 = vmul.f32 %v2602_v4, %v4901_v28  ;;  %vm2377_vm8 = vweird.f32 %v4915_v17 }
 0xc35   :  { %v4939_v10 = vadd.f32 %v2107_v32, %v4588_v9  ;;  %v2436_v9 = vmul.f32 %v2435_v42, %v4770_v25  ;;  %v2448_v32 = vadd.f32 0.4994258, %v2447_v59  ;;  %v2374_v59 = vmul.f32 %v4915_v17, %v2373_v1  ;;  %vm5006_vm9 = vmor %vm2376_vm7, %vm2377_vm8 }
 0xc36   :  { %v4970_v27 = vadd.f32 1.1283791, %v2398_v31  ;;  %v2641_v30 = vmul.f32 3.8918573e-05, %v4943_v57  ;;  %v2412_v5 = vmul.f32 %v4956_v7, %v4910_v48  ;;  %v2476_v4 = vmul.f32 %v2475_v13, %v4823_v46 }
 0xc37   :  { %5671 = vst [vmem:[#allocation50_spill] sm:$0xff] %v4939_v10  ;;  %v4966_v42 = vmul.f32 0.70710677, %v4939_v10  ;;  %v2437_v54 = vadd.f32 0.18741608, %v2436_v9  ;;  %v2449_v15 = vmul.f32 %v2448_v32, %v4770_v25  ;;  %v2487_v51 = vmul.f32 %v2486_v20, %v4823_v46 }
 0xc38   :  { %5677 = vst [vmem:[#allocation54_spill] sm:$0xff] %v4970_v27  ;;  %v2514_v39 = vmul.f32 %v2513_v47, %v4837_v33  ;;  %v2565_v1 = vmul.f32 %v2564_v38, %v4867_v45  ;;  %v2642_v55 = vadd.f32 0.001143296, %v2641_v30  ;;  %v2527_v44 = vmul.f32 %v2526_v53, %v4837_v33 }
 0xc39   :  { %v2604_v41 = vadd.f32 0.014752088, %v2603_v60  ;;  %v2668_v21 = vmul.f32 %v4966_v42, %v4966_v42  ;;  %v4985_v9 = vadd.f32 %v4915_v17, %v2374_v59  ;;  %v2422_v32 = vand.u32 2147483648, %v4910_v48 }
 0xc3a   :  { %v2550_v13 = vmul.f32 2.1237322e-06, %v4867_v45  ;;  %v2413_v47 = vsub.f32 1.0, %v2412_v5  ;;  %v4992_v38 = vadd.f32 1.0, %v2449_v15  ;;  %v2477_v30 = vadd.f32 0.18741608, %v2476_v4 }
 0xc3b   :  { %5678 = vst [vmem:[#allocation55_spill] sm:$0xff] %v4985_v9  ;;  %v2643_v53 = vmul.f32 %v2642_v55, %v4943_v57  ;;  %v2438_v60 = vmul.f32 %v2437_v54, %v4770_v25  ;;  %v2488_v31 = vadd.f32 0.4994258, %v2487_v51  ;;  %v2515_v37 = vadd.f32 0.05243302, %v2514_v39 }
 0xc3c   :  { %v2110_v23 = vpop.f32.mrf.mxu3  ;;  %v2566_v61 = vadd.f32 0.112945676, %v2565_v1  ;;  %v2528_v59 = vadd.f32 0.4994258, %v2527_v44  ;;  %v2605_v11 = vmul.f32 %v2604_v41, %v4901_v28  ;;  %v4997_v56 = vmin.f32 %v2668_v21, 16.0 }
 0xc3d   :  { %v4990_v20 = vadd.f32 %v2110_v23, %v4564_v19  ;;  %v2644_v6 = vadd.f32 0.014752088, %v2643_v53  ;;  %v5000_v19 = vadd.f32 %v4903_v40, %v2334_v43  ;;  %v5681_v55 = vmov 0 }
 0xc3e   :  { %v5682_v55 = vsel %vm5006_vm9, 4294967295, %v5681_v55  ;;  %v2551_v25 = vadd.f32 0.00028619796, %v2550_v13  ;;  %v2590_v39 = vmul.f32 2.1237322e-06, %v4901_v28  ;;  %v5018_v21 = vor.u32 1.1754944e-38, %v2422_v32 }
 0xc3f   :  { %5679 = vst [vmem:[#allocation56_spill] sm:$0xff] %v4990_v20  ;;  %v5012_v44 = vmul.f32 0.70710677, %v4990_v20  ;;  %3410 = vrcp.f32 %v4992_v38  ;;  %v2681_v51 = vmul.f32 3.8918573e-05, %v4997_v56  ;;  %v2414_v43 = vmul.f32 %v4956_v7, %v2413_v47 }
 0xc40   :  { %5680 = vst [vmem:[#allocation57_spill] sm:$0xff] %v5000_v19  ;;  %vm2417_vm10 = vweird.f32 %v4956_v7  ;;  %v2489_v23 = vmul.f32 %v2488_v31, %v4823_v46  ;;  %v2567_v5 = vmul.f32 %v2566_v61, %v4867_v45  ;;  %v2645_v54 = vmul.f32 %v2644_v6, %v4943_v57 }
 0xc41   :  { %5683 = vst [vmem:[#allocation58_spill] sm:$0xff] %v5682_v55  ;;  %v5027_v4 = vadd.f32 1.1283791, %v2438_v60  ;;  %v2478_v1 = vmul.f32 %v2477_v30, %v4823_v46  ;;  %v2516_v32 = vmul.f32 %v2515_v37, %v4837_v33  ;;  %v2606_v13 = vadd.f32 0.112945676, %v2605_v11 }
 0xc42   :  { %5684 = vst [vmem:[#allocation59_spill] sm:$0xff] %v5018_v21  ;;  %vm2416_vm11 = vweird.f32 %v4910_v48  ;;  %v2529_v47 = vmul.f32 %v2528_v59, %v4837_v33  ;;  %v2552_v53 = vmul.f32 %v2551_v25, %v4867_v45  ;;  %v2591_v41 = vadd.f32 0.00028619796, %v2590_v39 }
 0xc43   :  { %5685 = vst [vmem:[#allocation60_spill] sm:$0xff] %v5027_v4  ;;  %v2708_v61 = vmul.f32 %v5012_v44, %v5012_v44  ;;  %v2630_v31 = vmul.f32 2.1237322e-06, %v4943_v57  ;;  %v2682_v60 = vadd.f32 0.001143296, %v2681_v51  ;;  %v5042_v37 = vadd.f32 1.0, %v2489_v23  ;;  %vm5076_vm12 = vmor %vm2416_vm11, %vm2417_vm10 }
 0xc44   :  { %v2113_v15 = vpop.f32.mrf.mxu3  ;;  %v2568_v30 = vadd.f32 0.4994258, %v2567_v5  ;;  %v2646_v59 = vadd.f32 0.112945676, %v2645_v54  ;;  %v5046_v25 = vadd.f32 1.1283791, %v2478_v1  ;;  %v2607_v39 = vmul.f32 %v2606_v13, %v4901_v28 }
 0xc45   :  { %v5039_v46 = vadd.f32 %v2113_v15, %v4579_v2  ;;  %v5044_v14 = vpop.eup %3410  ;;  %v2683_v6 = vmul.f32 %v2682_v60, %v4997_v56  ;;  %v5050_v0 = vmin.f32 %v2708_v61, 16.0  ;;  %v2517_v51 = vadd.f32 0.18741608, %v2516_v32 }
 0xc46   :  { %5686 = vst [vmem:[#allocation61_spill] sm:$0xff] %v5046_v25  ;;  %v5052_v22 = vadd.f32 1.0, %v2529_v47  ;;  %v2553_v2 = vadd.f32 0.0036580483, %v2552_v53  ;;  %v2592_v15 = vmul.f32 %v2591_v41, %v4901_v28  ;;  %v5056_v23 = vadd.f32 %v4956_v7, %v2414_v43 }
 0xc47   :  { %v2631_v5 = vadd.f32 0.00028619796, %v2630_v31  ;;  %v2684_v54 = vadd.f32 0.014752088, %v2683_v6  ;;  %v5059_v1 = vmul.f32 0.70710677, %v5039_v46  ;;  %v2452_v13 = vmul.f32 %v5044_v14, %v4992_v38 }
 0xc48   :  { %5687 = vst [vmem:[#allocation62_spill] sm:$0xff] %v5056_v23  ;;  %3412 = vrcp.f32 %v5042_v37  ;;  %v2569_v32 = vmul.f32 %v2568_v30, %v4867_v45  ;;  %v2647_v47 = vmul.f32 %v2646_v59, %v4943_v57  ;;  %v2608_v53 = vadd.f32 0.4994258, %v2607_v39 }
 0xc49   :  { %v2685_v41 = vmul.f32 %v2684_v54, %v4997_v56  ;;  %v2710_v43 = vmul.f32 2.1237322e-06, %v5050_v0  ;;  %v2721_v61 = vmul.f32 3.8918573e-05, %v5050_v0  ;;  %3414 = vrcp.f32 %v5052_v22 }
 0xc4a   :  { %v2554_v6 = vmul.f32 %v2553_v2, %v4867_v45  ;;  %v2593_v31 = vadd.f32 0.0036580483, %v2592_v15  ;;  %v2670_v60 = vmul.f32 2.1237322e-06, %v4997_v56  ;;  %v5688_v30 = vmov 0 }
 0xc4b   :  { %v5689_v30 = vsel %vm5076_vm12, 4294967295, %v5688_v30  ;;  %v2632_v59 = vmul.f32 %v2631_v5, %v4943_v57  ;;  %v2686_v39 = vadd.f32 0.112945676, %v2685_v41  ;;  %v2722_v54 = vadd.f32 0.001143296, %v2721_v61 }
 0xc4c   :  { %5690 = vst [vmem:[#allocation63_spill] sm:$0xff] %v5689_v30  ;;  %v2748_v11 = vmul.f32 %v5059_v1, %v5059_v1  ;;  %v2648_v34 = vadd.f32 0.4994258, %v2647_v47  ;;  %v5089_v58 = vadd.f32 1.0, %v2569_v32  ;;  %v2609_v27 = vmul.f32 %v2608_v53, %v4901_v28 }
 0xc4d   :  { %v2687_v5 = vmul.f32 %v2686_v39, %v4997_v56  ;;  %v2711_v41 = vadd.f32 0.00028619796, %v2710_v43  ;;  %v2453_v50 = vsub.f32 1.0, %v2452_v13  ;;  %v2671_v62 = vadd.f32 0.00028619796, %v2670_v60 }
 0xc4e   :  { %v5093_v61 = vpop.eup %3412  ;;  %v2723_v9 = vmul.f32 %v2722_v54, %v5050_v0  ;;  %v5096_v17 = vmin.f32 %v2748_v11, 16.0  ;;  %v2555_v2 = vadd.f32 0.05243302, %v2554_v6  ;;  %v2594_v15 = vmul.f32 %v2593_v31, %v4901_v28 }
 0xc4f   :  { %v2633_v63 = vadd.f32 0.0036580483, %v2632_v59  ;;  %v2688_v47 = vadd.f32 0.4994258, %v2687_v5  ;;  %v5099_v32 = vpop.eup %3414  ;;  %v2649_v53 = vmul.f32 %v2648_v34, %v4943_v57  ;;  %3416 = vrcp.f32 %v5089_v58 }
 0xc50   :  { %v2724_v55 = vadd.f32 0.014752088, %v2723_v9  ;;  %v2750_v43 = vmul.f32 2.1237322e-06, %v5096_v17  ;;  %v2761_v39 = vmul.f32 3.8918573e-05, %v5096_v17  ;;  %v2712_v6 = vmul.f32 %v2711_v41, %v5050_v0 }
 0xc51   :  { %v5105_v13 = vadd.f32 1.0, %v2609_v27  ;;  %v2689_v11 = vmul.f32 %v2688_v47, %v4997_v56  ;;  %v2672_v31 = vmul.f32 %v2671_v62, %v4997_v56  ;;  %v2492_v34 = vmul.f32 %v5093_v61, %v5042_v37 }
 0xc52   :  { %v2725_v60 = vmul.f32 %v2724_v55, %v5050_v0  ;;  %v2751_v59 = vadd.f32 0.00028619796, %v2750_v43  ;;  %v2762_v54 = vadd.f32 0.001143296, %v2761_v39  ;;  %v2518_v9 = vmul.f32 %v2517_v51, %v4837_v33 }
 0xc53   :  { %v2634_v5 = vmul.f32 %v2633_v63, %v4943_v57  ;;  %v5115_v19 = vadd.f32 1.0, %v2689_v11  ;;  %v2532_v27 = vmul.f32 %v5099_v32, %v5052_v22  ;;  %v5119_v47 = vadd.f32 1.0, %v2649_v53 }
 0xc54   :  { %v2726_v41 = vadd.f32 0.112945676, %v2725_v60  ;;  %v2763_v62 = vmul.f32 %v2762_v54, %v5096_v17  ;;  %v2454_v55 = vmul.f32 %v5044_v14, %v2453_v50  ;;  %v2556_v43 = vmul.f32 %v2555_v2, %v4867_v45 }
 0xc55   :  { %v2595_v39 = vadd.f32 0.05243302, %v2594_v15  ;;  %v2713_v10 = vadd.f32 0.0036580483, %v2712_v6  ;;  %3418 = vrcp.f32 %v5105_v13  ;;  %v2673_v33 = vadd.f32 0.0036580483, %v2672_v31  ;;  %v5127_v11 = vpop.eup %3416 }
 0xc56   :  { %v2727_v63 = vmul.f32 %v2726_v41, %v5050_v0  ;;  %v2752_v51 = vmul.f32 %v2751_v59, %v5096_v17  ;;  %v5129_v53 = vadd.f32 1.1283791, %v2518_v9  ;;  %v2635_v60 = vadd.f32 0.05243302, %v2634_v5 }
 0xc57   :  { %3420 = vrcp.f32 %v5115_v19  ;;  %v2764_v54 = vadd.f32 0.014752088, %v2763_v62  ;;  %v2493_v50 = vsub.f32 1.0, %v2492_v34  ;;  %v2533_v4 = vsub.f32 1.0, %v2532_v27 }
 0xc58   :  { %3422 = vrcp.f32 %v5119_v47  ;;  %v2728_v2 = vadd.f32 0.4994258, %v2727_v63  ;;  %v2542_v15 = vand.u32 2147483648, %v5052_v22  ;;  %v2596_v6 = vmul.f32 %v2595_v39, %v4901_v28 }
 0xc59   :  { %v2714_v31 = vmul.f32 %v2713_v10, %v5050_v0  ;;  %v2765_v59 = vmul.f32 %v2764_v54, %v5096_v17  ;;  %v2557_v41 = vadd.f32 0.18741608, %v2556_v43  ;;  %v2674_v9 = vmul.f32 %v2673_v33, %v4997_v56 }
 0xc5a   :  { %v2729_v5 = vmul.f32 %v2728_v2, %v5050_v0  ;;  %v2753_v49 = vadd.f32 0.0036580483, %v2752_v51  ;;  %v5140_v34 = vadd.f32 %v5044_v14, %v2454_v55  ;;  %v2572_v27 = vmul.f32 %v5127_v11, %v5089_v58 }
 0xc5b   :  { %v2636_v62 = vmul.f32 %v2635_v60, %v4943_v57  ;;  %v2766_v63 = vadd.f32 0.112945676, %v2765_v59  ;;  %v5145_v39 = vpop.eup %3418  ;;  %v2494_v10 = vmul.f32 %v5093_v61, %v2493_v50  ;;  %v2534_v43 = vmul.f32 %v5099_v32, %v2533_v4 }
 0xc5c   :  { %vm2536_vm13 = vweird.f32 %v5052_v22  ;;  %v2597_v55 = vadd.f32 0.18741608, %v2596_v6  ;;  %v2715_v54 = vadd.f32 0.05243302, %v2714_v31  ;;  %v5153_v2 = vadd.f32 1.0, %v2729_v5 }
 0xc5d   :  { %v5151_v51 = vpop.eup %3420  ;;  %v2767_v21 = vmul.f32 %v2766_v63, %v5096_v17  ;;  %v5158_v59 = vor.u32 1.1754944e-38, %v2542_v15  ;;  %v2558_v50 = vmul.f32 %v2557_v41, %v4867_v45  ;;  %v2675_v23 = vadd.f32 0.05243302, %v2674_v9 }
 0xc5e   :  { %v5156_v60 = vpop.eup %3422  ;;  %v2754_v4 = vmul.f32 %v2753_v49, %v5096_v17  ;;  %vm2537_vm14 = vweird.f32 %v5099_v32  ;;  %v2573_v33 = vsub.f32 1.0, %v2572_v27  ;;  %v2637_v7 = vadd.f32 0.18741608, %v2636_v62 }
 0xc5f   :  { %3424 = vrcp.f32 %v5153_v2  ;;  %v5165_v6 = vadd.f32 %v5099_v32, %v2534_v43  ;;  %v2612_v31 = vmul.f32 %v5145_v39, %v5105_v13  ;;  %v2692_v15 = vmul.f32 %v5151_v51, %v5115_v19  ;;  %vm5186_vm15 = vmor %vm2536_vm13, %vm2537_vm14 }
 0xc60   :  { %v2768_v5 = vadd.f32 0.4994258, %v2767_v21  ;;  %v5172_v45 = vadd.f32 %v5093_v61, %v2494_v10  ;;  %v2598_v49 = vmul.f32 %v2597_v55, %v4901_v28  ;;  %v2652_v41 = vmul.f32 %v5156_v60, %v5119_v47 }
 0xc61   :  { %v2716_v9 = vmul.f32 %v2715_v54, %v5050_v0  ;;  %v5178_v27 = vadd.f32 1.1283791, %v2558_v50  ;;  %v2676_v62 = vmul.f32 %v2675_v23, %v4997_v56  ;;  %v2755_v63 = vadd.f32 0.05243302, %v2754_v4 }
 0xc62   :  { %v2769_v43 = vmul.f32 %v2768_v5, %v5096_v17  ;;  %v2574_v28 = vmul.f32 %v5127_v11, %v2573_v33  ;;  %v2622_v55 = vand.u32 2147483648, %v5105_v13  ;;  %v2638_v54 = vmul.f32 %v2637_v7, %v4943_v57 }
 0xc63   :  { %v2613_v50 = vsub.f32 1.0, %v2612_v31  ;;  %v2693_v4 = vsub.f32 1.0, %v2692_v15  ;;  %v5203_v33 = vadd.f32 1.1283791, %v2598_v49  ;;  %v2653_v10 = vsub.f32 1.0, %v2652_v41 }
 0xc64   :  { %v5198_v5 = vadd.f32 1.0, %v2769_v43  ;;  %v2717_v3 = vadd.f32 0.18741608, %v2716_v9  ;;  %v2620_v25 = vand.u32 2147483647, %v5105_v13  ;;  %v2756_v23 = vmul.f32 %v2755_v63, %v5096_v17 }
 0xc65   :  { %v5200_v30 = vpop.eup %3424  ;;  %v2677_v57 = vadd.f32 0.18741608, %v2676_v62  ;;  %v5210_v31 = vadd.f32 %v5127_v11, %v2574_v28  ;;  %v5212_v15 = vor.u32 1.1754944e-38, %v2622_v55  ;;  %v5214_v43 = vadd.f32 1.1283791, %v2638_v54 }
 0xc66   :  { %v2732_v7 = vmul.f32 %v5200_v30, %v5153_v2  ;;  %3426 = vrcp.f32 %v5198_v5  ;;  %v2614_v49 = vmul.f32 %v5145_v39, %v2613_v50  ;;  %v2694_v41 = vmul.f32 %v5151_v51, %v2693_v4 }
 0xc67   :  { %v2654_v62 = vmul.f32 %v5156_v60, %v2653_v10  ;;  %vm2656_vm5 = vweird.f32 %v5119_v47  ;;  %v2660_v63 = vand.u32 2147483647, %v5119_v47  ;;  %v2718_v28 = vmul.f32 %v2717_v3, %v5050_v0 }
 0xc68   :  { %v2733_v9 = vsub.f32 1.0, %v2732_v7  ;;  %v2678_v55 = vmul.f32 %v2677_v57, %v4997_v56  ;;  %vm2737_vm7 = vweird.f32 %v5200_v30  ;;  %v2757_v50 = vadd.f32 0.18741608, %v2756_v23 }
 0xc69   :  { %vm2697_vm10 = vweird.f32 %v5151_v51  ;;  %v2700_v4 = vand.u32 2147483647, %v5115_v19  ;;  %v2702_v10 = vand.u32 2147483648, %v5115_v19  ;;  %v2742_v7 = vand.u32 2147483648, %v5153_v2 }
 0xc6a   :  { %v2734_v54 = vmul.f32 %v5200_v30, %v2733_v9  ;;  %v2695_v20 = vadd.f32 %v5151_v51, %v2694_v41  ;;  %vm2736_vm11 = vweird.f32 %v5153_v2  ;;  %v2740_v56 = vand.u32 2147483647, %v5153_v2 }
 0xc6b   :  { %v2655_v23 = vadd.f32 %v5156_v60, %v2654_v62  ;;  %vm2657_vm14 = vweird.f32 %v5156_v60  ;;  %v2662_v57 = vand.u32 2147483648, %v5119_v47  ;;  %v2719_v9 = vadd.f32 1.1283791, %v2718_v28  ;;  %vm5244_vm8 = vmor %vm2736_vm11, %vm2737_vm7 }
 0xc6c   :  { %v2735_v3 = vadd.f32 %v5200_v30, %v2734_v54  ;;  %v3427_v0 = vpop.eup %3426  ;;  %vm5248_vm2 = vcmp.eq.f32.partialorder %v2620_v25, 8.507059e+37  ;;  %vm2696_vm4 = vweird.f32 %v5115_v19  ;;  %v2758_v62 = vmul.f32 %v2757_v50, %v5096_v17 }
 0xc6d   :  { %v2772_v28 = vmul.f32 %v3427_v0, %v5198_v5  ;;  %vm2496_vm7 = vweird.f32 %v5042_v37  ;;  %v2615_v29 = vadd.f32 %v5145_v39, %v2614_v49  ;;  %v2679_v25 = vadd.f32 1.1283791, %v2678_v55  ;;  %vm5263_vm11 = vmor %vm2696_vm4, %vm2697_vm10 }
 0xc6e   :  { %v2739_v2 = vsel %vm5244_vm8, %v5200_v30, %v2735_v3  ;;  %vm5267_vm1 = vcmp.eq.f32.partialorder %v2700_v4, 8.507059e+37  ;;  %v2743_v17 = vor.u32 1.1754944e-38, %v2742_v7  ;;  %vm5275_vm8 = vmor %vm2656_vm5, %vm2657_vm14  ;;  %v2699_v49 = vsel %vm5263_vm11, %v5151_v51, %v2695_v20 }
 0xc6f   :  { %v2703_v55 = vor.u32 1.1754944e-38, %v2702_v10  ;;  %vm2741_vm4 = vcmp.eq.f32.partialorder %v2740_v56, 8.507059e+37  ;;  %v2773_v50 = vsub.f32 1.0, %v2772_v28  ;;  %v2659_v4 = vsel %vm5275_vm8, %v5156_v60, %v2655_v23 }
 0xc70   :  { %v2720_v7 = vmul.f32 %v2719_v9, %v5012_v44  ;;  %v2744_v47 = vsel %vm2741_vm4, %v2743_v17, %v2739_v2  ;;  %v2782_v3 = vand.u32 2147483648, %v5198_v5  ;;  %vm5703_vm5 = vweird.f32 %v5145_v39  ;;  %v5746_v9 = vld [vmem:[#allocation56_spill] sm:$0xff] }
 0xc71   :  { %vm5704_vm14 = vweird.f32 %v5105_v13  ;;  %v2759_v20 = vadd.f32 1.1283791, %v2758_v62  ;;  %v2774_v51 = vmul.f32 %v3427_v0, %v2773_v50  ;;  %vm2777_vm11 = vweird.f32 %v3427_v0 }
 0xc72   :  { %vm5292_vm13 = vmor %vm5704_vm14, %vm5703_vm5  ;;  %v2780_v10 = vand.u32 2147483647, %v5198_v5  ;;  %vm2661_vm8 = vcmp.eq.f32.partialorder %v2660_v63, 8.507059e+37  ;;  %v2663_v60 = vor.u32 1.1754944e-38, %v2662_v57  ;;  %v2704_v56 = vsel %vm5267_vm1, %v2703_v55, %v2699_v49 }
 0xc73   :  { %v2619_v44 = vsel %vm5292_vm13, %v5145_v39, %v2615_v29  ;;  %v5707_v13 = vand.u32 2147483647, %v5042_v37  ;;  %vm5710_vm5 = vweird.f32 %v5127_v11  ;;  %vm5711_vm14 = vweird.f32 %v5089_v58 }
 0xc74   :  { %vm5312_vm10 = vmor %vm5711_vm14, %vm5710_vm5  ;;  %v2680_v29 = vmul.f32 %v2679_v25, %v4966_v42  ;;  %v2745_v39 = vmul.f32 %v2744_v47, %v2720_v7  ;;  %v2775_v63 = vadd.f32 %v3427_v0, %v2774_v51  ;;  %vm2776_vm1 = vweird.f32 %v5198_v5 }
 0xc75   :  { %vm5304_vm4 = vcmp.eq.f32.partialorder %v5707_v13, 8.507059e+37  ;;  %v2579_v57 = vsel %vm5312_vm10, %v5127_v11, %v5210_v31  ;;  %v2640_v41 = vmul.f32 %v5214_v43, %v4913_v26  ;;  %v2664_v2 = vsel %vm2661_vm8, %v2663_v60, %v2659_v4  ;;  %vm2778_vm5 = vmor %vm2776_vm1, %vm2777_vm11  ;;  %v5741_v60 = vld [vmem:[#allocation61_spill] sm:$0xff] }
 0xc76   :  { %v2783_v62 = vor.u32 1.1754944e-38, %v2782_v3  ;;  %v5714_v42 = vand.u32 2147483647, %v4910_v48  ;;  %v5717_v5 = vand.u32 2147483647, %v4992_v38  ;;  %v2705_v11 = vmul.f32 %v2704_v56, %v2680_v29 }
 0xc77   :  { %v2760_v31 = vmul.f32 %v2759_v20, %v5059_v1  ;;  %v2779_v26 = vsel %vm2778_vm5, %v3427_v0, %v2775_v63  ;;  %vm2781_vm10 = vcmp.eq.f32.partialorder %v2780_v10, 8.507059e+37  ;;  %v5720_v43 = vand.u32 2147483647, %v5089_v58  ;;  %v5759_v1 = vld [vmem:[#allocation57_spill] sm:$0xff] }
 0xc78   :  { %vm5328_vm14 = vcmp.eq.f32.partialorder %v5714_v42, 8.507059e+37  ;;  %vm5334_vm13 = vcmp.eq.f32.partialorder %v5717_v5, 8.507059e+37  ;;  %v5721_v48 = vand.u32 2147483648, %v5089_v58  ;;  %v2624_v17 = vsel %vm5248_vm2, %v5212_v15, %v2619_v44  ;;  %v5738_v44 = vld [vmem:[#allocation21_spill] sm:$0xff]  ;;  %v5751_v42 = vld [vmem:[#allocation59_spill] sm:$0xff]  ;;  %v5752_v5 = vld [vmem:[#allocation26_spill] sm:$0xff] }
 0xc79   :  { %vm2581_vm8 = vcmp.eq.f32.partialorder %v5720_v43, 8.507059e+37  ;;  %v2784_v30 = vsel %vm2781_vm10, %v2783_v62, %v2779_v26  ;;  %v5722_v49 = vand.u32 2147483647, %v4853_v24  ;;  %vm5725_vm5 = vweird.f32 %v5093_v61  ;;  %v5754_v43 = vld [vmem:[#allocation50_spill] sm:$0xff] }
 0xc7a   :  { %v2583_v19 = vor.u32 1.1754944e-38, %v5721_v48  ;;  %vm5357_vm11 = vmor %vm2496_vm7, %vm5725_vm5  ;;  %v2600_v58 = vmul.f32 %v5203_v33, %v4859_v36  ;;  %v2665_v0 = vmul.f32 %v2664_v2, %v2640_v41  ;;  %v2785_v15 = vmul.f32 %v2784_v30, %v2760_v31  ;;  %v5748_v41 = vld [vmem:[#allocation53_spill] sm:$0xff]  ;;  %v5749_v2 = vld [vmem:[#allocation62_spill] sm:$0xff] }
 0xc7b   :  { %vm5349_vm1 = vcmp.eq.f32.partialorder %v5722_v49, 8.507059e+37  ;;  %v3015_v54 = vclamps-f32 %v2745_v39, 1.0  ;;  %v2499_v24 = vsel %vm5357_vm11, %v5093_v61, %v5172_v45  ;;  %v5728_v50 = vand.u32 2147483647, %v5052_v22 }
 0xc7c   :  { %v2560_v4 = vmul.f32 %v5178_v27, %v4830_v8  ;;  %v2584_v7 = vsel %vm2581_vm8, %v2583_v19, %v2579_v57  ;;  %vm5729_vm7 = vweird.f32 %v5044_v14  ;;  %vm5730_vm10 = vweird.f32 %v4992_v38 }
 0xc7d   :  { %vm2541_vm2 = vcmp.eq.f32.partialorder %v5728_v50, 8.507059e+37  ;;  %vm5375_vm5 = vmor %vm5730_vm10, %vm5729_vm7  ;;  %v5733_v61 = vsel %vm5186_vm15, %v5099_v32, %v5165_v6  ;;  %v2625_v45 = vmul.f32 %v2624_v17, %v2600_v58  ;;  %v3016_v33 = vclamps-f32 %v2785_v15, 1.0  ;;  %v5762_v15 = vld [vmem:[#allocation55_spill] sm:$0xff] }
 0xc7e   :  { %v2544_v22 = vsel %vm2541_vm2, %v5158_v59, %v5733_v61  ;;  %v3014_v47 = vclamps-f32 %v2705_v11, 1.0  ;;  %vm2217_vm11 = vweird.f32 %v4727_v52  ;;  %v2459_v8 = vsel %vm5375_vm5, %v5044_v14, %v5140_v34  ;;  %v5740_v34 = vld [vmem:[#allocation32_spill] sm:$0xff]  ;;  %v5767_v61 = vld [vmem:[#allocation43_spill] sm:$0xff] }
 0xc7f   :  { %v5734_v27 = vand.u32 2147483648, %v5042_v37  ;;  %v2520_v21 = vmul.f32 %v5129_v53, %v4795_v12  ;;  %v2131_v32 = vmul.f32 0.5, %v5039_v46  ;;  %v5735_v59 = vand.u32 2147483647, %v4757_v16  ;;  %v5742_v53 = vld [vmem:[#allocation25_spill] sm:$0xff]  ;;  %v5753_v11 = vld [vmem:[#allocation60_spill] sm:$0xff] }
 0xc80   :  { %v2585_v18 = vmul.f32 %v2584_v7, %v2560_v4  ;;  %v2803_v20 = vadd.f32 1.0, %v3016_v33  ;;  %v2802_v51 = vadd.f32 1.0, %v3015_v54  ;;  %v3013_v10 = vclamps-f32 %v2665_v0, 1.0  ;;  %v5761_v0 = vld [vmem:[#allocation48_spill] sm:$0xff]  ;;  %v5766_v7 = vld [vmem:[#allocation54_spill] sm:$0xff] }
 0xc81   :  { %v2503_v3 = vor.u32 1.1754944e-38, %v5734_v27  ;;  %vm5397_vm15 = vcmp.eq.f32.partialorder %v5735_v59, 8.507059e+37  ;;  %vm2216_vm8 = vweird.f32 %v5738_v44  ;;  %v5739_v14 = vand.u32 2147483648, %v4992_v38  ;;  %v5765_v4 = vld [vmem:[#allocation20_spill] sm:$0xff]  ;;  %v5774_v59 = vld [vmem:[#allocation17_spill] sm:$0xff] }
 0xc82   :  { %v2480_v12 = vmul.f32 %v5741_v60, %v5740_v34  ;;  %v2545_v16 = vmul.f32 %v2544_v22, %v2520_v21  ;;  %v5743_v56 = vand.u32 2147483647, %v5742_v53  ;;  %v2130_v29 = vmul.f32 0.5, %v5746_v9  ;;  %v5782_v9 = vld [vmem:[#allocation16_spill] sm:$0xff] }
 0xc83   :  { %v2463_v37 = vor.u32 1.1754944e-38, %v5739_v14  ;;  %v2504_v46 = vsel %vm5304_vm4, %v2503_v3, %v2499_v24  ;;  %v2819_v39 = vmul.f32 %v2803_v20, %v2131_v32  ;;  %v2801_v63 = vadd.f32 1.0, %v3014_v47  ;;  %v5764_v24 = vld [vmem:[#allocation52_spill] sm:$0xff] }
 0xc84   :  { %vm5410_vm2 = vcmp.eq.f32.partialorder %v5743_v56, 8.507059e+37  ;;  %v3012_v57 = vclamps-f32 %v2625_v45, 1.0  ;;  %v5750_v62 = vsel %vm5076_vm12, %v5748_v41, %v5749_v2  ;;  %v2440_v31 = vmul.f32 %v5753_v11, %v5752_v5  ;;  %v5768_v45 = vld [vmem:[#allocation19_spill] sm:$0xff]  ;;  %v5781_v56 = vld [vmem:[#allocation44_spill] sm:$0xff] }
 0xc85   :  { %v2424_v23 = vsel %vm5328_vm14, %v5751_v42, %v5750_v62  ;;  %v2464_v26 = vsel %vm5334_vm13, %v2463_v37, %v2459_v8  ;;  %v2129_v48 = vmul.f32 0.5, %v5754_v43  ;;  %vm5755_vm4 = vweird.f32 %v4903_v40  ;;  %2840 = vmatpush.msra.mxu1 %v2819_v39  ;;  %vm5478_vm13 = vmor %vm2216_vm8, %vm2217_vm11  ;;  %v5786_v41 = vld [vmem:[#allocation36_spill] sm:$0xff] }
 0xc86   :  { %vm5756_vm7 = vweird.f32 %v4848_v35  ;;  %v2505_v17 = vmul.f32 %v2504_v46, %v2480_v12  ;;  %v2818_v28 = vmul.f32 %v2802_v51, %v2130_v29  ;;  %v2800_v30 = vadd.f32 1.0, %v3013_v10  ;;  %v5776_v10 = vld [vmem:[#allocation41_spill] sm:$0xff]  ;;  %v5783_v29 = vld [vmem:[#allocation46_spill] sm:$0xff]  ;;  %v5810_v12 = vld [vmem:[#allocation24_spill] sm:$0xff] }
 0xc87   :  { %vm5432_vm10 = vmor %vm5756_vm7, %vm5755_vm4  ;;  %v3011_v49 = vclamps-f32 %v2585_v18, 1.0  ;;  %v5763_v54 = vsel %vm5006_vm9, %v5761_v0, %v5762_v15  ;;  %v2400_v36 = vmul.f32 %v5766_v7, %v5765_v4  ;;  %v2128_v22 = vmul.f32 0.5, %v5767_v61  ;;  %v5775_v18 = vld [vmem:[#allocation49_spill] sm:$0xff]  ;;  %v5799_v4 = vld [vmem:[#allocation35_spill] sm:$0xff] }
 0xc88   :  { %v2339_v25 = vsel %vm5432_vm10, %v4903_v40, %v5759_v1  ;;  %v2384_v50 = vsel %vm5349_vm1, %v5764_v24, %v5763_v54  ;;  %v5769_v33 = vand.u32 2147483647, %v5768_v45  ;;  %v2465_v40 = vmul.f32 %v2464_v26, %v2440_v31  ;;  %2841 = vmatpush.msra.mxu1 %v2818_v28  ;;  %v5778_v46 = vld [vmem:[#allocation37_spill] sm:$0xff]  ;;  %v5790_v26 = vld [vmem:[#allocation42_spill] sm:$0xff]  ;;  %v5794_v28 = vld [vmem:[#allocation40_spill] sm:$0xff] }
 0xc89   :  { %v2817_v8 = vmul.f32 %v2801_v63, %v2129_v48  ;;  %v2799_v27 = vadd.f32 1.0, %v3012_v57  ;;  %v3010_v3 = vclamps-f32 %v2545_v16, 1.0  ;;  %v5772_v21 = vand.u32 2147483647, %v4848_v35  ;;  %v5779_v16 = vld [vmem:[#allocation47_spill] sm:$0xff]  ;;  %v5789_v31 = vld [vmem:[#allocation33_spill] sm:$0xff] }
 0xc8a   :  { %vm5453_vm12 = vcmp.eq.f32.partialorder %v5769_v33, 8.507059e+37  ;;  %v5773_v55 = vand.u32 2147483648, %v4848_v35  ;;  %v2360_v20 = vmul.f32 %v5775_v18, %v5774_v59  ;;  %v2425_v51 = vmul.f32 %v2424_v23, %v2400_v36  ;;  %v5787_v23 = vld [vmem:[#allocation38_spill] sm:$0xff]  ;;  %v5792_v48 = vld [vmem:[#allocation39_spill] sm:$0xff]  ;;  %v5800_v36 = vld [vmem:[#allocation28_spill] sm:$0xff] }
 0xc8b   :  { %vm2341_vm9 = vcmp.eq.f32.partialorder %v5772_v21, 8.507059e+37  ;;  %v2127_v14 = vmul.f32 0.5, %v5776_v10  ;;  %2842 = vmatpush.msra.mxu1 %v2817_v8  ;;  %v2816_v37 = vmul.f32 %v2800_v30, %v2128_v22  ;;  %v2798_v34 = vadd.f32 1.0, %v3011_v49  ;;  %v5795_v49 = vld [vmem:[#allocation30_spill] sm:$0xff]  ;;  %v5805_v21 = vld [vmem:[#allocation31_spill] sm:$0xff] }
 0xc8c   :  { %v2343_v32 = vor.u32 1.1754944e-38, %v5773_v55  ;;  %v3009_v60 = vclamps-f32 %v2505_v17, 1.0  ;;  %v5780_v53 = vsel %vm4949_vm6, %v5778_v46, %v5779_v16  ;;  %v2320_v39 = vmul.f32 %v5783_v29, %v5782_v9  ;;  %v5793_v17 = vld [vmem:[#allocation13_spill] sm:$0xff]  ;;  %v5802_v8 = vld [vmem:[#allocation22_spill] sm:$0xff] }
 0xc8d   :  { %v2304_v35 = vsel %vm5397_vm15, %v5781_v56, %v5780_v53  ;;  %v2385_v57 = vmul.f32 %v2384_v50, %v2360_v20  ;;  %v2126_v2 = vmul.f32 0.5, %v5786_v41  ;;  %2843 = vmatpush.msra.mxu1 %v2816_v37  ;;  %v2815_v62 = vmul.f32 %v2799_v27, %v2127_v14  ;;  %v5798_v50 = vld [vmem:[#allocation11_spill] sm:$0xff]  ;;  %v5803_v27 = vld [vmem:[#allocation29_spill] sm:$0xff]  ;;  %v5811_v16 = vld [vmem:[#allocation18_spill] sm:$0xff] }
 0xc8e   :  { %v2344_v63 = vsel %vm2341_vm9, %v2343_v32, %v2339_v25  ;;  %v2797_v42 = vadd.f32 1.0, %v3010_v3  ;;  %v3008_v6 = vclamps-f32 %v2465_v40, 1.0  ;;  %v2219_v5 = vsel %vm5478_vm13, %v4727_v52, %v5787_v23  ;;  %v5806_v55 = vld [vmem:[#allocation9_spill] sm:$0xff]  ;;  %v5807_v32 = vld [vmem:[#allocation27_spill] sm:$0xff] }
 0xc8f   :  { %v5791_v43 = vsel %vm4886_vm3, %v5789_v31, %v5790_v26  ;;  %v2280_v30 = vmul.f32 %v5794_v28, %v5793_v17  ;;  %v2125_v1 = vmul.f32 0.5, %v5795_v49  ;;  %v2345_v25 = vmul.f32 %v2344_v63, %v2320_v39  ;;  %2844 = vmatpush.msra.mxu1 %v2815_v62  ;;  %v5812_v39 = vld [vmem:[#allocation15_spill] sm:$0xff]  ;;  %v3437_v31 = vld [vmem:[%s5565_s4 + $0x10] sm:$0xff]  ;;  %v3438_v28 = vld [vmem:[%s5565_s4] sm:$0xff] }
 0xc90   :  { %v2264_v19 = vsel %vm5410_vm2, %v5792_v48, %v5791_v43  ;;  %v2814_v58 = vmul.f32 %v2798_v34, %v2126_v2  ;;  %v2796_v0 = vadd.f32 1.0, %v3009_v60  ;;  %v3007_v15 = vclamps-f32 %v2425_v51, 1.0  ;;  %v5808_v51 = vld [vmem:[#allocation23_spill] sm:$0xff]  ;;  %v5814_v26 = vld [vmem:[#allocation12_spill] sm:$0xff] }
 0xc91   :  { %v5796_v52 = vand.u32 2147483647, %v5738_v44  ;;  %v5797_v54 = vand.u32 2147483648, %v5738_v44  ;;  %v2240_v13 = vmul.f32 %v5799_v4, %v5798_v50  ;;  %v2305_v7 = vmul.f32 %v2304_v35, %v2280_v30  ;;  %v5809_v60 = vld [vmem:[#allocation7_spill] sm:$0xff]  ;;  %v5815_v30 = vld [vmem:[#allocation10_spill] sm:$0xff] }
 0xc92   :  { %v2124_v61 = vmul.f32 0.5, %v5800_v36  ;;  %2845 = vmatpush.msra.mxu1 %v2814_v58  ;;  %v2813_v22 = vmul.f32 %v2797_v42, %v2125_v1  ;;  %v2795_v45 = vadd.f32 1.0, %v3008_v6  ;;  %v3006_v33 = vclamps-f32 %v2385_v57, 1.0  ;;  %v3436_v62 = vld [vmem:[%s5565_s4 + $0x8] sm:$0xff]  ;;  %v5813_v42 = vld [vmem:[#allocation14_spill] sm:$0xff]  ;;  %v5816_v58 = vld [vmem:[#allocation8_spill] sm:$0xff] }
 0xc93   :  { %vm2221_vm6 = vcmp.eq.f32.partialorder %v5796_v52, 8.507059e+37  ;;  %v2223_v24 = vor.u32 1.1754944e-38, %v5797_v54  ;;  %v5804_v3 = vsel %vm4781_vm0, %v5802_v8, %v5803_v27  ;;  %v2200_v59 = vmul.f32 %v5807_v32, %v5806_v55  ;;  %v5817_v54 = vld [vmem:[#allocation6_spill] sm:$0xff]  ;;  %v2821_v36 = vld [vmem:[%s5570_s3 + $0x8] sm:$0xff] }
 0xc94   :  { %v2184_v44 = vsel %vm5453_vm12, %v5805_v21, %v5804_v3  ;;  %v2265_v20 = vmul.f32 %v2264_v19, %v2240_v13  ;;  %v2123_v10 = vmul.f32 0.5, %v5808_v51  ;;  %2846 = vmatpush.msra.mxu1 %v2813_v22  ;;  %v2812_v14 = vmul.f32 %v2796_v0, %v2124_v61  ;;  %v2820_v13 = vld [vmem:[%s5570_s3] sm:$0xff]  ;;  %v2822_v61 = vld [vmem:[%s5570_s3 + $0x10] sm:$0xff]  ;;  %v2823_v22 = vld [vmem:[%s5570_s3 + $0x18] sm:$0xff] }
 0xc95   :  { %v2224_v18 = vsel %vm2221_vm6, %v2223_v24, %v2219_v5  ;;  %v2794_v37 = vadd.f32 1.0, %v3007_v15  ;;  %v3005_v34 = vclamps-f32 %v2345_v25, 1.0  ;;  %v2160_v46 = vmul.f32 %v5810_v12, %v5809_v60  ;;  %v5818_v8 = vld [vmem:[#allocation3_spill] sm:$0xff]  ;;  %v5819_v55 = vld [vmem:[#allocation2_spill] sm:$0xff]  ;;  %v5820_v51 = vld [vmem:[#allocation4_spill] sm:$0xff] }
 0xc96   :  { %v2122_v53 = vmul.f32 0.5, %v5811_v16  ;;  %v2225_v56 = vmul.f32 %v2224_v18, %v2200_v59  ;;  %2847 = vmatpush.msra.mxu1 %v2812_v14  ;;  %v2811_v47 = vmul.f32 %v2795_v45, %v2123_v10  ;;  %v2793_v35 = vadd.f32 1.0, %v3006_v33  ;;  %v5821_v60 = vld [vmem:[#allocation5_spill] sm:$0xff] }
 0xc97   :  { %v3004_v9 = vclamps-f32 %v2305_v7, 1.0  ;;  %v2185_v29 = vmul.f32 %v2184_v44, %v2160_v46  ;;  %v2121_v63 = vmul.f32 0.5, %v5812_v39  ;;  %v2792_v38 = vadd.f32 1.0, %v3005_v34  ;;  %v3439_v7 = vld [vmem:[%s5565_s4 + $0x18] sm:$0xff] }
 0xc98   :  { %2848 = vmatpush.msra.mxu1 %v2811_v47  ;;  %v2810_v57 = vmul.f32 %v2794_v37, %v2122_v53  ;;  %v3003_v41 = vclamps-f32 %v2265_v20, 1.0  ;;  %v3448_v2 = vmov 5   ;;  %v2120_v6 = vmul.f32 0.5, %v5813_v42 }
 0xc99   :  { %3132 = vset.pattern.permute.xlu0 %v3448_v2  ;;  %3133 = vset.pattern.permute.xlu1 %v3448_v2  ;;  %v2809_v23 = vmul.f32 %v2793_v35, %v2121_v63  ;;  %v2791_v5 = vadd.f32 1.0, %v3004_v9  ;;  %v3002_v11 = vclamps-f32 %v2225_v56, 1.0  ;;  %v2119_v43 = vmul.f32 0.5, %v5814_v26 }
 0xc9a   :  { %2829 = vperm.xlu0 %3132, %v3436_v62   ;;  %2849 = vmatpush.msra.mxu1 %v2810_v57  ;;  %v2808_v48 = vmul.f32 %v2792_v38, %v2120_v6  ;;  %v2790_v19 = vadd.f32 1.0, %v3003_v41  ;;  %v3001_v17 = vclamps-f32 %v2185_v29, 1.0  ;;  %v2118_v49 = vmul.f32 0.5, %v5815_v30 }
 0xc9b   :  { %2833 = vperm.xlu1 %3133, %v3437_v31   ;;  %3131 = vset.pattern.permute.xlu2 %v3448_v2  ;;  %v2807_v1 = vmul.f32 %v2791_v5, %v2119_v43  ;;  %v2789_v25 = vadd.f32 1.0, %v3002_v11  ;;  %v2117_v0 = vmul.f32 0.5, %v5816_v58  ;;  %v2116_v24 = vmul.f32 0.5, %v5817_v54 }
 0xc9c   :  { %2850 = vmatpush.msra.mxu1 %v2809_v23  ;;  %2825 = vperm.xlu2 %3131, %v3438_v28   ;;  %v2806_v15 = vmul.f32 %v2790_v19, %v2118_v49  ;;  %v2788_v52 = vadd.f32 1.0, %v3001_v17 }
 0xc9d   :  { %v2805_v50 = vmul.f32 %v2789_v25, %v2117_v0 }
 0xc9e   :  { %2851 = vmatpush.msra.mxu1 %v2808_v48  ;;  %v2804_v4 = vmul.f32 %v2788_v52, %v2116_v24 }
 0xca0   :  { %2852 = vmatpush.msra.mxu1 %v2807_v1 }
 0xca2   :  { %2853 = vmatpush.msra.mxu1 %v2806_v15 }
 0xca4   :  { %2854 = vmatpush.msra.mxu1 %v2805_v50  ;;  %2837 = vperm.xlu2 %3131, %v3439_v7  }
 0xca6   :  { %2855 = vmatpush.msra.mxu1 %v2804_v4 }
 0xca7   :  { %2856 = vmatmul.f32.vlgmr.msra.gmra.mxu1 %v2820_v13 }
 0xcaf   :  { %2859 = vmatmul.f32.gmra.mxu1 %v2821_v36 }
 0xcb7   :  { %2862 = vmatmul.f32.gmra.mxu1 %v2822_v61 }
 0xcbf   :  { %2865 = vmatmul.f32.gmra.mxu1 %v2823_v22 }
 0xcf6   :  { %v2826_v45 = vpop.permute.xlu2 %2825 }
 0xcfe   :  { %v2838_v14 = vpop.permute.xlu2 %2837 }
 0xd0c   :  { %v2830_v3 = vpop.permute.xlu0 %2829 }
 0xd0d   :  { %v2834_v59 = vpop.permute.xlu1 %2833 }
 0xd24   :  { %v2857_v33 = vpop.f32.mrf.mxu1 }
 0xd25   :  { %v2858_v40 = vadd.f32 %v2857_v33, %v2826_v45 }
 0xd27   :  { %v2869_v27 = vadd.f32 %v2858_v40, %v5818_v8 }
 0xd29   :  { %2873 = vst [vmem:[%s5571_s6] sm:$0xff] %v2869_v27 }
 0xd2c   :  { %v2860_v21 = vpop.f32.mrf.mxu1 }
 0xd2d   :  { %v2861_v44 = vadd.f32 %v2860_v21, %v2830_v3 }
 0xd2f   :  { %v2870_v32 = vadd.f32 %v2861_v44, %v5819_v55 }
 0xd31   :  { %2874 = vst [vmem:[%s5571_s6 + $0x8] sm:$0xff] %v2870_v32 }
 0xd34   :  { %v2863_v18 = vpop.f32.mrf.mxu1 }
 0xd35   :  { %v2864_v20 = vadd.f32 %v2863_v18, %v2834_v59 }
 0xd37   :  { %v2871_v10 = vadd.f32 %v2864_v20, %v5820_v51 }
 0xd39   :  { %2875 = vst [vmem:[%s5571_s6 + $0x10] sm:$0xff] %v2871_v10 }
 0xd3c   :  { %v2866_v37 = vpop.f32.mrf.mxu1 }
 0xd3d   :  { %v2867_v34 = vadd.f32 %v2866_v37, %v2838_v14 }
 0xd3f   :  { %v2872_v12 = vadd.f32 %v2867_v34, %v5821_v60 }
 0xd41   :  { %2876 = vst [vmem:[%s5571_s6 + $0x18] sm:$0xff] %v2872_v12 }

</bundles_post_ra>
